<compile_context>
chip_gen: v5e
topology: v5e:2x2
jax: 0.10.0
libtpu: 0.0.40
codegen_flags: <defaults>
</compile_context>

<pallas_src>
import numpy as np

import jax
import jax.numpy as jnp
from jax.experimental import pallas as pl
from jax.experimental.pallas import tpu as pltpu

NUM_CLASSES = 10
OUT_PAD = 128          # lane-dense (padded) logits width; sliced to 10 outside
N_HALF = 128           # lane-aligned width of each parity half of conv outputs


# ----------------------------------------------------------------------------
# Fused forward kernel: one grid step = block_b images, everything in VMEM.
# Activation layout everywhere: [H, tb, W*C(padded)]  (H-major, lane-dense).
# ----------------------------------------------------------------------------
def _netcifar_kernel(x_ref, t1_ref, b1_ref, t2_ref, b2_ref,
                     fw1_ref, fb1_ref, fw2_ref, fb2_ref, fw3_ref, fb3_ref,
                     out_ref):
    f32 = jnp.float32
    cd = t1_ref.dtype                       # matmul operand dtype (bf16 by default)
    tb = x_ref.shape[1]                     # batch tile (multiple of 8)

    def conv_relu_pool(act_cd, t_ref, b_ref, out_h):
        """act_cd: [in_h, tb, K] (compute dtype) -> [out_h//2, tb, 128] f32.

        Valid 5x5 conv as 5 shifted MXU matmuls against block-Toeplitz weights
        (t_ref[kh]: [K, 256]; columns = (ow parity half, ow//2, c_out), each
        half zero-padded to 128 lanes), then bias + ReLU + fused 2x2 stride-2
        max pool.  All slices/reshapes below are layout-preserving views."""
        k_dim = act_cd.shape[-1]
        acc = None
        for kh in range(5):
            # H-major: contiguous row window; reshape merges (out_h, tb) sublanes.
            lhs = act_cd[kh:kh + out_h].reshape(out_h * tb, k_dim)
            part = jnp.dot(lhs, t_ref[kh], preferred_element_type=f32)
            acc = part if acc is None else acc + part
        # Bias is per-channel only, tiled per output column at prep time; pad
        # lanes have zero weight+bias so they stay exactly 0 through ReLU/pool.
        acc = jnp.maximum(acc + b_ref[...], 0.0)              # [out_h*tb, 256]
        # W-pool: even/odd output columns are the two 128-lane halves (vreg-aligned).
        pw = jnp.maximum(acc[:, :N_HALF], acc[:, N_HALF:])    # [out_h*tb, 128]
        # H-pool: max of two contiguous tb-row blocks (sublane-aligned, pure VPU).
        pw = pw.reshape(out_h // 2, 2 * tb, N_HALF)
        return jnp.maximum(pw[:, :tb, :], pw[:, tb:, :])      # [out_h//2, tb, 128]

    x = x_ref[...].astype(cd)                                 # [32, tb, 96]
    h = conv_relu_pool(x, t1_ref, b1_ref, 28)                 # [14, tb, 128]
    h = conv_relu_pool(h.astype(cd), t2_ref, b2_ref, 10)      # [5, tb, 128]
    h = h.astype(cd)                                          # one cast per layer

    # fc1: contract over (spatial row, W*C); fw1 rows were pre-permuted so this
    # exactly reproduces PyTorch's x.view(-1, 16*5*5) (NCHW flatten) order.
    z = None
    for r in range(5):
        part = jnp.dot(h[r], fw1_ref[r], preferred_element_type=f32)
        z = part if z is None else z + part
    z = jnp.maximum(z + fb1_ref[...], 0.0)                    # [tb, 128]
    z = jnp.maximum(jnp.dot(z.astype(cd), fw2_ref[...],
                            preferred_element_type=f32) + fb2_ref[...], 0.0)
    z = jnp.dot(z.astype(cd), fw3_ref[...],
                preferred_element_type=f32) + fb3_ref[...]    # [tb, 128], cols 10.. == 0
    out_ref[...] = z.astype(out_ref.dtype)


# ----------------------------------------------------------------------------
# One-time parameter preparation (padded Toeplitz conv weights, permuted FC).
# ----------------------------------------------------------------------------
def prepare_params(params, compute_dtype=jnp.bfloat16):
    def conv_toeplitz(w_oihw, in_w, k_rows):
        # w: [Cout, Cin, 5, 5] (PyTorch) -> [5, k_rows, 256].
        # Rows match the (W, C) lane packing of the input (rows >= in_w*Cin are
        # zero pad).  Columns: parity half (even/odd ow) * 128 + (ow//2)*Cout +
        # Cout, each half zero-padded to 128 lanes.
        w = np.asarray(w_oihw, np.float32)
        co, ci, k, _ = w.shape
        out_w = in_w - k + 1
        half = out_w // 2
        t = np.zeros((k, k_rows, 2 * N_HALF), np.float32)
        for parity in range(2):
            for j in range(half):
                ow = 2 * j + parity
                col0 = parity * N_HALF + j * co
                for kw in range(k):
                    w_in = ow + kw
                    t[:, w_in * ci:(w_in + 1) * ci, col0:col0 + co] = (
                        np.transpose(w[:, :, :, kw], (2, 1, 0)))
        return t

    def conv_bias(b, out_w):
        # Per-channel bias tiled per pooled output column, zero-padded per half.
        b = np.asarray(b, np.float32)
        half = np.pad(np.tile(b, out_w // 2), (0, N_HALF - (out_w // 2) * b.size))
        return np.concatenate([half, half])[None, :]          # [1, 256]

    cd = compute_dtype
    q = {}
    # conv1: input rows W*C = 32*3 = 96; output 28 wide x 6 channels.
    q["t1"] = jnp.asarray(conv_toeplitz(params["conv1_w"], 32, 96), cd)    # [5, 96, 256]
    q["b1"] = jnp.asarray(conv_bias(params["conv1_b"], 28))                # [1, 256]
    # conv2: input 14*6 = 84 real rows, padded to K=128; output 10 wide x 16 ch.
    q["t2"] = jnp.asarray(conv_toeplitz(params["conv2_w"], 14, 128), cd)   # [5, 128, 256]
    q["b2"] = jnp.asarray(conv_bias(params["conv2_b"], 10))                # [1, 256]
    # fc1: fold the NCHW flatten permutation in; split by spatial row h; pad
    # rows 80->128 (zero) and cols 120->128 (zero).
    fc1 = np.asarray(params["fc1_w"], np.float32)          # [120, 400], torch idx c*25+h*5+w
    t_fc1 = np.zeros((5, 128, OUT_PAD), np.float32)
    for hh in range(5):
        for ww in range(5):
            for cc in range(16):
                t_fc1[hh, ww * 16 + cc, :120] = fc1[:, cc * 25 + hh * 5 + ww]
    q["fw1"] = jnp.asarray(t_fc1, cd)                                      # [5, 128, 128]
    q["fb1"] = jnp.asarray(np.pad(np.asarray(params["fc1_b"], np.float32), (0, 8))[None, :])
    q["fw2"] = jnp.asarray(np.pad(np.asarray(params["fc2_w"], np.float32).T,
                                  ((0, 8), (0, 44))), cd)                  # [128, 128]
    q["fb2"] = jnp.asarray(np.pad(np.asarray(params["fc2_b"], np.float32), (0, 44))[None, :])
    q["fw3"] = jnp.asarray(np.pad(np.asarray(params["fc3_w"], np.float32).T,
                                  ((0, 44), (0, 118))), cd)                # [128, 128]
    q["fb3"] = jnp.asarray(np.pad(np.asarray(params["fc3_b"], np.float32), (0, 118))[None, :])
    return q


# ----------------------------------------------------------------------------
# Forward pass wrapper (single pallas_call, batch-tiled grid, H-major input).
# ----------------------------------------------------------------------------
def net_cifar_forward(prepped, x_nchw, *, block_b=128):
    cd = prepped["t1"].dtype
    B = x_nchw.shape[0]
    assert x_nchw.shape[1:] == (3, 32, 32)
    # Effective batch tile: default 128 (good on v5e/v6e/v7x; use 256 on v6e for
    # a full 256-row MXU tile), clamped for small batches to limit pad waste.
    bb = max(8, (min(block_b, ((B + 7) // 8) * 8) // 8) * 8)
    assert bb % 8 == 0
    bp = ((B + bb - 1) // bb) * bb

    # NCHW -> H-major rows=(H, batch), lanes=(W, C); stream in compute dtype.
    x = jnp.transpose(x_nchw, (2, 0, 3, 1)).reshape(32, B, 96).astype(cd)
    if bp != B:
        x = jnp.pad(x, ((0, 0), (0, bp - B), (0, 0)))

    order = ("t1", "b1", "t2", "b2", "fw1", "fb1", "fw2", "fb2", "fw3", "fb3")
    args = [prepped[k] for k in order]

    in_specs = [pl.BlockSpec((32, bb, 96), lambda i: (0, i, 0))]
    for arr in args:  # weights/biases: one full-array block, resident across steps
        in_specs.append(pl.BlockSpec(arr.shape, lambda i, n=arr.ndim: (0,) * n))

    flops = 2 * bp * (5 * 28 * 96 * 2 * N_HALF + 5 * 10 * 128 * 2 * N_HALF
                      + 5 * 128 * OUT_PAD + 2 * OUT_PAD * OUT_PAD)
    bytes_accessed = (int(x.size) * x.dtype.itemsize + bp * OUT_PAD * 4
                      + sum(int(a.size) * a.dtype.itemsize for a in args))
    vmem_limit = (48 if bb > 128 else 32) * 1024 * 1024   # keep <=48 MiB for v7x

    out = pl.pallas_call(
        _netcifar_kernel,
        out_shape=jax.ShapeDtypeStruct((bp, OUT_PAD), jnp.float32),
        grid=(bp // bb,),
        in_specs=in_specs,
        out_specs=pl.BlockSpec((bb, OUT_PAD), lambda i: (i, 0)),
        compiler_params=pltpu.CompilerParams(
            dimension_semantics=("parallel",),
            vmem_limit_bytes=vmem_limit,
        ),
        cost_estimate=pl.CostEstimate(flops=flops, transcendentals=0,
                                      bytes_accessed=bytes_accessed),
    )(x, *args)
    return out[:B, :NUM_CLASSES]


# ----------------------------------------------------------------------------
# Parameters (deterministic, PyTorch-default-style uniform init, torch layout)
# ----------------------------------------------------------------------------
def init_params(key):
    def uniform(k, shape, fan_in):
        bound = 1.0 / jnp.sqrt(float(fan_in))
        return jax.random.uniform(k, shape, jnp.float32, -bound, bound)

    keys = jax.random.split(key, 10)
    p = {}
    p["conv1_w"] = uniform(keys[0], (6, 3, 5, 5), 3 * 5 * 5)
    p["conv1_b"] = uniform(keys[1], (6,), 3 * 5 * 5)
    p["conv2_w"] = uniform(keys[2], (16, 6, 5, 5), 6 * 5 * 5)
    p["conv2_b"] = uniform(keys[3], (16,), 6 * 5 * 5)
    p["fc1_w"] = uniform(keys[4], (120, 400), 400)
    p["fc1_b"] = uniform(keys[5], (120,), 400)
    p["fc2_w"] = uniform(keys[6], (84, 120), 120)
    p["fc2_b"] = uniform(keys[7], (84,), 120)
    p["fc3_w"] = uniform(keys[8], (10, 84), 84)
    p["fc3_b"] = uniform(keys[9], (10,), 84)
    return p


# Pure-JAX reference of the PyTorch module (numerical sanity check).
def net_cifar_reference(params, x):
    def conv(y, w, b):
        y = jax.lax.conv_general_dilated(y, w, (1, 1), "VALID",
                                         dimension_numbers=("NCHW", "OIHW", "NCHW"))
        return y + b.reshape(1, -1, 1, 1)

    def pool(y):
        return jax.lax.reduce_window(y, -jnp.inf, jax.lax.max,
                                     (1, 1, 2, 2), (1, 1, 2, 2), "VALID")

    x = pool(jax.nn.relu(conv(x, params["conv1_w"], params["conv1_b"])))
    x = pool(jax.nn.relu(conv(x, params["conv2_w"], params["conv2_b"])))
    x = x.reshape(x.shape[0], -1)
    x = jax.nn.relu(x @ params["fc1_w"].T + params["fc1_b"])
    x = jax.nn.relu(x @ params["fc2_w"].T + params["fc2_b"])
    return x @ params["fc3_w"].T + params["fc3_b"]


if __name__ == "__main__":
    key = jax.random.PRNGKey(0)
    pkey, xkey = jax.random.split(key)
    params = init_params(pkey)
    prepped = prepare_params(params)                 # one-time weight prep (not in hot path)
    x = jax.random.normal(xkey, (32, 3, 32, 32), dtype=jnp.float32)

    # Small test batch: use a 16-image tile so the grid has 2 (even) steps and
    # the pipelined / megacore-parallel path is exercised.
    fwd = jax.jit(lambda p, xx: net_cifar_forward(p, xx, block_b=16))
    out = jax.block_until_ready(fwd(prepped, x))
    assert out.shape == (32, NUM_CLASSES)
    assert out.dtype == jnp.float32

    ref = jax.block_until_ready(jax.jit(net_cifar_reference)(params, x))
    err = float(jnp.max(jnp.abs(out - ref)))
    assert err < 0.2, f"kernel deviates from reference by {err}"
    print("KERNEL_OK")
</pallas_src>

<mosaic_0001>
module attributes {stable_mosaic.version = 11 : i64} {
  func.func @_netcifar_kernel(%arg0: i32, %arg1: memref<32x16x96xbf16, #tpu.memory_space<vmem>>, %arg2: memref<5x96x256xbf16, #tpu.memory_space<vmem>>, %arg3: memref<1x256xf32, #tpu.memory_space<vmem>>, %arg4: memref<5x128x256xbf16, #tpu.memory_space<vmem>>, %arg5: memref<1x256xf32, #tpu.memory_space<vmem>>, %arg6: memref<5x128x128xbf16, #tpu.memory_space<vmem>>, %arg7: memref<1x128xf32, #tpu.memory_space<vmem>>, %arg8: memref<128x128xbf16, #tpu.memory_space<vmem>>, %arg9: memref<1x128xf32, #tpu.memory_space<vmem>>, %arg10: memref<128x128xbf16, #tpu.memory_space<vmem>>, %arg11: memref<1x128xf32, #tpu.memory_space<vmem>>, %arg12: memref<16x128xf32, #tpu.memory_space<vmem>>) attributes {dimension_semantics = [#tpu.dimension_semantics<parallel>], iteration_bounds = array<i64: 2>, scalar_prefetch = 0 : i64, scratch_operands = 0 : i64, tpu.core_type = #tpu.core_type<tc>, window_params = [{transform_indices = @transform_0, window_bounds = array<i64: 32, 16, 96>}, {pipeline_mode = #tpu.pipeline_mode<synchronous>, transform_indices = @transform_1, window_bounds = array<i64: 5, 96, 256>}, {pipeline_mode = #tpu.pipeline_mode<synchronous>, transform_indices = @transform_2, window_bounds = array<i64: 1, 256>}, {pipeline_mode = #tpu.pipeline_mode<synchronous>, transform_indices = @transform_3, window_bounds = array<i64: 5, 128, 256>}, {pipeline_mode = #tpu.pipeline_mode<synchronous>, transform_indices = @transform_4, window_bounds = array<i64: 1, 256>}, {pipeline_mode = #tpu.pipeline_mode<synchronous>, transform_indices = @transform_5, window_bounds = array<i64: 5, 128, 128>}, {pipeline_mode = #tpu.pipeline_mode<synchronous>, transform_indices = @transform_6, window_bounds = array<i64: 1, 128>}, {pipeline_mode = #tpu.pipeline_mode<synchronous>, transform_indices = @transform_7, window_bounds = array<i64: 128, 128>}, {pipeline_mode = #tpu.pipeline_mode<synchronous>, transform_indices = @transform_8, window_bounds = array<i64: 1, 128>}, {pipeline_mode = #tpu.pipeline_mode<synchronous>, transform_indices = @transform_9, window_bounds = array<i64: 128, 128>}, {pipeline_mode = #tpu.pipeline_mode<synchronous>, transform_indices = @transform_10, window_bounds = array<i64: 1, 128>}, {transform_indices = @transform_11, window_bounds = array<i64: 16, 128>}]} {
    %c0 = arith.constant 0 : index
    %c0_0 = arith.constant 0 : index
    %c0_1 = arith.constant 0 : index
    %0 = vector.load %arg1[%c0, %c0_0, %c0_1] : memref<32x16x96xbf16, #tpu.memory_space<vmem>>, vector<32x16x96xbf16>
    %1 = vector.extract_strided_slice %0 {offsets = [0, 0, 0], sizes = [28, 16, 96], strides = [1, 1, 1]} : vector<32x16x96xbf16> to vector<28x16x96xbf16>
    %2 = vector.shape_cast %1 : vector<28x16x96xbf16> to vector<448x96xbf16>
    %c0_2 = arith.constant 0 : index
    %c0_3 = arith.constant 0 : index
    %c0_4 = arith.constant 0 : index
    %3 = vector.load %arg2[%c0_2, %c0_3, %c0_4] : memref<5x96x256xbf16, #tpu.memory_space<vmem>>, vector<1x96x256xbf16>
    %4 = vector.shape_cast %3 : vector<1x96x256xbf16> to vector<96x256xbf16>
    %cst = arith.constant dense<0.000000e+00> : vector<448x256xf32>
    %5 = tpu.matmul %2, %4, %cst {dimension_numbers = #tpu.dot_dimension_numbers<[1], [0], [0], [1], [0, 0, 1, 1], [], []>} : vector<448x96xbf16>, vector<96x256xbf16>, vector<448x256xf32> -> vector<448x256xf32>
    %6 = vector.extract_strided_slice %0 {offsets = [1, 0, 0], sizes = [28, 16, 96], strides = [1, 1, 1]} : vector<32x16x96xbf16> to vector<28x16x96xbf16>
    %7 = vector.shape_cast %6 : vector<28x16x96xbf16> to vector<448x96xbf16>
    %c1 = arith.constant 1 : index
    %c0_5 = arith.constant 0 : index
    %c0_6 = arith.constant 0 : index
    %8 = vector.load %arg2[%c1, %c0_5, %c0_6] : memref<5x96x256xbf16, #tpu.memory_space<vmem>>, vector<1x96x256xbf16>
    %9 = vector.shape_cast %8 : vector<1x96x256xbf16> to vector<96x256xbf16>
    %cst_7 = arith.constant dense<0.000000e+00> : vector<448x256xf32>
    %10 = tpu.matmul %7, %9, %cst_7 {dimension_numbers = #tpu.dot_dimension_numbers<[1], [0], [0], [1], [0, 0, 1, 1], [], []>} : vector<448x96xbf16>, vector<96x256xbf16>, vector<448x256xf32> -> vector<448x256xf32>
    %11 = arith.addf %5, %10 : vector<448x256xf32>
    %12 = vector.extract_strided_slice %0 {offsets = [2, 0, 0], sizes = [28, 16, 96], strides = [1, 1, 1]} : vector<32x16x96xbf16> to vector<28x16x96xbf16>
    %13 = vector.shape_cast %12 : vector<28x16x96xbf16> to vector<448x96xbf16>
    %c2 = arith.constant 2 : index
    %c0_8 = arith.constant 0 : index
    %c0_9 = arith.constant 0 : index
    %14 = vector.load %arg2[%c2, %c0_8, %c0_9] : memref<5x96x256xbf16, #tpu.memory_space<vmem>>, vector<1x96x256xbf16>
    %15 = vector.shape_cast %14 : vector<1x96x256xbf16> to vector<96x256xbf16>
    %cst_10 = arith.constant dense<0.000000e+00> : vector<448x256xf32>
    %16 = tpu.matmul %13, %15, %cst_10 {dimension_numbers = #tpu.dot_dimension_numbers<[1], [0], [0], [1], [0, 0, 1, 1], [], []>} : vector<448x96xbf16>, vector<96x256xbf16>, vector<448x256xf32> -> vector<448x256xf32>
    %17 = arith.addf %11, %16 : vector<448x256xf32>
    %18 = vector.extract_strided_slice %0 {offsets = [3, 0, 0], sizes = [28, 16, 96], strides = [1, 1, 1]} : vector<32x16x96xbf16> to vector<28x16x96xbf16>
    %19 = vector.shape_cast %18 : vector<28x16x96xbf16> to vector<448x96xbf16>
    %c3 = arith.constant 3 : index
    %c0_11 = arith.constant 0 : index
    %c0_12 = arith.constant 0 : index
    %20 = vector.load %arg2[%c3, %c0_11, %c0_12] : memref<5x96x256xbf16, #tpu.memory_space<vmem>>, vector<1x96x256xbf16>
    %21 = vector.shape_cast %20 : vector<1x96x256xbf16> to vector<96x256xbf16>
    %cst_13 = arith.constant dense<0.000000e+00> : vector<448x256xf32>
    %22 = tpu.matmul %19, %21, %cst_13 {dimension_numbers = #tpu.dot_dimension_numbers<[1], [0], [0], [1], [0, 0, 1, 1], [], []>} : vector<448x96xbf16>, vector<96x256xbf16>, vector<448x256xf32> -> vector<448x256xf32>
    %23 = arith.addf %17, %22 : vector<448x256xf32>
    %24 = vector.extract_strided_slice %0 {offsets = [4, 0, 0], sizes = [28, 16, 96], strides = [1, 1, 1]} : vector<32x16x96xbf16> to vector<28x16x96xbf16>
    %25 = vector.shape_cast %24 : vector<28x16x96xbf16> to vector<448x96xbf16>
    %c4 = arith.constant 4 : index
    %c0_14 = arith.constant 0 : index
    %c0_15 = arith.constant 0 : index
    %26 = vector.load %arg2[%c4, %c0_14, %c0_15] : memref<5x96x256xbf16, #tpu.memory_space<vmem>>, vector<1x96x256xbf16>
    %27 = vector.shape_cast %26 : vector<1x96x256xbf16> to vector<96x256xbf16>
    %cst_16 = arith.constant dense<0.000000e+00> : vector<448x256xf32>
    %28 = tpu.matmul %25, %27, %cst_16 {dimension_numbers = #tpu.dot_dimension_numbers<[1], [0], [0], [1], [0, 0, 1, 1], [], []>} : vector<448x96xbf16>, vector<96x256xbf16>, vector<448x256xf32> -> vector<448x256xf32>
    %29 = arith.addf %23, %28 : vector<448x256xf32>
    %c0_17 = arith.constant 0 : index
    %c0_18 = arith.constant 0 : index
    %30 = vector.load %arg3[%c0_17, %c0_18] : memref<1x256xf32, #tpu.memory_space<vmem>>, vector<1x256xf32>
    %31 = vector.broadcast %30 : vector<1x256xf32> to vector<448x256xf32>
    %32 = arith.addf %29, %31 : vector<448x256xf32>
    %cst_19 = arith.constant 0.000000e+00 : f32
    %33 = vector.broadcast %cst_19 : f32 to vector<448x256xf32>
    %34 = arith.maximumf %32, %33 : vector<448x256xf32>
    %35 = vector.extract_strided_slice %34 {offsets = [0, 0], sizes = [448, 128], strides = [1, 1]} : vector<448x256xf32> to vector<448x128xf32>
    %36 = vector.extract_strided_slice %34 {offsets = [0, 128], sizes = [448, 128], strides = [1, 1]} : vector<448x256xf32> to vector<448x128xf32>
    %37 = arith.maximumf %35, %36 : vector<448x128xf32>
    %38 = vector.shape_cast %37 : vector<448x128xf32> to vector<14x32x128xf32>
    %39 = vector.extract_strided_slice %38 {offsets = [0, 0, 0], sizes = [14, 16, 128], strides = [1, 1, 1]} : vector<14x32x128xf32> to vector<14x16x128xf32>
    %40 = vector.extract_strided_slice %38 {offsets = [0, 16, 0], sizes = [14, 16, 128], strides = [1, 1, 1]} : vector<14x32x128xf32> to vector<14x16x128xf32>
    %41 = arith.maximumf %39, %40 : vector<14x16x128xf32>
    %42 = arith.truncf %41 : vector<14x16x128xf32> to vector<14x16x128xbf16>
    %43 = vector.extract_strided_slice %42 {offsets = [0, 0, 0], sizes = [10, 16, 128], strides = [1, 1, 1]} : vector<14x16x128xbf16> to vector<10x16x128xbf16>
    %44 = vector.shape_cast %43 : vector<10x16x128xbf16> to vector<160x128xbf16>
    %c0_20 = arith.constant 0 : index
    %c0_21 = arith.constant 0 : index
    %c0_22 = arith.constant 0 : index
    %45 = vector.load %arg4[%c0_20, %c0_21, %c0_22] : memref<5x128x256xbf16, #tpu.memory_space<vmem>>, vector<1x128x256xbf16>
    %46 = vector.shape_cast %45 : vector<1x128x256xbf16> to vector<128x256xbf16>
    %cst_23 = arith.constant dense<0.000000e+00> : vector<160x256xf32>
    %47 = tpu.matmul %44, %46, %cst_23 {dimension_numbers = #tpu.dot_dimension_numbers<[1], [0], [0], [1], [0, 0, 1, 1], [], []>} : vector<160x128xbf16>, vector<128x256xbf16>, vector<160x256xf32> -> vector<160x256xf32>
    %48 = vector.extract_strided_slice %42 {offsets = [1, 0, 0], sizes = [10, 16, 128], strides = [1, 1, 1]} : vector<14x16x128xbf16> to vector<10x16x128xbf16>
    %49 = vector.shape_cast %48 : vector<10x16x128xbf16> to vector<160x128xbf16>
    %c1_24 = arith.constant 1 : index
    %c0_25 = arith.constant 0 : index
    %c0_26 = arith.constant 0 : index
    %50 = vector.load %arg4[%c1_24, %c0_25, %c0_26] : memref<5x128x256xbf16, #tpu.memory_space<vmem>>, vector<1x128x256xbf16>
    %51 = vector.shape_cast %50 : vector<1x128x256xbf16> to vector<128x256xbf16>
    %cst_27 = arith.constant dense<0.000000e+00> : vector<160x256xf32>
    %52 = tpu.matmul %49, %51, %cst_27 {dimension_numbers = #tpu.dot_dimension_numbers<[1], [0], [0], [1], [0, 0, 1, 1], [], []>} : vector<160x128xbf16>, vector<128x256xbf16>, vector<160x256xf32> -> vector<160x256xf32>
    %53 = arith.addf %47, %52 : vector<160x256xf32>
    %54 = vector.extract_strided_slice %42 {offsets = [2, 0, 0], sizes = [10, 16, 128], strides = [1, 1, 1]} : vector<14x16x128xbf16> to vector<10x16x128xbf16>
    %55 = vector.shape_cast %54 : vector<10x16x128xbf16> to vector<160x128xbf16>
    %c2_28 = arith.constant 2 : index
    %c0_29 = arith.constant 0 : index
    %c0_30 = arith.constant 0 : index
    %56 = vector.load %arg4[%c2_28, %c0_29, %c0_30] : memref<5x128x256xbf16, #tpu.memory_space<vmem>>, vector<1x128x256xbf16>
    %57 = vector.shape_cast %56 : vector<1x128x256xbf16> to vector<128x256xbf16>
    %cst_31 = arith.constant dense<0.000000e+00> : vector<160x256xf32>
    %58 = tpu.matmul %55, %57, %cst_31 {dimension_numbers = #tpu.dot_dimension_numbers<[1], [0], [0], [1], [0, 0, 1, 1], [], []>} : vector<160x128xbf16>, vector<128x256xbf16>, vector<160x256xf32> -> vector<160x256xf32>
    %59 = arith.addf %53, %58 : vector<160x256xf32>
    %60 = vector.extract_strided_slice %42 {offsets = [3, 0, 0], sizes = [10, 16, 128], strides = [1, 1, 1]} : vector<14x16x128xbf16> to vector<10x16x128xbf16>
    %61 = vector.shape_cast %60 : vector<10x16x128xbf16> to vector<160x128xbf16>
    %c3_32 = arith.constant 3 : index
    %c0_33 = arith.constant 0 : index
    %c0_34 = arith.constant 0 : index
    %62 = vector.load %arg4[%c3_32, %c0_33, %c0_34] : memref<5x128x256xbf16, #tpu.memory_space<vmem>>, vector<1x128x256xbf16>
    %63 = vector.shape_cast %62 : vector<1x128x256xbf16> to vector<128x256xbf16>
    %cst_35 = arith.constant dense<0.000000e+00> : vector<160x256xf32>
    %64 = tpu.matmul %61, %63, %cst_35 {dimension_numbers = #tpu.dot_dimension_numbers<[1], [0], [0], [1], [0, 0, 1, 1], [], []>} : vector<160x128xbf16>, vector<128x256xbf16>, vector<160x256xf32> -> vector<160x256xf32>
    %65 = arith.addf %59, %64 : vector<160x256xf32>
    %66 = vector.extract_strided_slice %42 {offsets = [4, 0, 0], sizes = [10, 16, 128], strides = [1, 1, 1]} : vector<14x16x128xbf16> to vector<10x16x128xbf16>
    %67 = vector.shape_cast %66 : vector<10x16x128xbf16> to vector<160x128xbf16>
    %c4_36 = arith.constant 4 : index
    %c0_37 = arith.constant 0 : index
    %c0_38 = arith.constant 0 : index
    %68 = vector.load %arg4[%c4_36, %c0_37, %c0_38] : memref<5x128x256xbf16, #tpu.memory_space<vmem>>, vector<1x128x256xbf16>
    %69 = vector.shape_cast %68 : vector<1x128x256xbf16> to vector<128x256xbf16>
    %cst_39 = arith.constant dense<0.000000e+00> : vector<160x256xf32>
    %70 = tpu.matmul %67, %69, %cst_39 {dimension_numbers = #tpu.dot_dimension_numbers<[1], [0], [0], [1], [0, 0, 1, 1], [], []>} : vector<160x128xbf16>, vector<128x256xbf16>, vector<160x256xf32> -> vector<160x256xf32>
    %71 = arith.addf %65, %70 : vector<160x256xf32>
    %c0_40 = arith.constant 0 : index
    %c0_41 = arith.constant 0 : index
    %72 = vector.load %arg5[%c0_40, %c0_41] : memref<1x256xf32, #tpu.memory_space<vmem>>, vector<1x256xf32>
    %73 = vector.broadcast %72 : vector<1x256xf32> to vector<160x256xf32>
    %74 = arith.addf %71, %73 : vector<160x256xf32>
    %cst_42 = arith.constant 0.000000e+00 : f32
    %75 = vector.broadcast %cst_42 : f32 to vector<160x256xf32>
    %76 = arith.maximumf %74, %75 : vector<160x256xf32>
    %77 = vector.extract_strided_slice %76 {offsets = [0, 0], sizes = [160, 128], strides = [1, 1]} : vector<160x256xf32> to vector<160x128xf32>
    %78 = vector.extract_strided_slice %76 {offsets = [0, 128], sizes = [160, 128], strides = [1, 1]} : vector<160x256xf32> to vector<160x128xf32>
    %79 = arith.maximumf %77, %78 : vector<160x128xf32>
    %80 = vector.shape_cast %79 : vector<160x128xf32> to vector<5x32x128xf32>
    %81 = vector.extract_strided_slice %80 {offsets = [0, 0, 0], sizes = [5, 16, 128], strides = [1, 1, 1]} : vector<5x32x128xf32> to vector<5x16x128xf32>
    %82 = vector.extract_strided_slice %80 {offsets = [0, 16, 0], sizes = [5, 16, 128], strides = [1, 1, 1]} : vector<5x32x128xf32> to vector<5x16x128xf32>
    %83 = arith.maximumf %81, %82 : vector<5x16x128xf32>
    %84 = arith.truncf %83 : vector<5x16x128xf32> to vector<5x16x128xbf16>
    %85 = vector.extract_strided_slice %84 {offsets = [0, 0, 0], sizes = [1, 16, 128], strides = [1, 1, 1]} : vector<5x16x128xbf16> to vector<1x16x128xbf16>
    %86 = vector.shape_cast %85 : vector<1x16x128xbf16> to vector<16x128xbf16>
    %c0_43 = arith.constant 0 : index
    %c0_44 = arith.constant 0 : index
    %c0_45 = arith.constant 0 : index
    %87 = vector.load %arg6[%c0_43, %c0_44, %c0_45] : memref<5x128x128xbf16, #tpu.memory_space<vmem>>, vector<1x128x128xbf16>
    %88 = vector.shape_cast %87 : vector<1x128x128xbf16> to vector<128x128xbf16>
    %cst_46 = arith.constant dense<0.000000e+00> : vector<16x128xf32>
    %89 = tpu.matmul %86, %88, %cst_46 {dimension_numbers = #tpu.dot_dimension_numbers<[1], [0], [0], [1], [0, 0, 1, 1], [], []>} : vector<16x128xbf16>, vector<128x128xbf16>, vector<16x128xf32> -> vector<16x128xf32>
    %90 = vector.extract_strided_slice %84 {offsets = [1, 0, 0], sizes = [1, 16, 128], strides = [1, 1, 1]} : vector<5x16x128xbf16> to vector<1x16x128xbf16>
    %91 = vector.shape_cast %90 : vector<1x16x128xbf16> to vector<16x128xbf16>
    %c1_47 = arith.constant 1 : index
    %c0_48 = arith.constant 0 : index
    %c0_49 = arith.constant 0 : index
    %92 = vector.load %arg6[%c1_47, %c0_48, %c0_49] : memref<5x128x128xbf16, #tpu.memory_space<vmem>>, vector<1x128x128xbf16>
    %93 = vector.shape_cast %92 : vector<1x128x128xbf16> to vector<128x128xbf16>
    %cst_50 = arith.constant dense<0.000000e+00> : vector<16x128xf32>
    %94 = tpu.matmul %91, %93, %cst_50 {dimension_numbers = #tpu.dot_dimension_numbers<[1], [0], [0], [1], [0, 0, 1, 1], [], []>} : vector<16x128xbf16>, vector<128x128xbf16>, vector<16x128xf32> -> vector<16x128xf32>
    %95 = arith.addf %89, %94 : vector<16x128xf32>
    %96 = vector.extract_strided_slice %84 {offsets = [2, 0, 0], sizes = [1, 16, 128], strides = [1, 1, 1]} : vector<5x16x128xbf16> to vector<1x16x128xbf16>
    %97 = vector.shape_cast %96 : vector<1x16x128xbf16> to vector<16x128xbf16>
    %c2_51 = arith.constant 2 : index
    %c0_52 = arith.constant 0 : index
    %c0_53 = arith.constant 0 : index
    %98 = vector.load %arg6[%c2_51, %c0_52, %c0_53] : memref<5x128x128xbf16, #tpu.memory_space<vmem>>, vector<1x128x128xbf16>
    %99 = vector.shape_cast %98 : vector<1x128x128xbf16> to vector<128x128xbf16>
    %cst_54 = arith.constant dense<0.000000e+00> : vector<16x128xf32>
    %100 = tpu.matmul %97, %99, %cst_54 {dimension_numbers = #tpu.dot_dimension_numbers<[1], [0], [0], [1], [0, 0, 1, 1], [], []>} : vector<16x128xbf16>, vector<128x128xbf16>, vector<16x128xf32> -> vector<16x128xf32>
    %101 = arith.addf %95, %100 : vector<16x128xf32>
    %102 = vector.extract_strided_slice %84 {offsets = [3, 0, 0], sizes = [1, 16, 128], strides = [1, 1, 1]} : vector<5x16x128xbf16> to vector<1x16x128xbf16>
    %103 = vector.shape_cast %102 : vector<1x16x128xbf16> to vector<16x128xbf16>
    %c3_55 = arith.constant 3 : index
    %c0_56 = arith.constant 0 : index
    %c0_57 = arith.constant 0 : index
    %104 = vector.load %arg6[%c3_55, %c0_56, %c0_57] : memref<5x128x128xbf16, #tpu.memory_space<vmem>>, vector<1x128x128xbf16>
    %105 = vector.shape_cast %104 : vector<1x128x128xbf16> to vector<128x128xbf16>
    %cst_58 = arith.constant dense<0.000000e+00> : vector<16x128xf32>
    %106 = tpu.matmul %103, %105, %cst_58 {dimension_numbers = #tpu.dot_dimension_numbers<[1], [0], [0], [1], [0, 0, 1, 1], [], []>} : vector<16x128xbf16>, vector<128x128xbf16>, vector<16x128xf32> -> vector<16x128xf32>
    %107 = arith.addf %101, %106 : vector<16x128xf32>
    %108 = vector.extract_strided_slice %84 {offsets = [4, 0, 0], sizes = [1, 16, 128], strides = [1, 1, 1]} : vector<5x16x128xbf16> to vector<1x16x128xbf16>
    %109 = vector.shape_cast %108 : vector<1x16x128xbf16> to vector<16x128xbf16>
    %c4_59 = arith.constant 4 : index
    %c0_60 = arith.constant 0 : index
    %c0_61 = arith.constant 0 : index
    %110 = vector.load %arg6[%c4_59, %c0_60, %c0_61] : memref<5x128x128xbf16, #tpu.memory_space<vmem>>, vector<1x128x128xbf16>
    %111 = vector.shape_cast %110 : vector<1x128x128xbf16> to vector<128x128xbf16>
    %cst_62 = arith.constant dense<0.000000e+00> : vector<16x128xf32>
    %112 = tpu.matmul %109, %111, %cst_62 {dimension_numbers = #tpu.dot_dimension_numbers<[1], [0], [0], [1], [0, 0, 1, 1], [], []>} : vector<16x128xbf16>, vector<128x128xbf16>, vector<16x128xf32> -> vector<16x128xf32>
    %113 = arith.addf %107, %112 : vector<16x128xf32>
    %c0_63 = arith.constant 0 : index
    %c0_64 = arith.constant 0 : index
    %114 = vector.load %arg7[%c0_63, %c0_64] : memref<1x128xf32, #tpu.memory_space<vmem>>, vector<1x128xf32>
    %115 = vector.broadcast %114 : vector<1x128xf32> to vector<16x128xf32>
    %116 = arith.addf %113, %115 : vector<16x128xf32>
    %cst_65 = arith.constant 0.000000e+00 : f32
    %117 = vector.broadcast %cst_65 : f32 to vector<16x128xf32>
    %118 = arith.maximumf %116, %117 : vector<16x128xf32>
    %119 = arith.truncf %118 : vector<16x128xf32> to vector<16x128xbf16>
    %c0_66 = arith.constant 0 : index
    %c0_67 = arith.constant 0 : index
    %120 = vector.load %arg8[%c0_66, %c0_67] : memref<128x128xbf16, #tpu.memory_space<vmem>>, vector<128x128xbf16>
    %cst_68 = arith.constant dense<0.000000e+00> : vector<16x128xf32>
    %121 = tpu.matmul %119, %120, %cst_68 {dimension_numbers = #tpu.dot_dimension_numbers<[1], [0], [0], [1], [0, 0, 1, 1], [], []>} : vector<16x128xbf16>, vector<128x128xbf16>, vector<16x128xf32> -> vector<16x128xf32>
    %c0_69 = arith.constant 0 : index
    %c0_70 = arith.constant 0 : index
    %122 = vector.load %arg9[%c0_69, %c0_70] : memref<1x128xf32, #tpu.memory_space<vmem>>, vector<1x128xf32>
    %123 = vector.broadcast %122 : vector<1x128xf32> to vector<16x128xf32>
    %124 = arith.addf %121, %123 : vector<16x128xf32>
    %cst_71 = arith.constant 0.000000e+00 : f32
    %125 = vector.broadcast %cst_71 : f32 to vector<16x128xf32>
    %126 = arith.maximumf %124, %125 : vector<16x128xf32>
    %127 = arith.truncf %126 : vector<16x128xf32> to vector<16x128xbf16>
    %c0_72 = arith.constant 0 : index
    %c0_73 = arith.constant 0 : index
    %128 = vector.load %arg10[%c0_72, %c0_73] : memref<128x128xbf16, #tpu.memory_space<vmem>>, vector<128x128xbf16>
    %cst_74 = arith.constant dense<0.000000e+00> : vector<16x128xf32>
    %129 = tpu.matmul %127, %128, %cst_74 {dimension_numbers = #tpu.dot_dimension_numbers<[1], [0], [0], [1], [0, 0, 1, 1], [], []>} : vector<16x128xbf16>, vector<128x128xbf16>, vector<16x128xf32> -> vector<16x128xf32>
    %c0_75 = arith.constant 0 : index
    %c0_76 = arith.constant 0 : index
    %130 = vector.load %arg11[%c0_75, %c0_76] : memref<1x128xf32, #tpu.memory_space<vmem>>, vector<1x128xf32>
    %131 = vector.broadcast %130 : vector<1x128xf32> to vector<16x128xf32>
    %132 = arith.addf %129, %131 : vector<16x128xf32>
    %c0_77 = arith.constant 0 : index
    %c0_78 = arith.constant 0 : index
    %133 = vector.load %arg12[%c0_77, %c0_78] : memref<16x128xf32, #tpu.memory_space<vmem>>, vector<16x128xf32>
    tpu.vector_store %arg12[%c0_77, %c0_78], %132 {strides = array<i32>} : memref<16x128xf32, #tpu.memory_space<vmem>>, vector<16x128xf32>,
    return
  }
  func.func @transform_0(%arg0: i32) -> (i32, i32, i32) {
    %c0_i32 = arith.constant 0 : i32
    %c0_i32_0 = arith.constant 0 : i32
    %c0_i32_1 = arith.constant 0 : i32
    return %c0_i32, %arg0, %c0_i32_0 : i32, i32, i32
  }
  func.func @transform_1(%arg0: i32) -> (i32, i32, i32) {
    %c0_i32 = arith.constant 0 : i32
    %c0_i32_0 = arith.constant 0 : i32
    %c0_i32_1 = arith.constant 0 : i32
    %c0_i32_2 = arith.constant 0 : i32
    return %c0_i32, %c0_i32_0, %c0_i32_1 : i32, i32, i32
  }
  func.func @transform_2(%arg0: i32) -> (i32, i32) {
    %c0_i32 = arith.constant 0 : i32
    %c0_i32_0 = arith.constant 0 : i32
    %c0_i32_1 = arith.constant 0 : i32
    return %c0_i32, %c0_i32_0 : i32, i32
  }
  func.func @transform_3(%arg0: i32) -> (i32, i32, i32) {
    %c0_i32 = arith.constant 0 : i32
    %c0_i32_0 = arith.constant 0 : i32
    %c0_i32_1 = arith.constant 0 : i32
    %c0_i32_2 = arith.constant 0 : i32
    return %c0_i32, %c0_i32_0, %c0_i32_1 : i32, i32, i32
  }
  func.func @transform_4(%arg0: i32) -> (i32, i32) {
    %c0_i32 = arith.constant 0 : i32
    %c0_i32_0 = arith.constant 0 : i32
    %c0_i32_1 = arith.constant 0 : i32
    return %c0_i32, %c0_i32_0 : i32, i32
  }
  func.func @transform_5(%arg0: i32) -> (i32, i32, i32) {
    %c0_i32 = arith.constant 0 : i32
    %c0_i32_0 = arith.constant 0 : i32
    %c0_i32_1 = arith.constant 0 : i32
    %c0_i32_2 = arith.constant 0 : i32
    return %c0_i32, %c0_i32_0, %c0_i32_1 : i32, i32, i32
  }
  func.func @transform_6(%arg0: i32) -> (i32, i32) {
    %c0_i32 = arith.constant 0 : i32
    %c0_i32_0 = arith.constant 0 : i32
    %c0_i32_1 = arith.constant 0 : i32
    return %c0_i32, %c0_i32_0 : i32, i32
  }
  func.func @transform_7(%arg0: i32) -> (i32, i32) {
    %c0_i32 = arith.constant 0 : i32
    %c0_i32_0 = arith.constant 0 : i32
    %c0_i32_1 = arith.constant 0 : i32
    return %c0_i32, %c0_i32_0 : i32, i32
  }
  func.func @transform_8(%arg0: i32) -> (i32, i32) {
    %c0_i32 = arith.constant 0 : i32
    %c0_i32_0 = arith.constant 0 : i32
    %c0_i32_1 = arith.constant 0 : i32
    return %c0_i32, %c0_i32_0 : i32, i32
  }
  func.func @transform_9(%arg0: i32) -> (i32, i32) {
    %c0_i32 = arith.constant 0 : i32
    %c0_i32_0 = arith.constant 0 : i32
    %c0_i32_1 = arith.constant 0 : i32
    return %c0_i32, %c0_i32_0 : i32, i32
  }
  func.func @transform_10(%arg0: i32) -> (i32, i32) {
    %c0_i32 = arith.constant 0 : i32
    %c0_i32_0 = arith.constant 0 : i32
    %c0_i32_1 = arith.constant 0 : i32
    return %c0_i32, %c0_i32_0 : i32, i32
  }
  func.func @transform_11(%arg0: i32) -> (i32, i32) {
    %c0_i32 = arith.constant 0 : i32
    %c0_i32_0 = arith.constant 0 : i32
    return %arg0, %c0_i32 : i32, i32
  }
}

</mosaic_0001>

<bundles_post_ra>
// kernel: _lambda_.1
= control target key start
LH: loop header
LB: loop body
LE: loop exit
PB: predicated region body
PF: predicated region fallthrough
CT: control target
= control target key end

     0   :  { %s7393_s17 = smov 0   ;;  %s7395_s18 = smov 0   ;;  %s10502_s0 = inlined_call_operand.vmem [shape: bf16[32,32,96], index: 0, kind: input, shape index: {}]   ;;  %s10503_s1 = inlined_call_operand.vmem [shape: bf16[5,96,256], index: 1, kind: input, shape index: {}]   ;;  %s10504_s2 = inlined_call_operand.vmem [shape: f32[1,256], index: 2, kind: input, shape index: {}]   ;;  %s10505_s3 = inlined_call_operand.vmem [shape: bf16[5,128,256], index: 3, kind: input, shape index: {}]   ;;  %s10506_s4 = inlined_call_operand.vmem [shape: f32[1,256], index: 4, kind: input, shape index: {}]   ;;  %s10507_s5 = inlined_call_operand.vmem [shape: bf16[5,128,128], index: 5, kind: input, shape index: {}]   ;;  %s10508_s6 = inlined_call_operand.vmem [shape: f32[1,128], index: 6, kind: input, shape index: {}]   ;;  %s10509_s7 = inlined_call_operand.vmem [shape: bf16[128,128], index: 7, kind: input, shape index: {}]   ;;  %s10510_s8 = inlined_call_operand.vmem [shape: f32[1,128], index: 8, kind: input, shape index: {}]   ;;  %s10511_s9 = inlined_call_operand.vmem [shape: bf16[128,128], index: 9, kind: input, shape index: {}]   ;;  %s10512_s10 = inlined_call_operand.vmem [shape: f32[1,128], index: 10, kind: input, shape index: {}]   ;;  %s10513_s11 = inlined_call_operand.vmem [shape: f32[32,128], index: 11, kind: output, shape index: {}]  }
   0x1   :  { %s7397_s19 = smov 0  }
   0x2 LB: > { %s5613_s20 = sadd.s32 4294967295, %s7331_s19   ;;  %s7410_s21 = sadd.s32 1, %s7331_s19   ;;  %s7331_s19 = sphi %s7397_s19, %s10917_s19   ;;  %s7327_s18 = sphi %s7395_s18, %s10916_s18   ;;  %s7323_s17 = sphi %s7393_s17, %s10915_s17  }
   0x3   : > { %s25_s22 = ssub.s32 %s7331_s19, %s7410_s21  ;;  %s28_s23 = sadd.s32 1, %s7327_s18 }
   0x4   : > { %p26_p0 = scmp.eq.s32.totalorder %s25_s22, 0  ;;  %p35_p1 = scmp.ne.s32.totalorder %s7327_s18, %s7323_s17 }
   0x5   : > { %p36_p2 = scmp.eq.s32.totalorder %s7331_s19, 0  ;;  %p5616_p4 = scmp.ge.s32.totalorder %s7331_s19, 2 }
   0x6   : > { %s7419_s24 = scalar_select %p26_p0, %s7327_s18, %s28_s23  }
   0x7   : > { %p37_p3 = por %p36_p2, %p35_p1  ;;  %327 = sbr.rel (%p5616_p4) target bundleno = 48 (0x30), region = 56 }
   0xc   : > { %330 = sbr.rel (!%p37_p3) target bundleno = 48 (0x30), region = 60  ;;  %s332_s25 = sand.u32 (%p37_p3), 1, %s7327_s18  }
   0xd   : > { %s6994_s26 = sshll.u32 (%p37_p3), %s7331_s19, 3  ;;  %s5617_s27 = sshll.u32 (%p37_p3), %s332_s25, 8 }
   0xe   : > { %s7427_s30 = scalar_lea.vmem (%p37_p3), %s10502_s0, %s6994_s26  ;;  %s7432_s12 = scalar_lea.vmem (%p37_p3), [#allocation2], %s5617_s27 }
   0xf   : > { %v354_v0 = vld [vmem:[%s7427_s30] sm:$0xff] (%p37_p3)   ;;  %v358_v1 = vld [vmem:[%s7427_s30 + $0x10] sm:$0xff] (%p37_p3)  }
  0x10   : > { %v362_v2 = vld [vmem:[%s7427_s30 + $0x20] sm:$0xff] (%p37_p3)   ;;  %355 = vst [vmem:[%s7432_s12] sm:$0xff] (%p37_p3), %v354_v0   ;;  %v366_v3 = vld [vmem:[%s7427_s30 + $0x30] sm:$0xff] (%p37_p3)  }
  0x11   : > { %359 = vst [vmem:[%s7432_s12 + $0x8] sm:$0xff] %v358_v1   ;;  %v370_v4 = vld [vmem:[%s7427_s30 + $0x40] sm:$0xff]   ;;  %v374_v5 = vld [vmem:[%s7427_s30 + $0x50] sm:$0xff]  }
  0x12   : > { %363 = vst [vmem:[%s7432_s12 + $0x10] sm:$0xff] %v362_v2   ;;  %v378_v6 = vld [vmem:[%s7427_s30 + $0x60] sm:$0xff]   ;;  %v382_v7 = vld [vmem:[%s7427_s30 + $0x70] sm:$0xff]  }
  0x13   : > { %367 = vst [vmem:[%s7432_s12 + $0x18] sm:$0xff] %v366_v3   ;;  %v386_v8 = vld [vmem:[%s7427_s30 + $0x80] sm:$0xff]   ;;  %v390_v9 = vld [vmem:[%s7427_s30 + $0x90] sm:$0xff]  }
  0x14   : > { %371 = vst [vmem:[%s7432_s12 + $0x20] sm:$0xff] %v370_v4   ;;  %v394_v10 = vld [vmem:[%s7427_s30 + $0xa0] sm:$0xff]   ;;  %v398_v11 = vld [vmem:[%s7427_s30 + $0xb0] sm:$0xff]  }
  0x15   : > { %375 = vst [vmem:[%s7432_s12 + $0x28] sm:$0xff] %v374_v5   ;;  %v402_v12 = vld [vmem:[%s7427_s30 + $0xc0] sm:$0xff]   ;;  %v406_v13 = vld [vmem:[%s7427_s30 + $0xd0] sm:$0xff]  }
  0x16   : > { %379 = vst [vmem:[%s7432_s12 + $0x30] sm:$0xff] %v378_v6   ;;  %v410_v14 = vld [vmem:[%s7427_s30 + $0xe0] sm:$0xff]   ;;  %v414_v15 = vld [vmem:[%s7427_s30 + $0xf0] sm:$0xff]  }
  0x17   : > { %383 = vst [vmem:[%s7432_s12 + $0x38] sm:$0xff] %v382_v7   ;;  %v418_v16 = vld [vmem:[%s7427_s30 + $0x100] sm:$0xff]   ;;  %v422_v17 = vld [vmem:[%s7427_s30 + $0x110] sm:$0xff]  }
  0x18   : > { %387 = vst [vmem:[%s7432_s12 + $0x40] sm:$0xff] %v386_v8   ;;  %v426_v18 = vld [vmem:[%s7427_s30 + $0x120] sm:$0xff]   ;;  %v430_v19 = vld [vmem:[%s7427_s30 + $0x130] sm:$0xff]  }
  0x19   : > { %391 = vst [vmem:[%s7432_s12 + $0x48] sm:$0xff] %v390_v9   ;;  %v434_v20 = vld [vmem:[%s7427_s30 + $0x140] sm:$0xff]   ;;  %v438_v21 = vld [vmem:[%s7427_s30 + $0x150] sm:$0xff]  }
  0x1a   : > { %395 = vst [vmem:[%s7432_s12 + $0x50] sm:$0xff] %v394_v10   ;;  %v442_v22 = vld [vmem:[%s7427_s30 + $0x160] sm:$0xff]   ;;  %v446_v23 = vld [vmem:[%s7427_s30 + $0x170] sm:$0xff]  }
  0x1b   : > { %399 = vst [vmem:[%s7432_s12 + $0x58] sm:$0xff] %v398_v11   ;;  %v450_v24 = vld [vmem:[%s7427_s30 + $0x180] sm:$0xff]   ;;  %v454_v25 = vld [vmem:[%s7427_s30 + $0x190] sm:$0xff]  }
  0x1c   : > { %403 = vst [vmem:[%s7432_s12 + $0x60] sm:$0xff] %v402_v12   ;;  %v458_v26 = vld [vmem:[%s7427_s30 + $0x1a0] sm:$0xff]   ;;  %v462_v27 = vld [vmem:[%s7427_s30 + $0x1b0] sm:$0xff]  }
  0x1d   : > { %407 = vst [vmem:[%s7432_s12 + $0x68] sm:$0xff] %v406_v13   ;;  %v466_v28 = vld [vmem:[%s7427_s30 + $0x1c0] sm:$0xff]   ;;  %v470_v29 = vld [vmem:[%s7427_s30 + $0x1d0] sm:$0xff]  }
  0x1e   : > { %411 = vst [vmem:[%s7432_s12 + $0x70] sm:$0xff] %v410_v14   ;;  %v474_v30 = vld [vmem:[%s7427_s30 + $0x1e0] sm:$0xff]   ;;  %v478_v31 = vld [vmem:[%s7427_s30 + $0x1f0] sm:$0xff]  }
  0x1f   : > { %415 = vst [vmem:[%s7432_s12 + $0x78] sm:$0xff] %v414_v15  }
  0x20   : > { %419 = vst [vmem:[%s7432_s12 + $0x80] sm:$0xff] %v418_v16  }
  0x21   : > { %423 = vst [vmem:[%s7432_s12 + $0x88] sm:$0xff] %v422_v17  }
  0x22   : > { %427 = vst [vmem:[%s7432_s12 + $0x90] sm:$0xff] %v426_v18  }
  0x23   : > { %431 = vst [vmem:[%s7432_s12 + $0x98] sm:$0xff] %v430_v19  }
  0x24   : > { %435 = vst [vmem:[%s7432_s12 + $0xa0] sm:$0xff] %v434_v20  }
  0x25   : > { %439 = vst [vmem:[%s7432_s12 + $0xa8] sm:$0xff] %v438_v21  }
  0x26   : > { %443 = vst [vmem:[%s7432_s12 + $0xb0] sm:$0xff] %v442_v22  }
  0x27   : > { %447 = vst [vmem:[%s7432_s12 + $0xb8] sm:$0xff] %v446_v23  }
  0x28   : > { %451 = vst [vmem:[%s7432_s12 + $0xc0] sm:$0xff] %v450_v24  }
  0x29   : > { %455 = vst [vmem:[%s7432_s12 + $0xc8] sm:$0xff] %v454_v25  }
  0x2a   : > { %459 = vst [vmem:[%s7432_s12 + $0xd0] sm:$0xff] %v458_v26  }
  0x2b   : > { %463 = vst [vmem:[%s7432_s12 + $0xd8] sm:$0xff] %v462_v27  }
  0x2c   : > { %467 = vst [vmem:[%s7432_s12 + $0xe0] sm:$0xff] %v466_v28  }
  0x2d   : > { %471 = vst [vmem:[%s7432_s12 + $0xe8] sm:$0xff] %v470_v29  }
  0x2e   : > { %475 = vst [vmem:[%s7432_s12 + $0xf0] sm:$0xff] %v474_v30  }
  0x2f   : > { %479 = vst [vmem:[%s7432_s12 + $0xf8] sm:$0xff] %v478_v31  }
  0x30 PF: > { %p5620_p5 = scmp.ge.s32.totalorder %s7331_s19, 1  ;;  %p632_p6 = scmp.lt.s32.totalorder %s7331_s19, 3 }
  0x32   : > { %p633_p7 = pnand %p5620_p5, %p632_p6 }
  0x34   : > { %636 = sbr.rel (%p633_p7) target bundleno = 2556 (0x9fc), region = 101 }
  0x39   : > { %v5790_v32 = vld [vmem:[%s10503_s1 + $0xb0] sm:$0xf]  ;;  %v7050_v33 = vld [vmem:[%s10503_s1 + $0xb4] sm:$0xf0]  ;;  %v5782_v37 = vld [vmem:[%s10503_s1 + $0xa0] sm:$0xf] }
  0x3a   : > { %v5898_v34 = vld [vmem:[%s10503_s1 + $0x50] sm:$0xf]  ;;  %v5791_v35 = vor.u32 %v7050_v33, %v5790_v32  ;;  %v7038_v36 = vld [vmem:[%s10503_s1 + $0x54] sm:$0xf0]  ;;  %v7048_v38 = vld [vmem:[%s10503_s1 + $0xa4] sm:$0xf0] }
  0x3b   : > { %v5899_v39 = vor.u32 %v7038_v36, %v5898_v34  ;;  %v5890_v40 = vld [vmem:[%s10503_s1 + $0x40] sm:$0xf]  ;;  %v7036_v41 = vld [vmem:[%s10503_s1 + $0x44] sm:$0xf0]  ;;  %v5783_v42 = vor.u32 %v7048_v38, %v5782_v37  ;;  %v5774_v44 = vld [vmem:[%s10503_s1 + $0x90] sm:$0xf] }
  0x3c   : > { %1062 = vmatpush.bf16.msra.mxu0 %v5791_v35  ;;  %7223 = vmatpush.bf16.msra.mxu1 %v5791_v35  ;;  %v5891_v43 = vor.u32 %v7036_v41, %v5890_v40  ;;  %v7046_v45 = vld [vmem:[%s10503_s1 + $0x94] sm:$0xf0]  ;;  %v5882_v46 = vld [vmem:[%s10503_s1 + $0x30] sm:$0xf]  ;;  %v7037_v48 = vld [vmem:[%s10503_s1 + $0x54] sm:$0xf] }
  0x3d   : > { %1428 = vmatpush.bf16.msra.mxu2 %v5899_v39  ;;  %v7034_v47 = vld [vmem:[%s10503_s1 + $0x34] sm:$0xf0]  ;;  %v5900_v49 = vld [vmem:[%s10503_s1 + $0x58] sm:$0xf0]  ;;  %v5775_v51 = vor.u32 %v7046_v45, %v5774_v44  ;;  %v7035_v52 = vld [vmem:[%s10503_s1 + $0x44] sm:$0xf] }
  0x3e   : > { %v5903_v50 = vor.u32 %v7037_v48, %v5900_v49  ;;  %v5892_v53 = vld [vmem:[%s10503_s1 + $0x48] sm:$0xf0]  ;;  %v5883_v54 = vor.u32 %v7034_v47, %v5882_v46  ;;  %v5766_v55 = vld [vmem:[%s10503_s1 + $0x80] sm:$0xf]  ;;  %v7044_v56 = vld [vmem:[%s10503_s1 + $0x84] sm:$0xf0] }
  0x3f   : > { %v5895_v57 = vor.u32 %v7035_v52, %v5892_v53  ;;  %v5874_v58 = vld [vmem:[%s10503_s1 + $0x20] sm:$0xf]  ;;  %v7032_v59 = vld [vmem:[%s10503_s1 + $0x24] sm:$0xf0]  ;;  %v7033_v60 = vld [vmem:[%s10503_s1 + $0x34] sm:$0xf]  ;;  %v5767_v62 = vor.u32 %v7044_v56, %v5766_v55 }
  0x40   : > { %1063 = vmatpush.bf16.msra.mxu0 %v5783_v42  ;;  %7224 = vmatpush.bf16.msra.mxu1 %v5783_v42  ;;  %v5884_v61 = vld [vmem:[%s10503_s1 + $0x38] sm:$0xf0]  ;;  %v5758_v63 = vld [vmem:[%s10503_s1 + $0x70] sm:$0xf]  ;;  %v5875_v0 = vor.u32 %v7032_v59, %v5874_v58  ;;  %v7042_v1 = vld [vmem:[%s10503_s1 + $0x74] sm:$0xf0] }
  0x41   : > { %1429 = vmatpush.bf16.msra.mxu2 %v5891_v43  ;;  %1577 = vmatpush.bf16.msra.mxu3 %v5903_v50  ;;  %v5866_v2 = vld [vmem:[%s10503_s1 + $0x10] sm:$0xf]  ;;  %s639_s30 = sand.u32 1, %s7323_s17   ;;  %v5887_v3 = vor.u32 %v7033_v60, %v5884_v61  ;;  %v7030_v4 = vld [vmem:[%s10503_s1 + $0x14] sm:$0xf0]  ;;  %v5759_v7 = vor.u32 %v7042_v1, %v5758_v63  ;;  %vm975_vm0 = vcmask 785408  }
  0x42   : > { %v7031_v5 = vld [vmem:[%s10503_s1 + $0x24] sm:$0xf]  ;;  %v5876_v6 = vld [vmem:[%s10503_s1 + $0x28] sm:$0xf0]  ;;  %s5621_s23 = sshll.u32 %s639_s30, 8  ;;  %v5867_v8 = vor.u32 %v7030_v4, %v5866_v2  ;;  %s5622_s29 = sshll.u32 %s5613_s20, 1 }
  0x43   : > { %v5750_v9 = vld [vmem:[%s10503_s1 + $0x60] sm:$0xf]  ;;  %v7040_v10 = vld [vmem:[%s10503_s1 + $0x64] sm:$0xf0]  ;;  %v5879_v12 = vor.u32 %v7031_v5, %v5876_v6  ;;  %v7049_v14 = vld [vmem:[%s10503_s1 + $0xb4] sm:$0xf] }
  0x44   : > { %1064 = vmatpush.bf16.msra.mxu0 %v5775_v51  ;;  %7225 = vmatpush.bf16.msra.mxu1 %v5775_v51  ;;  %v5858_v11 = vld [vmem:[%s10503_s1] sm:$0xf]  ;;  %v7028_v13 = vld [vmem:[%s10503_s1 + $0x4] sm:$0xf0]  ;;  %v5792_v15 = vld [vmem:[%s10503_s1 + $0xb8] sm:$0xf0]  ;;  %v5751_v18 = vor.u32 %v7040_v10, %v5750_v9 }
  0x45   : > { %1430 = vmatpush.bf16.msra.mxu2 %v5883_v54  ;;  %1578 = vmatpush.bf16.msra.mxu3 %v5895_v57  ;;  %v7029_v16 = vld [vmem:[%s10503_s1 + $0x14] sm:$0xf]  ;;  %v5868_v17 = vld [vmem:[%s10503_s1 + $0x18] sm:$0xf0]  ;;  %v5859_v19 = vor.u32 %v7028_v13, %v5858_v11  ;;  %v5795_v20 = vor.u32 %v7049_v14, %v5792_v15  ;;  %s7606_s27 = scalar_lea.vmem [#allocation2], %s5621_s23  ;;  %p680_p8 = scmp.lt.s32.totalorder %s5622_s29, 3 }
  0x46   : > { %v6996_v21 = vld [vmem:[%s7606_s27 + $0x8] sm:$0xff]  ;;  %v7047_v22 = vld [vmem:[%s10503_s1 + $0xa4] sm:$0xf]  ;;  %v5871_v24 = vor.u32 %v7029_v16, %v5868_v17  ;;  %v7045_v30 = vld [vmem:[%s10503_s1 + $0x94] sm:$0xf] }
  0x47   : > { %v5784_v23 = vld [vmem:[%s10503_s1 + $0xa8] sm:$0xf0]  ;;  %v7023_v25 = vld [vmem:[%s7606_s27 + $0xe0] sm:$0xff]  ;;  %v5776_v31 = vld [vmem:[%s10503_s1 + $0x98] sm:$0xf0]  ;;  %s10919_s29 = smov (!%p680_p8, %s5622_s29), 3 }
  0x48   : > { %1065 = vmatpush.bf16.msra.mxu0 %v5767_v62  ;;  %7226 = vmatpush.bf16.msra.mxu1 %v5767_v62  ;;  %v7027_v26 = vld [vmem:[%s10503_s1 + $0x4] sm:$0xf]  ;;  %v5860_v27 = vld [vmem:[%s10503_s1 + $0x8] sm:$0xf0]  ;;  %v5787_v29 = vor.u32 %v7047_v22, %v5784_v23  ;;  %v5779_v33 = vor.u32 %v7045_v30, %v5776_v31  ;;  %v6018_v36 = vld [vmem:[%s10503_s1 + $0x110] sm:$0xf] }
  0x49   : > { %1431 = vmatpush.bf16.msra.mxu2 %v5875_v0  ;;  %1579 = vmatpush.bf16.msra.mxu3 %v5887_v3  ;;  %v6995_v28 = vld [vmem:[%s7606_s27] sm:$0xff]  ;;  %v5863_v32 = vor.u32 %v7027_v26, %v5860_v27  ;;  %v5768_v35 = vld [vmem:[%s10503_s1 + $0x88] sm:$0xf0]  ;;  %v7062_v37 = vld [vmem:[%s10503_s1 + $0x114] sm:$0xf0]  ;;  %s5623_s12 = sshll.u32 %s10919_s29, 3 }
  0x4a   : > { %v7043_v34 = vld [vmem:[%s10503_s1 + $0x84] sm:$0xf]  ;;  %v6019_v39 = vor.u32 %v7062_v37, %v6018_v36  ;;  %v7041_v40 = vld [vmem:[%s10503_s1 + $0x74] sm:$0xf]  ;;  %v5760_v41 = vld [vmem:[%s10503_s1 + $0x78] sm:$0xf0]  ;;  %s683_s15 = scalar_lea.vmem %s10513_s11, %s5623_s12 }
  0x4b   : > { %v5771_v38 = vor.u32 %v7043_v34, %v5768_v35  ;;  %v5763_v42 = vor.u32 %v7041_v40, %v5760_v41  ;;  %v7039_v43 = vld [vmem:[%s10503_s1 + $0x64] sm:$0xf]  ;;  %v5752_v44 = vld [vmem:[%s10503_s1 + $0x68] sm:$0xf0]  ;;  %v7658_v45 = vld [vmem:[%s7606_s27 + $0x10] sm:$0xff] }
  0x4c   : > { %1066 = vmatpush.bf16.msra.mxu0 %v5759_v7  ;;  %7227 = vmatpush.bf16.msra.mxu1 %v5759_v7  ;;  %v7061_v46 = vld [vmem:[%s10503_s1 + $0x114] sm:$0xf]  ;;  %v6020_v47 = vld [vmem:[%s10503_s1 + $0x118] sm:$0xf0]  ;;  %v5755_v48 = vor.u32 %v7039_v43, %v5752_v44  ;;  %v7683_v51 = vld [vmem:[%s7606_s27 + $0x20] sm:$0xff] }
  0x4d   : > { %1432 = vmatpush.bf16.msra.mxu2 %v5867_v8  ;;  %1580 = vmatpush.bf16.msra.mxu3 %v5879_v12  ;;  %v6023_v49 = vor.u32 %v7061_v46, %v6020_v47  ;;  %v7672_v50 = vld [vmem:[%s7606_s27 + $0x18] sm:$0xff]  ;;  %v7694_v52 = vld [vmem:[%s7606_s27 + $0x28] sm:$0xff]  ;;  %v7059_v53 = vld [vmem:[%s10503_s1 + $0x104] sm:$0xf] }
  0x4e   : > { %v6012_v54 = vld [vmem:[%s10503_s1 + $0x108] sm:$0xf0]  ;;  %v6010_v56 = vld [vmem:[%s10503_s1 + $0x100] sm:$0xf]  ;;  %v7060_v57 = vld [vmem:[%s10503_s1 + $0x104] sm:$0xf0] }
  0x4f   : > { %v6015_v55 = vor.u32 %v7059_v53, %v6012_v54  ;;  %v6011_v58 = vor.u32 %v7060_v57, %v6010_v56  ;;  %v7717_v59 = vld [vmem:[%s7606_s27 + $0x30] sm:$0xff]  ;;  %v7728_v60 = vld [vmem:[%s7606_s27 + $0x38] sm:$0xff]  ;;  %v7003_v61 = vld [vmem:[%s7606_s27 + $0x40] sm:$0xff] }
  0x50   : > { %1067 = vmatpush.bf16.msra.mxu0 %v5751_v18  ;;  %7228 = vmatpush.bf16.msra.mxu1 %v5751_v18  ;;  %v7004_v62 = vld [vmem:[%s7606_s27 + $0x48] sm:$0xff]  ;;  %v7005_v7 = vld [vmem:[%s7606_s27 + $0x50] sm:$0xff]  ;;  %v6004_v11 = vld [vmem:[%s10503_s1 + $0xf8] sm:$0xf0] }
  0x51   : > { %1433 = vmatpush.bf16.msra.mxu2 %v5859_v19  ;;  %1581 = vmatpush.bf16.msra.mxu3 %v5871_v24  ;;  %v7057_v10 = vld [vmem:[%s10503_s1 + $0xf4] sm:$0xf]  ;;  %v6002_v19 = vld [vmem:[%s10503_s1 + $0xf0] sm:$0xf]  ;;  %v7006_v26 = vld [vmem:[%s7606_s27 + $0x58] sm:$0xff] }
  0x52   : > { %v6007_v12 = vor.u32 %v7057_v10, %v6004_v11  ;;  %v7008_v56 = vld [vmem:[%s7606_s27 + $0x68] sm:$0xff]  ;;  %v7009_v11 = vld [vmem:[%s7606_s27 + $0x70] sm:$0xff] }
  0x53   : > { %5796 = vmatmul.msk.bf16.vlgmr.msra.gmra.mxu0 %vm975_vm0, %v6996_v21  ;;  %5823 = vmatmul.msk.bf16.vlgmr.msra.gmra.mxu1 %vm975_vm0, %v7023_v25 }
  0x54   : > { %1211 = vmatpush.bf16.msrb.mxu1 %v5795_v20  ;;  %5904 = vmatmul.msk.bf16.vlgmr.msra.gmra.mxu2 %vm975_vm0, %v6995_v28  ;;  %v7058_v20 = vld [vmem:[%s10503_s1 + $0xf4] sm:$0xf0] }
  0x55   : > { %1582 = vmatpush.bf16.msra.mxu3 %v5863_v32  ;;  %1807 = vmatpush.bf16.msrb.mxu0 %v6019_v39  ;;  %v7007_v39 = vld [vmem:[%s7606_s27 + $0x60] sm:$0xff] }
  0x58   : > { %1212 = vmatpush.bf16.msrb.mxu1 %v5787_v29  ;;  %5932 = vmatmul.msk.bf16.vlgmr.msra.gmra.mxu3 %vm975_vm0, %v6995_v28 }
  0x59   : > { %1808 = vmatpush.bf16.msrb.mxu0 %v6011_v58 }
  0x5c   : > { %1213 = vmatpush.bf16.msrb.mxu1 %v5779_v33 }
  0x60   : > { %1214 = vmatpush.bf16.msrb.mxu1 %v5771_v38 }
  0x63   : > { %5797 = vmatmul.msk.bf16.gmra.mxu0 %vm975_vm0, %v7658_v45 }
  0x64   : > { %1215 = vmatpush.bf16.msrb.mxu1 %v5763_v42  ;;  %5905 = vmatmul.msk.bf16.gmra.mxu2 %vm975_vm0, %v6996_v21 }
  0x68   : > { %1216 = vmatpush.bf16.msrb.mxu1 %v5755_v48  ;;  %5933 = vmatmul.msk.bf16.gmra.mxu3 %vm975_vm0, %v6996_v21 }
  0x6b   : > { %5824 = vmatmul.msk.bf16.vlgmr.msrb.gmra.mxu1 %vm975_vm0, %v6996_v21  ;;  %v6003_v21 = vor.u32 %v7058_v20, %v6002_v19 }
  0x6c   : > { %1956 = vmatpush.bf16.msra.mxu1 %v6023_v49 }
  0x6d   : > { %1809 = vmatpush.bf16.msrb.mxu0 %v6003_v21 }
  0x70   : > { %1957 = vmatpush.bf16.msra.mxu1 %v6015_v55 }
  0x73   : > { %5798 = vmatmul.msk.bf16.gmra.mxu0 %vm975_vm0, %v7672_v50 }
  0x74   : > { %5906 = vmatmul.msk.bf16.gmra.mxu2 %vm975_vm0, %v7658_v45  ;;  %1958 = vmatpush.bf16.msra.mxu1 %v6007_v12 }
  0x78   : > { %5934 = vmatmul.msk.bf16.gmra.mxu3 %vm975_vm0, %v7658_v45 }
  0x7b   : > { %5825 = vmatmul.msk.bf16.gmra.mxu1 %vm975_vm0, %v7658_v45 }
  0x83   : > { %5799 = vmatmul.msk.bf16.gmra.mxu0 %vm975_vm0, %v7683_v51 }
  0x84   : > { %5907 = vmatmul.msk.bf16.gmra.mxu2 %vm975_vm0, %v7672_v50 }
  0x88   : > { %5935 = vmatmul.msk.bf16.gmra.mxu3 %vm975_vm0, %v7672_v50 }
  0x8b   : > { %5826 = vmatmul.msk.bf16.gmra.mxu1 %vm975_vm0, %v7672_v50 }
  0x93   : > { %5800 = vmatmul.msk.bf16.gmra.mxu0 %vm975_vm0, %v7694_v52 }
  0x94   : > { %5908 = vmatmul.msk.bf16.gmra.mxu2 %vm975_vm0, %v7683_v51 }
  0x98   : > { %5936 = vmatmul.msk.bf16.gmra.mxu3 %vm975_vm0, %v7683_v51 }
  0x9b   : > { %5827 = vmatmul.msk.bf16.gmra.mxu1 %vm975_vm0, %v7683_v51 }
  0xa3   : > { %5801 = vmatmul.msk.bf16.gmra.mxu0 %vm975_vm0, %v7717_v59 }
  0xa4   : > { %5909 = vmatmul.msk.bf16.gmra.mxu2 %vm975_vm0, %v7694_v52 }
  0xa8   : > { %5937 = vmatmul.msk.bf16.gmra.mxu3 %vm975_vm0, %v7694_v52 }
  0xab   : > { %5828 = vmatmul.msk.bf16.gmra.mxu1 %vm975_vm0, %v7694_v52 }
  0xb3   : > { %5802 = vmatmul.msk.bf16.gmra.mxu0 %vm975_vm0, %v7728_v60 }
  0xb4   : > { %5910 = vmatmul.msk.bf16.gmra.mxu2 %vm975_vm0, %v7717_v59 }
  0xb8   : > { %5938 = vmatmul.msk.bf16.gmra.mxu3 %vm975_vm0, %v7717_v59 }
  0xbb   : > { %5829 = vmatmul.msk.bf16.gmra.mxu1 %vm975_vm0, %v7717_v59 }
  0xc3   : > { %5803 = vmatmul.msk.bf16.gmra.mxu0 %vm975_vm0, %v7003_v61 }
  0xc4   : > { %5911 = vmatmul.msk.bf16.gmra.mxu2 %vm975_vm0, %v7728_v60 }
  0xc8   : > { %5939 = vmatmul.msk.bf16.gmra.mxu3 %vm975_vm0, %v7728_v60 }
  0xcb   : > { %5830 = vmatmul.msk.bf16.gmra.mxu1 %vm975_vm0, %v7728_v60 }
  0xd0   : > { %v1069_v63 = vpop.f32.mrf.mxu0  ;;  %v7747_v0 = vpop.f32.mrf.mxu1 }
  0xd1   : > { %10521 = vst [vmem:[#allocation3_spill] sm:$0xff] %v7747_v0 }
  0xd3   : > { %5804 = vmatmul.msk.bf16.gmra.mxu0 %vm975_vm0, %v7004_v62 }
  0xd4   : > { %5912 = vmatmul.msk.bf16.gmra.mxu2 %vm975_vm0, %v7003_v61 }
  0xd7   : > { %v1435_v1 = vpop.f32.mrf.mxu2 }
  0xd8   : > { %v7751_v2 = vadd.f32 %v1435_v1, %v1069_v63  ;;  %v1071_v3 = vpop.f32.mrf.mxu0  ;;  %5940 = vmatmul.msk.bf16.gmra.mxu3 %vm975_vm0, %v7003_v61  ;;  %v7755_v5 = vpop.f32.mrf.mxu1 }
  0xd9   : > { %10522 = vst [vmem:[#allocation4_spill] sm:$0xff] %v7755_v5 }
  0xdb   : > { %5831 = vmatmul.msk.bf16.gmra.mxu1 %vm975_vm0, %v7003_v61  ;;  %v1584_v4 = vpop.f32.mrf.mxu3 }
  0xdf   : > { %v1437_v6 = vpop.f32.mrf.mxu2 }
  0xe0   : > { %v7758_v8 = vadd.f32 %v1437_v6, %v1071_v3  ;;  %v1074_v9 = vpop.f32.mrf.mxu0 }
  0xe3   : > { %5805 = vmatmul.msk.bf16.gmra.mxu0 %vm975_vm0, %v7005_v7  ;;  %v1586_v13 = vpop.f32.mrf.mxu3 }
  0xe4   : > { %5913 = vmatmul.msk.bf16.gmra.mxu2 %vm975_vm0, %v7004_v62 }
  0xe7   : > { %v1440_v16 = vpop.f32.mrf.mxu2 }
  0xe8   : > { %v1218_v14 = vpop.f32.mrf.mxu1  ;;  %v7770_v17 = vadd.f32 %v1440_v16, %v1074_v9  ;;  %v1076_v18 = vpop.f32.mrf.mxu0  ;;  %5941 = vmatmul.msk.bf16.gmra.mxu3 %vm975_vm0, %v7004_v62 }
  0xe9   : > { %v7768_v15 = vadd.f32 %v1584_v4, %v1218_v14 }
  0xeb   : > { %5832 = vmatmul.msk.bf16.gmra.mxu1 %vm975_vm0, %v7004_v62  ;;  %v1589_v22 = vpop.f32.mrf.mxu3 }
  0xef   : > { %v1442_v25 = vpop.f32.mrf.mxu2 }
  0xf0   : > { %v1220_v23 = vpop.f32.mrf.mxu1  ;;  %v7783_v27 = vadd.f32 %v1442_v25, %v1076_v18  ;;  %v1079_v28 = vpop.f32.mrf.mxu0 }
  0xf1   : > { %v7780_v24 = vadd.f32 %v1586_v13, %v1220_v23  ;;  %v5996_v23 = vld [vmem:[%s10503_s1 + $0xe8] sm:$0xf0] }
  0xf3   : > { %5806 = vmatmul.msk.bf16.gmra.mxu0 %vm975_vm0, %v7006_v26  ;;  %v1591_v29 = vpop.f32.mrf.mxu3 }
  0xf4   : > { %5914 = vmatmul.msk.bf16.gmra.mxu2 %vm975_vm0, %v7005_v7 }
  0xf7   : > { %v1445_v32 = vpop.f32.mrf.mxu2 }
  0xf8   : > { %v1223_v30 = vpop.f32.mrf.mxu1  ;;  %v7789_v33 = vadd.f32 %v1445_v32, %v1079_v28  ;;  %v1081_v34 = vpop.f32.mrf.mxu0  ;;  %5942 = vmatmul.msk.bf16.gmra.mxu3 %vm975_vm0, %v7005_v7  ;;  %v7010_v32 = vld [vmem:[%s7606_s27 + $0x78] sm:$0xff] }
  0xf9   : > { %v7787_v31 = vadd.f32 %v1589_v22, %v1223_v30  ;;  %v7055_v22 = vld [vmem:[%s10503_s1 + $0xe4] sm:$0xf] }
  0xfa   : > { %v5999_v25 = vor.u32 %v7055_v22, %v5996_v23  ;;  %v7012_v22 = vld [vmem:[%s7606_s27 + $0x88] sm:$0xff] }
  0xfb   : > { %5833 = vmatmul.msk.bf16.gmra.mxu1 %vm975_vm0, %v7005_v7  ;;  %v1594_v35 = vpop.f32.mrf.mxu3 }
  0xfc   : > { %1959 = vmatpush.bf16.msra.mxu1 %v5999_v25 }
  0xff   : > { %v1447_v38 = vpop.f32.mrf.mxu2 }
 0x100   : > { %v1225_v36 = vpop.f32.mrf.mxu1  ;;  %v7796_v40 = vadd.f32 %v1447_v38, %v1081_v34  ;;  %v1084_v41 = vpop.f32.mrf.mxu0  ;;  %v7056_v38 = vld [vmem:[%s10503_s1 + $0xe4] sm:$0xf0] }
 0x101   : > { %v7793_v37 = vadd.f32 %v1591_v29, %v1225_v36  ;;  %v5994_v36 = vld [vmem:[%s10503_s1 + $0xe0] sm:$0xf] }
 0x103   : > { %5807 = vmatmul.msk.bf16.gmra.mxu0 %vm975_vm0, %v7007_v39  ;;  %v1596_v42 = vpop.f32.mrf.mxu3 }
 0x104   : > { %5915 = vmatmul.msk.bf16.gmra.mxu2 %vm975_vm0, %v7006_v26 }
 0x107   : > { %v1450_v46 = vpop.f32.mrf.mxu2 }
 0x108   : > { %v1228_v43 = vpop.f32.mrf.mxu1  ;;  %v7802_v47 = vadd.f32 %v1450_v46, %v1084_v41  ;;  %v1086_v48 = vpop.f32.mrf.mxu0  ;;  %5943 = vmatmul.msk.bf16.gmra.mxu3 %vm975_vm0, %v7006_v26 }
 0x109   : > { %v7800_v44 = vadd.f32 %v1594_v35, %v1228_v43 }
 0x10b   : > { %5834 = vmatmul.msk.bf16.gmra.mxu1 %vm975_vm0, %v7006_v26  ;;  %v1599_v49 = vpop.f32.mrf.mxu3 }
 0x10f   : > { %v1452_v55 = vpop.f32.mrf.mxu2 }
 0x110   : > { %v1230_v53 = vpop.f32.mrf.mxu1  ;;  %v7809_v57 = vadd.f32 %v1452_v55, %v1086_v48  ;;  %v1089_v58 = vpop.f32.mrf.mxu0 }
 0x111   : > { %v7806_v54 = vadd.f32 %v1596_v42, %v1230_v53 }
 0x113   : > { %5808 = vmatmul.msk.bf16.gmra.mxu0 %vm975_vm0, %v7008_v56  ;;  %v1601_v61 = vpop.f32.mrf.mxu3 }
 0x114   : > { %5916 = vmatmul.msk.bf16.gmra.mxu2 %vm975_vm0, %v7007_v39 }
 0x117   : > { %v1455_v1 = vpop.f32.mrf.mxu2 }
 0x118   : > { %v1233_v62 = vpop.f32.mrf.mxu1  ;;  %v7815_v3 = vadd.f32 %v1455_v1, %v1089_v58  ;;  %v1091_v4 = vpop.f32.mrf.mxu0  ;;  %5944 = vmatmul.msk.bf16.gmra.mxu3 %vm975_vm0, %v7007_v39 }
 0x119   : > { %v7813_v63 = vadd.f32 %v1599_v49, %v1233_v62 }
 0x11b   : > { %5835 = vmatmul.msk.bf16.gmra.mxu1 %vm975_vm0, %v7007_v39  ;;  %v1604_v6 = vpop.f32.mrf.mxu3  ;;  %v5995_v39 = vor.u32 %v7056_v38, %v5994_v36 }
 0x11d   : > { %1810 = vmatpush.bf16.msrb.mxu0 %v5995_v39 }
 0x11f   : > { %v1457_v10 = vpop.f32.mrf.mxu2 }
 0x120   : > { %v1235_v7 = vpop.f32.mrf.mxu1  ;;  %v7822_v12 = vadd.f32 %v1457_v10, %v1091_v4  ;;  %v1094_v13 = vpop.f32.mrf.mxu0 }
 0x121   : > { %v7819_v9 = vadd.f32 %v1601_v61, %v1235_v7  ;;  %v7011_v61 = vld [vmem:[%s7606_s27 + $0x80] sm:$0xff] }
 0x123   : > { %5809 = vmatmul.msk.bf16.gmra.mxu0 %vm975_vm0, %v7009_v11  ;;  %v1606_v14 = vpop.f32.mrf.mxu3 }
 0x124   : > { %5917 = vmatmul.msk.bf16.gmra.mxu2 %vm975_vm0, %v7008_v56 }
 0x127   : > { %v1460_v19 = vpop.f32.mrf.mxu2 }
 0x128   : > { %v1238_v16 = vpop.f32.mrf.mxu1  ;;  %v7828_v20 = vadd.f32 %v1460_v19, %v1094_v13  ;;  %v1096_v21 = vpop.f32.mrf.mxu0  ;;  %5945 = vmatmul.msk.bf16.gmra.mxu3 %vm975_vm0, %v7008_v56 }
 0x129   : > { %v7826_v18 = vadd.f32 %v1604_v6, %v1238_v16 }
 0x12b   : > { %5836 = vmatmul.msk.bf16.gmra.mxu1 %vm975_vm0, %v7008_v56  ;;  %v1609_v26 = vpop.f32.mrf.mxu3 }
 0x12f   : > { %v1462_v30 = vpop.f32.mrf.mxu2 }
 0x130   : > { %v1240_v28 = vpop.f32.mrf.mxu1  ;;  %v7841_v34 = vadd.f32 %v1462_v30, %v1096_v21  ;;  %v1099_v35 = vpop.f32.mrf.mxu0 }
 0x131   : > { %v7838_v29 = vadd.f32 %v1606_v14, %v1240_v28 }
 0x133   : > { %5810 = vmatmul.msk.bf16.gmra.mxu0 %vm975_vm0, %v7010_v32  ;;  %v1611_v41 = vpop.f32.mrf.mxu3 }
 0x134   : > { %5918 = vmatmul.msk.bf16.gmra.mxu2 %vm975_vm0, %v7009_v11 }
 0x137   : > { %v1465_v46 = vpop.f32.mrf.mxu2 }
 0x138   : > { %v1243_v42 = vpop.f32.mrf.mxu1  ;;  %v7853_v48 = vadd.f32 %v1465_v46, %v1099_v35  ;;  %v1101_v49 = vpop.f32.mrf.mxu0  ;;  %5946 = vmatmul.msk.bf16.gmra.mxu3 %vm975_vm0, %v7009_v11  ;;  %v7013_v46 = vld [vmem:[%s7606_s27 + $0x90] sm:$0xff] }
 0x139   : > { %v7851_v43 = vadd.f32 %v1609_v26, %v1243_v42 }
 0x13b   : > { %5837 = vmatmul.msk.bf16.gmra.mxu1 %vm975_vm0, %v7009_v11  ;;  %v1614_v53 = vpop.f32.mrf.mxu3 }
 0x13f   : > { %v1467_v58 = vpop.f32.mrf.mxu2 }
 0x140   : > { %v1245_v55 = vpop.f32.mrf.mxu1  ;;  %v7860_v62 = vadd.f32 %v1467_v58, %v1101_v49  ;;  %v1104_v1 = vpop.f32.mrf.mxu0 }
 0x141   : > { %v7857_v56 = vadd.f32 %v1611_v41, %v1245_v55 }
 0x143   : > { %5811 = vmatmul.msk.bf16.gmra.mxu0 %vm975_vm0, %v7011_v61  ;;  %v1616_v4 = vpop.f32.mrf.mxu3 }
 0x144   : > { %5919 = vmatmul.msk.bf16.gmra.mxu2 %vm975_vm0, %v7010_v32 }
 0x147   : > { %v1470_v10 = vpop.f32.mrf.mxu2 }
 0x148   : > { %v1248_v6 = vpop.f32.mrf.mxu1  ;;  %v7866_v11 = vadd.f32 %v1470_v10, %v1104_v1  ;;  %v1106_v13 = vpop.f32.mrf.mxu0  ;;  %5947 = vmatmul.msk.bf16.gmra.mxu3 %vm975_vm0, %v7010_v32 }
 0x149   : > { %v7864_v7 = vadd.f32 %v1614_v53, %v1248_v6 }
 0x14b   : > { %5838 = vmatmul.msk.bf16.gmra.mxu1 %vm975_vm0, %v7010_v32  ;;  %v1619_v14 = vpop.f32.mrf.mxu3 }
 0x14f   : > { %v1472_v21 = vpop.f32.mrf.mxu2 }
 0x150   : > { %v1250_v16 = vpop.f32.mrf.mxu1  ;;  %v7873_v23 = vadd.f32 %v1472_v21, %v1106_v13  ;;  %v1109_v25 = vpop.f32.mrf.mxu0  ;;  %v7014_v21 = vld [vmem:[%s7606_s27 + $0x98] sm:$0xff] }
 0x151   : > { %v7870_v19 = vadd.f32 %v1616_v4, %v1250_v16 }
 0x153   : > { %5812 = vmatmul.msk.bf16.gmra.mxu0 %vm975_vm0, %v7012_v22  ;;  %v1621_v26 = vpop.f32.mrf.mxu3 }
 0x154   : > { %5920 = vmatmul.msk.bf16.gmra.mxu2 %vm975_vm0, %v7011_v61 }
 0x157   : > { %v1475_v35 = vpop.f32.mrf.mxu2 }
 0x158   : > { %v1253_v28 = vpop.f32.mrf.mxu1  ;;  %v7879_v32 = vadd.f32 %v1475_v35, %v1109_v25  ;;  %v1111_v36 = vpop.f32.mrf.mxu0  ;;  %5948 = vmatmul.msk.bf16.gmra.mxu3 %vm975_vm0, %v7011_v61  ;;  %v7053_v35 = vld [vmem:[%s10503_s1 + $0xd4] sm:$0xf] }
 0x159   : > { %v7877_v30 = vadd.f32 %v1619_v14, %v1253_v28 }
 0x15b   : > { %5839 = vmatmul.msk.bf16.gmra.mxu1 %vm975_vm0, %v7011_v61  ;;  %v1624_v38 = vpop.f32.mrf.mxu3 }
 0x15f   : > { %v1477_v42 = vpop.f32.mrf.mxu2 }
 0x160   : > { %v1255_v39 = vpop.f32.mrf.mxu1  ;;  %v7886_v49 = vadd.f32 %v1477_v42, %v1111_v36  ;;  %v1114_v53 = vpop.f32.mrf.mxu0 }
 0x161   : > { %v7883_v41 = vadd.f32 %v1621_v26, %v1255_v39 }
 0x163   : > { %5813 = vmatmul.msk.bf16.gmra.mxu0 %vm975_vm0, %v7013_v46  ;;  %v1626_v55 = vpop.f32.mrf.mxu3 }
 0x164   : > { %5921 = vmatmul.msk.bf16.gmra.mxu2 %vm975_vm0, %v7012_v22 }
 0x167   : > { %v1480_v4 = vpop.f32.mrf.mxu2 }
 0x168   : > { %v1258_v58 = vpop.f32.mrf.mxu1  ;;  %v7892_v61 = vadd.f32 %v1480_v4, %v1114_v53  ;;  %v1116_v6 = vpop.f32.mrf.mxu0  ;;  %5949 = vmatmul.msk.bf16.gmra.mxu3 %vm975_vm0, %v7012_v22  ;;  %v7054_v4 = vld [vmem:[%s10503_s1 + $0xd4] sm:$0xf0] }
 0x169   : > { %v7890_v1 = vadd.f32 %v1624_v38, %v1258_v58  ;;  %v5986_v58 = vld [vmem:[%s10503_s1 + $0xd0] sm:$0xf] }
 0x16b   : > { %5840 = vmatmul.msk.bf16.gmra.mxu1 %vm975_vm0, %v7012_v22  ;;  %v1629_v10 = vpop.f32.mrf.mxu3  ;;  %v5988_v22 = vld [vmem:[%s10503_s1 + $0xd8] sm:$0xf0] }
 0x16c   : > { %v5991_v38 = vor.u32 %v7053_v35, %v5988_v22  ;;  %v7015_v35 = vld [vmem:[%s7606_s27 + $0xa0] sm:$0xff] }
 0x16e   : > { %1960 = vmatpush.bf16.msra.mxu1 %v5991_v38 }
 0x16f   : > { %v1482_v16 = vpop.f32.mrf.mxu2 }
 0x170   : > { %v1260_v13 = vpop.f32.mrf.mxu1  ;;  %v7899_v25 = vadd.f32 %v1482_v16, %v1116_v6  ;;  %v1119_v26 = vpop.f32.mrf.mxu0  ;;  %v5987_v6 = vor.u32 %v7054_v4, %v5986_v58 }
 0x171   : > { %v7896_v14 = vadd.f32 %v1626_v55, %v1260_v13 }
 0x172   : > { %1811 = vmatpush.bf16.msrb.mxu0 %v5987_v6 }
 0x173   : > { %5814 = vmatmul.msk.bf16.gmra.mxu0 %vm975_vm0, %v7014_v21  ;;  %v1631_v28 = vpop.f32.mrf.mxu3 }
 0x174   : > { %5922 = vmatmul.msk.bf16.gmra.mxu2 %vm975_vm0, %v7013_v46 }
 0x177   : > { %v1485_v42 = vpop.f32.mrf.mxu2 }
 0x178   : > { %v1263_v36 = vpop.f32.mrf.mxu1  ;;  %v7911_v53 = vadd.f32 %v1485_v42, %v1119_v26  ;;  %v1121_v55 = vpop.f32.mrf.mxu0  ;;  %5950 = vmatmul.msk.bf16.gmra.mxu3 %vm975_vm0, %v7013_v46 }
 0x179   : > { %v7909_v39 = vadd.f32 %v1629_v10, %v1263_v36 }
 0x17b   : > { %10523 = vst [vmem:[#allocation5_spill] sm:$0xff] %v7909_v39  ;;  %5841 = vmatmul.msk.bf16.gmra.mxu1 %vm975_vm0, %v7013_v46  ;;  %v1634_v10 = vpop.f32.mrf.mxu3 }
 0x17f   : > { %v1487_v26 = vpop.f32.mrf.mxu2 }
 0x180   : > { %v1265_v13 = vpop.f32.mrf.mxu1  ;;  %v7924_v22 = vadd.f32 %v1487_v26, %v1121_v55  ;;  %v1124_v36 = vpop.f32.mrf.mxu0  ;;  %v7016_v26 = vld [vmem:[%s7606_s27 + $0xa8] sm:$0xff] }
 0x181   : > { %v7921_v16 = vadd.f32 %v1631_v28, %v1265_v13 }
 0x183   : > { %10524 = vst [vmem:[#allocation6_spill] sm:$0xff] %v7921_v16  ;;  %5815 = vmatmul.msk.bf16.gmra.mxu0 %vm975_vm0, %v7015_v35  ;;  %v1636_v38 = vpop.f32.mrf.mxu3 }
 0x184   : > { %5923 = vmatmul.msk.bf16.gmra.mxu2 %vm975_vm0, %v7014_v21 }
 0x187   : > { %v1490_v46 = vpop.f32.mrf.mxu2 }
 0x188   : > { %v1268_v42 = vpop.f32.mrf.mxu1  ;;  %v7930_v58 = vadd.f32 %v1490_v46, %v1124_v36  ;;  %v1126_v4 = vpop.f32.mrf.mxu0  ;;  %5951 = vmatmul.msk.bf16.gmra.mxu3 %vm975_vm0, %v7014_v21 }
 0x189   : > { %v7928_v5 = vadd.f32 %v1634_v10, %v1268_v42 }
 0x18b   : > { %10525 = vst [vmem:[#allocation7_spill] sm:$0xff] %v7928_v5  ;;  %5842 = vmatmul.msk.bf16.gmra.mxu1 %vm975_vm0, %v7014_v21  ;;  %v1639_v28 = vpop.f32.mrf.mxu3 }
 0x18f   : > { %v1492_v13 = vpop.f32.mrf.mxu2 }
 0x190   : > { %v1270_v55 = vpop.f32.mrf.mxu1  ;;  %v7937_v0 = vadd.f32 %v1492_v13, %v1126_v4  ;;  %v1129_v16 = vpop.f32.mrf.mxu0 }
 0x191   : > { %v7934_v6 = vadd.f32 %v1636_v38, %v1270_v55 }
 0x192   : > { %10527 = vst [vmem:[#allocation9_spill] sm:$0xff] %v7937_v0 }
 0x193   : > { %10526 = vst [vmem:[#allocation8_spill] sm:$0xff] %v7934_v6  ;;  %5816 = vmatmul.msk.bf16.gmra.mxu0 %vm975_vm0, %v7016_v26  ;;  %v1641_v10 = vpop.f32.mrf.mxu3  ;;  %v7017_v6 = vld [vmem:[%s7606_s27 + $0xb0] sm:$0xff] }
 0x194   : > { %5924 = vmatmul.msk.bf16.gmra.mxu2 %vm975_vm0, %v7015_v35 }
 0x197   : > { %v1495_v46 = vpop.f32.mrf.mxu2 }
 0x198   : > { %v1273_v36 = vpop.f32.mrf.mxu1  ;;  %v7943_v21 = vadd.f32 %v1495_v46, %v1129_v16  ;;  %v1131_v5 = vpop.f32.mrf.mxu0  ;;  %5952 = vmatmul.msk.bf16.gmra.mxu3 %vm975_vm0, %v7015_v35  ;;  %v7074_v16 = vld [vmem:[%s10503_s1 + $0x174] sm:$0xf0] }
 0x199   : > { %v7941_v42 = vadd.f32 %v1639_v28, %v1273_v36  ;;  %v6138_v28 = vld [vmem:[%s10503_s1 + $0x170] sm:$0xf] }
 0x19a   : > { %10529 = vst [vmem:[#allocation11_spill] sm:$0xff] %v7943_v21  ;;  %v6139_v36 = vor.u32 %v7074_v16, %v6138_v28 }
 0x19b   : > { %10528 = vst [vmem:[#allocation10_spill] sm:$0xff] %v7941_v42  ;;  %5843 = vmatmul.msk.bf16.gmra.mxu1 %vm975_vm0, %v7015_v35  ;;  %v1644_v38 = vpop.f32.mrf.mxu3  ;;  %v7073_v35 = vld [vmem:[%s10503_s1 + $0x174] sm:$0xf] }
 0x19c   : > { %2298 = vmatpush.bf16.msrb.mxu2 %v6139_v36 }
 0x19f   : > { %v1497_v13 = vpop.f32.mrf.mxu2 }
 0x1a0   : > { %v1275_v4 = vpop.f32.mrf.mxu1  ;;  %v7950_v0 = vadd.f32 %v1497_v13, %v1131_v5  ;;  %v1134_v39 = vpop.f32.mrf.mxu0 }
 0x1a1   : > { %v7947_v55 = vadd.f32 %v1641_v10, %v1275_v4  ;;  %v6140_v10 = vld [vmem:[%s10503_s1 + $0x178] sm:$0xf0] }
 0x1a2   : > { %10531 = vst [vmem:[#allocation13_spill] sm:$0xff] %v7950_v0  ;;  %v6143_v5 = vor.u32 %v7073_v35, %v6140_v10  ;;  %v7018_v0 = vld [vmem:[%s7606_s27 + $0xb8] sm:$0xff] }
 0x1a3   : > { %10530 = vst [vmem:[#allocation12_spill] sm:$0xff] %v7947_v55  ;;  %5817 = vmatmul.msk.bf16.gmra.mxu0 %vm975_vm0, %v7017_v6  ;;  %v1646_v46 = vpop.f32.mrf.mxu3 }
 0x1a4   : > { %5925 = vmatmul.msk.bf16.gmra.mxu2 %vm975_vm0, %v7016_v26  ;;  %2447 = vmatpush.bf16.msrb.mxu3 %v6143_v5 }
 0x1a7   : > { %v1500_v55 = vpop.f32.mrf.mxu2 }
 0x1a8   : > { %v1278_v4 = vpop.f32.mrf.mxu1  ;;  %v7968_v42 = vadd.f32 %v1500_v55, %v1134_v39  ;;  %v1136_v28 = vpop.f32.mrf.mxu0  ;;  %5953 = vmatmul.msk.bf16.gmra.mxu3 %vm975_vm0, %v7016_v26 }
 0x1a9   : > { %v7966_v13 = vadd.f32 %v1644_v38, %v1278_v4 }
 0x1aa   : > { %10533 = vst [vmem:[#allocation15_spill] sm:$0xff] %v7968_v42 }
 0x1ab   : > { %10532 = vst [vmem:[#allocation14_spill] sm:$0xff] %v7966_v13  ;;  %5844 = vmatmul.msk.bf16.gmra.mxu1 %vm975_vm0, %v7016_v26  ;;  %v1649_v16 = vpop.f32.mrf.mxu3 }
 0x1af   : > { %v1502_v36 = vpop.f32.mrf.mxu2 }
 0x1b0   : > { %v1280_v35 = vpop.f32.mrf.mxu1  ;;  %v7975_v21 = vadd.f32 %v1502_v36, %v1136_v28  ;;  %v1139_v5 = vpop.f32.mrf.mxu0 }
 0x1b1   : > { %v7972_v10 = vadd.f32 %v1646_v46, %v1280_v35 }
 0x1b2   : > { %10535 = vst [vmem:[#allocation17_spill] sm:$0xff] %v7975_v21 }
 0x1b3   : > { %10534 = vst [vmem:[#allocation16_spill] sm:$0xff] %v7972_v10  ;;  %5818 = vmatmul.msk.bf16.gmra.mxu0 %vm975_vm0, %v7018_v0  ;;  %v1651_v39 = vpop.f32.mrf.mxu3  ;;  %v7019_v10 = vld [vmem:[%s7606_s27 + $0xc0] sm:$0xff] }
 0x1b4   : > { %5926 = vmatmul.msk.bf16.gmra.mxu2 %vm975_vm0, %v7017_v6 }
 0x1b7   : > { %v1505_v4 = vpop.f32.mrf.mxu2 }
 0x1b8   : > { %v1283_v38 = vpop.f32.mrf.mxu1  ;;  %v7981_v26 = vadd.f32 %v1505_v4, %v1139_v5  ;;  %v1141_v13 = vpop.f32.mrf.mxu0  ;;  %5954 = vmatmul.msk.bf16.gmra.mxu3 %vm975_vm0, %v7017_v6  ;;  %v5980_v5 = vld [vmem:[%s10503_s1 + $0xc8] sm:$0xf0] }
 0x1b9   : > { %v7979_v55 = vadd.f32 %v1649_v16, %v1283_v38  ;;  %v7051_v16 = vld [vmem:[%s10503_s1 + $0xc4] sm:$0xf] }
 0x1ba   : > { %10537 = vst [vmem:[#allocation19_spill] sm:$0xff] %v7981_v26  ;;  %v5983_v38 = vor.u32 %v7051_v16, %v5980_v5 }
 0x1bb   : > { %10536 = vst [vmem:[#allocation18_spill] sm:$0xff] %v7979_v55  ;;  %5845 = vmatmul.msk.bf16.gmra.mxu1 %vm975_vm0, %v7017_v6  ;;  %v1654_v46 = vpop.f32.mrf.mxu3  ;;  %v5978_v6 = vld [vmem:[%s10503_s1 + $0xc0] sm:$0xf] }
 0x1bc   : > { %1961 = vmatpush.bf16.msra.mxu1 %v5983_v38 }
 0x1bf   : > { %v1507_v36 = vpop.f32.mrf.mxu2 }
 0x1c0   : > { %v1285_v28 = vpop.f32.mrf.mxu1  ;;  %v7988_v21 = vadd.f32 %v1507_v36, %v1141_v13  ;;  %v1144_v42 = vpop.f32.mrf.mxu0 }
 0x1c1   : > { %v7985_v35 = vadd.f32 %v1651_v39, %v1285_v28  ;;  %v7052_v39 = vld [vmem:[%s10503_s1 + $0xc4] sm:$0xf0] }
 0x1c2   : > { %10539 = vst [vmem:[#allocation21_spill] sm:$0xff] %v7988_v21  ;;  %v5979_v13 = vor.u32 %v7052_v39, %v5978_v6  ;;  %v7020_v21 = vld [vmem:[%s7606_s27 + $0xc8] sm:$0xff] }
 0x1c3   : > { %10538 = vst [vmem:[#allocation20_spill] sm:$0xff] %v7985_v35  ;;  %5819 = vmatmul.msk.bf16.gmra.mxu0 %vm975_vm0, %v7019_v10  ;;  %v1656_v4 = vpop.f32.mrf.mxu3 }
 0x1c4   : > { %5927 = vmatmul.msk.bf16.gmra.mxu2 %vm975_vm0, %v7018_v0  ;;  %1812 = vmatpush.bf16.msrb.mxu0 %v5979_v13 }
 0x1c7   : > { %v1510_v35 = vpop.f32.mrf.mxu2 }
 0x1c8   : > { %v1288_v28 = vpop.f32.mrf.mxu1  ;;  %v8006_v55 = vadd.f32 %v1510_v35, %v1144_v42  ;;  %v1146_v16 = vpop.f32.mrf.mxu0  ;;  %5955 = vmatmul.msk.bf16.gmra.mxu3 %vm975_vm0, %v7018_v0 }
 0x1c9   : > { %v8004_v36 = vadd.f32 %v1654_v46, %v1288_v28 }
 0x1cb   : > { %10540 = vst [vmem:[#allocation22_spill] sm:$0xff] %v8004_v36  ;;  %5846 = vmatmul.msk.bf16.gmra.mxu1 %vm975_vm0, %v7018_v0  ;;  %v1659_v5 = vpop.f32.mrf.mxu3 }
 0x1cf   : > { %v1512_v38 = vpop.f32.mrf.mxu2 }
 0x1d0   : > { %v1290_v6 = vpop.f32.mrf.mxu1  ;;  %v8013_v26 = vadd.f32 %v1512_v38, %v1146_v16  ;;  %v1149_v13 = vpop.f32.mrf.mxu0  ;;  %v6130_v38 = vld [vmem:[%s10503_s1 + $0x160] sm:$0xf] }
 0x1d1   : > { %v8010_v39 = vadd.f32 %v1656_v4, %v1290_v6 }
 0x1d2   : > { %10542 = vst [vmem:[#allocation24_spill] sm:$0xff] %v8013_v26 }
 0x1d3   : > { %10541 = vst [vmem:[#allocation23_spill] sm:$0xff] %v8010_v39  ;;  %5820 = vmatmul.msk.bf16.gmra.mxu0 %vm975_vm0, %v7020_v21  ;;  %v1661_v42 = vpop.f32.mrf.mxu3 }
 0x1d4   : > { %5928 = vmatmul.msk.bf16.gmra.mxu2 %vm975_vm0, %v7019_v10 }
 0x1d7   : > { %v1515_v28 = vpop.f32.mrf.mxu2 }
 0x1d8   : > { %v1293_v46 = vpop.f32.mrf.mxu1  ;;  %v8019_v0 = vadd.f32 %v1515_v28, %v1149_v13  ;;  %v1151_v36 = vpop.f32.mrf.mxu0  ;;  %5956 = vmatmul.msk.bf16.gmra.mxu3 %vm975_vm0, %v7019_v10  ;;  %v7021_v13 = vld [vmem:[%s7606_s27 + $0xd0] sm:$0xff] }
 0x1d9   : > { %v8017_v35 = vadd.f32 %v1659_v5, %v1293_v46  ;;  %v7072_v5 = vld [vmem:[%s10503_s1 + $0x164] sm:$0xf0] }
 0x1da   : > { %10544 = vst [vmem:[#allocation26_spill] sm:$0xff] %v8019_v0  ;;  %v6131_v28 = vor.u32 %v7072_v5, %v6130_v38  ;;  %v6114_v38 = vld [vmem:[%s10503_s1 + $0x140] sm:$0xf]  ;;  %v7068_v5 = vld [vmem:[%s10503_s1 + $0x144] sm:$0xf0] }
 0x1db   : > { %10543 = vst [vmem:[#allocation25_spill] sm:$0xff] %v8017_v35  ;;  %5847 = vmatmul.msk.bf16.gmra.mxu1 %vm975_vm0, %v7019_v10  ;;  %v1664_v4 = vpop.f32.mrf.mxu3  ;;  %v6122_v10 = vld [vmem:[%s10503_s1 + $0x150] sm:$0xf] }
 0x1dc   : > { %2299 = vmatpush.bf16.msrb.mxu2 %v6131_v28  ;;  %v6115_v28 = vor.u32 %v7068_v5, %v6114_v38 }
 0x1df   : > { %v1517_v46 = vpop.f32.mrf.mxu2 }
 0x1e0   : > { %v1295_v16 = vpop.f32.mrf.mxu1  ;;  %v8032_v35 = vadd.f32 %v1517_v46, %v1151_v36  ;;  %v1154_v39 = vpop.f32.mrf.mxu0 }
 0x1e1   : > { %v8023_v6 = vadd.f32 %v1661_v42, %v1295_v16  ;;  %v7070_v42 = vld [vmem:[%s10503_s1 + $0x154] sm:$0xf0] }
 0x1e2   : > { %10546 = vst [vmem:[#allocation28_spill] sm:$0xff] %v8032_v35  ;;  %v6123_v16 = vor.u32 %v7070_v42, %v6122_v10  ;;  %v6106_v42 = vld [vmem:[%s10503_s1 + $0x130] sm:$0xf] }
 0x1e3   : > { %10545 = vst [vmem:[#allocation27_spill] sm:$0xff] %v8023_v6  ;;  %5821 = vmatmul.msk.bf16.gmra.mxu0 %vm975_vm0, %v7021_v13  ;;  %v1666_v6 = vpop.f32.mrf.mxu3 }
 0x1e4   : > { %5929 = vmatmul.msk.bf16.gmra.mxu2 %vm975_vm0, %v7020_v21 }
 0x1e5   : > { %2300 = vmatpush.bf16.msrb.mxu2 %v6123_v16  ;;  %v7066_v16 = vld [vmem:[%s10503_s1 + $0x134] sm:$0xf0] }
 0x1e6   : > { %v6107_v38 = vor.u32 %v7066_v16, %v6106_v42 }
 0x1e7   : > { %v1520_v46 = vpop.f32.mrf.mxu2 }
 0x1e8   : > { %v1298_v0 = vpop.f32.mrf.mxu1  ;;  %v8050_v35 = vadd.f32 %v1520_v46, %v1154_v39  ;;  %v1156_v10 = vpop.f32.mrf.mxu0  ;;  %5957 = vmatmul.msk.bf16.gmra.mxu3 %vm975_vm0, %v7020_v21 }
 0x1e9   : > { %v8042_v36 = vadd.f32 %v1664_v4, %v1298_v0  ;;  %v7071_v0 = vld [vmem:[%s10503_s1 + $0x164] sm:$0xf]  ;;  %v6132_v4 = vld [vmem:[%s10503_s1 + $0x168] sm:$0xf0]  ;;  %2301 = vmatpush.bf16.msrb.mxu2 %v6115_v28 }
 0x1ea   : > { %10548 = vst [vmem:[#allocation30_spill] sm:$0xff] %v8050_v35  ;;  %v6135_v39 = vor.u32 %v7071_v0, %v6132_v4  ;;  %v6098_v35 = vld [vmem:[%s10503_s1 + $0x120] sm:$0xf]  ;;  %v7022_v0 = vld [vmem:[%s7606_s27 + $0xd8] sm:$0xff] }
 0x1eb   : > { %10547 = vst [vmem:[#allocation29_spill] sm:$0xff] %v8042_v36  ;;  %5848 = vmatmul.msk.bf16.gmra.mxu1 %vm975_vm0, %v7020_v21  ;;  %v1669_v5 = vpop.f32.mrf.mxu3  ;;  %v7064_v21 = vld [vmem:[%s10503_s1 + $0x124] sm:$0xf0] }
 0x1ec   : > { %2448 = vmatpush.bf16.msrb.mxu3 %v6135_v39  ;;  %v6099_v4 = vor.u32 %v7064_v21, %v6098_v35  ;;  %v6124_v39 = vld [vmem:[%s10503_s1 + $0x158] sm:$0xf0]  ;;  %v7067_v21 = vld [vmem:[%s10503_s1 + $0x144] sm:$0xf] }
 0x1ed   : > { %2302 = vmatpush.bf16.msrb.mxu2 %v6107_v38 }
 0x1ef   : > { %v1522_v28 = vpop.f32.mrf.mxu2 }
 0x1f0   : > { %v1300_v46 = vpop.f32.mrf.mxu1  ;;  %v8075_v26 = vadd.f32 %v1522_v28, %v1156_v10  ;;  %v1159_v42 = vpop.f32.mrf.mxu0  ;;  %v6116_v28 = vld [vmem:[%s10503_s1 + $0x148] sm:$0xf0] }
 0x1f1   : > { %v8066_v36 = vadd.f32 %v1666_v6, %v1300_v46  ;;  %2303 = vmatpush.bf16.msrb.mxu2 %v6099_v4  ;;  %v7069_v6 = vld [vmem:[%s10503_s1 + $0x154] sm:$0xf] }
 0x1f2   : > { %10550 = vst [vmem:[#allocation32_spill] sm:$0xff] %v8075_v26  ;;  %v6127_v38 = vor.u32 %v7069_v6, %v6124_v39  ;;  %v6119_v26 = vor.u32 %v7067_v21, %v6116_v28  ;;  %v6108_v6 = vld [vmem:[%s10503_s1 + $0x138] sm:$0xf0] }
 0x1f3   : > { %10549 = vst [vmem:[#allocation31_spill] sm:$0xff] %v8066_v36  ;;  %5822 = vmatmul.msk.bf16.gmra.mxu0 %vm975_vm0, %v7022_v0  ;;  %v1671_v16 = vpop.f32.mrf.mxu3 }
 0x1f4   : > { %5930 = vmatmul.msk.bf16.gmra.mxu2 %vm975_vm0, %v7021_v13  ;;  %2449 = vmatpush.bf16.msrb.mxu3 %v6127_v38 }
 0x1f7   : > { %v1525_v10 = vpop.f32.mrf.mxu2 }
 0x1f8   : > { %v1303_v46 = vpop.f32.mrf.mxu1  ;;  %v8093_v4 = vadd.f32 %v1525_v10, %v1159_v42  ;;  %v1161_v36 = vpop.f32.mrf.mxu0  ;;  %5958 = vmatmul.msk.bf16.gmra.mxu3 %vm975_vm0, %v7021_v13 }
 0x1f9   : > { %v8085_v35 = vadd.f32 %v1669_v5, %v1303_v46  ;;  %2450 = vmatpush.bf16.msrb.mxu3 %v6119_v26  ;;  %v7065_v5 = vld [vmem:[%s10503_s1 + $0x134] sm:$0xf]  ;;  %v6100_v26 = vld [vmem:[%s10503_s1 + $0x128] sm:$0xf0] }
 0x1fa   : > { %v6111_v38 = vor.u32 %v7065_v5, %v6108_v6 }
 0x1fb   : > { %10551 = vst [vmem:[#allocation33_spill] sm:$0xff] %v8085_v35  ;;  %5849 = vmatmul.msk.bf16.gmra.mxu1 %vm975_vm0, %v7021_v13  ;;  %v1674_v39 = vpop.f32.mrf.mxu3  ;;  %v7063_v13 = vld [vmem:[%s10503_s1 + $0x124] sm:$0xf] }
 0x1fc   : > { %v6103_v35 = vor.u32 %v7063_v13, %v6100_v26  ;;  %v6260_v13 = vld [vmem:[%s10503_s1 + $0x1d8] sm:$0xf0] }
 0x1fd   : > { %2451 = vmatpush.bf16.msrb.mxu3 %v6111_v38 }
 0x1ff   : > { %v1527_v10 = vpop.f32.mrf.mxu2 }
 0x200   : > { %v1305_v46 = vpop.f32.mrf.mxu1  ;;  %v8111_v21 = vadd.f32 %v1527_v10, %v1161_v36  ;;  %v1164_v28 = vpop.f32.mrf.mxu0  ;;  %v6258_v36 = vld [vmem:[%s10503_s1 + $0x1d0] sm:$0xf]  ;;  %v7085_v10 = vld [vmem:[%s10503_s1 + $0x1d4] sm:$0xf] }
 0x201   : > { %v8103_v42 = vadd.f32 %v1671_v16, %v1305_v46  ;;  %2452 = vmatpush.bf16.msrb.mxu3 %v6103_v35  ;;  %v7086_v35 = vld [vmem:[%s10503_s1 + $0x1d4] sm:$0xf0]  ;;  %v6263_v26 = vor.u32 %v7085_v10, %v6260_v13 }
 0x202   : > { %10553 = vst [vmem:[#allocation35_spill] sm:$0xff] %v8111_v21 }
 0x203   : > { %10552 = vst [vmem:[#allocation34_spill] sm:$0xff] %v8103_v42  ;;  %6024 = vmatmul.msk.bf16.vlgmr.msrb.gmra.mxu0 %vm975_vm0, %v7658_v45  ;;  %v1676_v16 = vpop.f32.mrf.mxu3  ;;  %2938 = vmatpush.bf16.msrb.mxu1 %v6263_v26 }
 0x204   : > { %5931 = vmatmul.msk.bf16.gmra.mxu2 %vm975_vm0, %v7022_v0 }
 0x207   : > { %v1530_v38 = vpop.f32.mrf.mxu2 }
 0x208   : > { %v1308_v5 = vpop.f32.mrf.mxu1  ;;  %v8118_v46 = vadd.f32 %v1530_v38, %v1164_v28  ;;  %v1166_v42 = vpop.f32.mrf.mxu0  ;;  %5959 = vmatmul.msk.bf16.gmra.mxu3 %vm975_vm0, %v7022_v0 }
 0x209   : > { %v8116_v6 = vadd.f32 %v1674_v39, %v1308_v5  ;;  %v6259_v39 = vor.u32 %v7086_v35, %v6258_v36 }
 0x20a   : > { %10555 = vst [vmem:[#allocation37_spill] sm:$0xff] %v8118_v46 }
 0x20b   : > { %10554 = vst [vmem:[#allocation36_spill] sm:$0xff] %v8116_v6  ;;  %5850 = vmatmul.msk.bf16.gmra.mxu1 %vm975_vm0, %v7022_v0  ;;  %2789 = vmatpush.bf16.msra.mxu0 %v6259_v39  ;;  %v1679_v28 = vpop.f32.mrf.mxu3 }
 0x20f   : > { %v1532_v6 = vpop.f32.mrf.mxu2 }
 0x210   : > { %v1310_v5 = vpop.f32.mrf.mxu1  ;;  %v8136_v46 = vadd.f32 %v1532_v6, %v1166_v42  ;;  %v1169_v21 = vpop.f32.mrf.mxu0 }
 0x211   : > { %v8134_v38 = vadd.f32 %v1676_v16, %v1310_v5  ;;  %v7256_v16 = vld [vmem:[%s7606_s27 + $0xe0] sm:$0xff] }
 0x212   : > { %10557 = vst [vmem:[#allocation39_spill] sm:$0xff] %v8136_v46 }
 0x213   : > { %10556 = vst [vmem:[#allocation38_spill] sm:$0xff] %v8134_v38  ;;  %6025 = vmatmul.msk.bf16.gmra.mxu0 %vm975_vm0, %v7672_v50  ;;  %v1681_v0 = vpop.f32.mrf.mxu3 }
 0x214   : > { %6144 = vmatmul.msk.bf16.vlgmr.msrb.gmra.mxu2 %vm975_vm0, %v7672_v50 }
 0x217   : > { %v1535_v10 = vpop.f32.mrf.mxu2 }
 0x218   : > { %v1313_v36 = vpop.f32.mrf.mxu1  ;;  %v8144_v39 = vadd.f32 %v1535_v10, %v1169_v21  ;;  %v1171_v13 = vpop.f32.mrf.mxu0  ;;  %6172 = vmatmul.msk.bf16.vlgmr.msrb.gmra.mxu3 %vm975_vm0, %v7672_v50 }
 0x219   : > { %v8142_v35 = vadd.f32 %v1679_v28, %v1313_v36 }
 0x21b   : > { %10558 = vst [vmem:[#allocation40_spill] sm:$0xff] %v8142_v35  ;;  %5851 = vmatmul.msk.bf16.gmra.mxu1 %vm975_vm0, %v7256_v16  ;;  %v1684_v42 = vpop.f32.mrf.mxu3 }
 0x21f   : > { %v1537_v5 = vpop.f32.mrf.mxu2 }
 0x220   : > { %v1315_v6 = vpop.f32.mrf.mxu1  ;;  %v8152_v38 = vadd.f32 %v1537_v5, %v1171_v13  ;;  %v1174_v46 = vpop.f32.mrf.mxu0 }
 0x221   : > { %v8150_v26 = vadd.f32 %v1681_v0, %v1315_v6 }
 0x222   : > { %10560 = vst [vmem:[#allocation42_spill] sm:$0xff] %v8152_v38 }
 0x223   : > { %10559 = vst [vmem:[#allocation41_spill] sm:$0xff] %v8150_v26  ;;  %6026 = vmatmul.msk.bf16.gmra.mxu0 %vm975_vm0, %v7683_v51  ;;  %v1686_v21 = vpop.f32.mrf.mxu3 }
 0x224   : > { %6145 = vmatmul.msk.bf16.gmra.mxu2 %vm975_vm0, %v7683_v51 }
 0x227   : > { %v1540_v10 = vpop.f32.mrf.mxu2 }
 0x228   : > { %v1318_v28 = vpop.f32.mrf.mxu1  ;;  %v8160_v16 = vadd.f32 %v1540_v10, %v1174_v46  ;;  %v1176_v35 = vpop.f32.mrf.mxu0  ;;  %6173 = vmatmul.msk.bf16.gmra.mxu3 %vm975_vm0, %v7683_v51 }
 0x229   : > { %v8158_v36 = vadd.f32 %v1684_v42, %v1318_v28 }
 0x22b   : > { %10561 = vst [vmem:[#allocation43_spill] sm:$0xff] %v8158_v36  ;;  %6052 = vmatmul.msk.bf16.vlgmr.msra.gmra.mxu1 %vm975_vm0, %v7658_v45  ;;  %v1689_v0 = vpop.f32.mrf.mxu3  ;;  %v7259_v36 = vld [vmem:[%s7606_s27 + $0x38] sm:$0xff] }
 0x22f   : > { %v1542_v5 = vpop.f32.mrf.mxu2 }
 0x230   : > { %v1320_v13 = vpop.f32.mrf.mxu1  ;;  %v8168_v26 = vadd.f32 %v1542_v5, %v1176_v35  ;;  %v1179_v38 = vpop.f32.mrf.mxu0 }
 0x231   : > { %v8166_v6 = vadd.f32 %v1686_v21, %v1320_v13 }
 0x232   : > { %10563 = vst [vmem:[#allocation45_spill] sm:$0xff] %v8168_v26 }
 0x233   : > { %10562 = vst [vmem:[#allocation44_spill] sm:$0xff] %v8166_v6  ;;  %6027 = vmatmul.msk.bf16.gmra.mxu0 %vm975_vm0, %v7694_v52  ;;  %v1691_v46 = vpop.f32.mrf.mxu3 }
 0x234   : > { %6146 = vmatmul.msk.bf16.gmra.mxu2 %vm975_vm0, %v7694_v52 }
 0x237   : > { %v1545_v28 = vpop.f32.mrf.mxu2 }
 0x238   : > { %v1323_v42 = vpop.f32.mrf.mxu1  ;;  %v8176_v51 = vadd.f32 %v1545_v28, %v1179_v38  ;;  %v1181_v10 = vpop.f32.mrf.mxu0  ;;  %6174 = vmatmul.msk.bf16.gmra.mxu3 %vm975_vm0, %v7694_v52 }
 0x239   : > { %v8174_v45 = vadd.f32 %v1689_v0, %v1323_v42 }
 0x23a   : > { %10565 = vst [vmem:[#allocation47_spill] sm:$0xff] %v8176_v51 }
 0x23b   : > { %10564 = vst [vmem:[#allocation46_spill] sm:$0xff] %v8174_v45  ;;  %6053 = vmatmul.msk.bf16.gmra.mxu1 %vm975_vm0, %v7672_v50  ;;  %v1694_v35 = vpop.f32.mrf.mxu3 }
 0x23f   : > { %v1547_v5 = vpop.f32.mrf.mxu2 }
 0x240   : > { %v1325_v21 = vpop.f32.mrf.mxu1  ;;  %v8184_v6 = vadd.f32 %v1547_v5, %v1181_v10  ;;  %v1184_v0 = vpop.f32.mrf.mxu0 }
 0x241   : > { %v8182_v13 = vadd.f32 %v1691_v46, %v1325_v21  ;;  %v8195_v46 = vld [vmem:[%s7606_s27 + $0x20] sm:$0xff] }
 0x242   : > { %10567 = vst [vmem:[#allocation49_spill] sm:$0xff] %v8184_v6 }
 0x243   : > { %10566 = vst [vmem:[#allocation48_spill] sm:$0xff] %v8182_v13  ;;  %6028 = vmatmul.msk.bf16.gmra.mxu0 %vm975_vm0, %v7717_v59  ;;  %v1696_v38 = vpop.f32.mrf.mxu3 }
 0x244   : > { %6147 = vmatmul.msk.bf16.gmra.mxu2 %vm975_vm0, %v7717_v59 }
 0x247   : > { %v1550_v28 = vpop.f32.mrf.mxu2 }
 0x248   : > { %v1328_v50 = vpop.f32.mrf.mxu1  ;;  %v8192_v52 = vadd.f32 %v1550_v28, %v1184_v0  ;;  %v1186_v45 = vpop.f32.mrf.mxu0  ;;  %6175 = vmatmul.msk.bf16.gmra.mxu3 %vm975_vm0, %v7717_v59  ;;  %v6250_v59 = vld [vmem:[%s10503_s1 + $0x1c0] sm:$0xf] }
 0x249   : > { %v8190_v42 = vadd.f32 %v1694_v35, %v1328_v50 }
 0x24a   : > { %10569 = vst [vmem:[#allocation51_spill] sm:$0xff] %v8192_v52  ;;  %v8226_v52 = vld [vmem:[%s7606_s27 + $0x28] sm:$0xff] }
 0x24b   : > { %10568 = vst [vmem:[#allocation50_spill] sm:$0xff] %v8190_v42  ;;  %6054 = vmatmul.msk.bf16.gmra.mxu1 %vm975_vm0, %v8195_v46  ;;  %v1699_v10 = vpop.f32.mrf.mxu3 }
 0x24c   : > { %10574 = vst [vmem:[#allocation56_spill] sm:$0xff] %v8226_v52 }
 0x24f   : > { %v1552_v13 = vpop.f32.mrf.mxu2 }
 0x250   : > { %v1330_v21 = vpop.f32.mrf.mxu1  ;;  %v8203_v6 = vadd.f32 %v1552_v13, %v1186_v45  ;;  %v1189_v35 = vpop.f32.mrf.mxu0  ;;  %v7083_v45 = vld [vmem:[%s10503_s1 + $0x1c4] sm:$0xf] }
 0x251   : > { %v8201_v5 = vadd.f32 %v1696_v38, %v1330_v21  ;;  %v7084_v38 = vld [vmem:[%s10503_s1 + $0x1c4] sm:$0xf0] }
 0x252   : > { %10571 = vst [vmem:[#allocation53_spill] sm:$0xff] %v8203_v6  ;;  %v6251_v50 = vor.u32 %v7084_v38, %v6250_v59 }
 0x253   : > { %10570 = vst [vmem:[#allocation52_spill] sm:$0xff] %v8201_v5  ;;  %6029 = vmatmul.msk.bf16.gmra.mxu0 %vm975_vm0, %v7728_v60  ;;  %v1701_v0 = vpop.f32.mrf.mxu3 }
 0x254   : > { %6148 = vmatmul.msk.bf16.gmra.mxu2 %vm975_vm0, %v7728_v60  ;;  %v6252_v60 = vld [vmem:[%s10503_s1 + $0x1c8] sm:$0xf0]  ;;  %2790 = vmatpush.bf16.msra.mxu0 %v6251_v50 }
 0x255   : > { %v6255_v21 = vor.u32 %v7083_v45, %v6252_v60 }
 0x257   : > { %v1555_v5 = vpop.f32.mrf.mxu2  ;;  %2939 = vmatpush.bf16.msrb.mxu1 %v6255_v21 }
 0x258   : > { %v1333_v13 = vpop.f32.mrf.mxu1  ;;  %v8223_v42 = vadd.f32 %v1555_v5, %v1189_v35  ;;  %v1191_v6 = vpop.f32.mrf.mxu0  ;;  %6176 = vmatmul.msk.bf16.gmra.mxu3 %vm975_vm0, %v7259_v36  ;;  %v7260_v35 = vld [vmem:[%s7606_s27 + $0x40] sm:$0xff] }
 0x259   : > { %v8221_v28 = vadd.f32 %v1699_v10, %v1333_v13 }
 0x25a   : > { %10573 = vst [vmem:[#allocation55_spill] sm:$0xff] %v8223_v42 }
 0x25b   : > { %10572 = vst [vmem:[#allocation54_spill] sm:$0xff] %v8221_v28  ;;  %6055 = vmatmul.msk.bf16.gmra.mxu1 %vm975_vm0, %v8226_v52  ;;  %v1704_v59 = vpop.f32.mrf.mxu3 }
 0x25f   : > { %v1557_v45 = vpop.f32.mrf.mxu2 }
 0x260   : > { %v1335_v10 = vpop.f32.mrf.mxu1  ;;  %v8234_v13 = vadd.f32 %v1557_v45, %v1191_v6  ;;  %v1194_v5 = vpop.f32.mrf.mxu0 }
 0x261   : > { %v8232_v38 = vadd.f32 %v1701_v0, %v1335_v10  ;;  %v8244_v0 = vld [vmem:[%s7606_s27 + $0x30] sm:$0xff] }
 0x262   : > { %10576 = vst [vmem:[#allocation58_spill] sm:$0xff] %v8234_v13 }
 0x263   : > { %10575 = vst [vmem:[#allocation57_spill] sm:$0xff] %v8232_v38  ;;  %6030 = vmatmul.msk.bf16.gmra.mxu0 %vm975_vm0, %v7260_v35  ;;  %v1706_v50 = vpop.f32.mrf.mxu3 }
 0x264   : > { %6149 = vmatmul.msk.bf16.gmra.mxu2 %vm975_vm0, %v7260_v35  ;;  %10579 = vst [vmem:[#allocation61_spill] sm:$0xff] %v8244_v0 }
 0x267   : > { %v1560_v21 = vpop.f32.mrf.mxu2 }
 0x268   : > { %v1338_v60 = vpop.f32.mrf.mxu1  ;;  %v8241_v42 = vadd.f32 %v1560_v21, %v1194_v5  ;;  %v1196_v51 = vpop.f32.mrf.mxu0  ;;  %6177 = vmatmul.msk.bf16.gmra.mxu3 %vm975_vm0, %v7260_v35 }
 0x269   : > { %v8239_v28 = vadd.f32 %v1704_v59, %v1338_v60  ;;  %v7262_v60 = vld [vmem:[%s7606_s27 + $0x48] sm:$0xff] }
 0x26a   : > { %10578 = vst [vmem:[#allocation60_spill] sm:$0xff] %v8241_v42 }
 0x26b   : > { %10577 = vst [vmem:[#allocation59_spill] sm:$0xff] %v8239_v28  ;;  %6056 = vmatmul.msk.bf16.gmra.mxu1 %vm975_vm0, %v8244_v0  ;;  %v1709_v6 = vpop.f32.mrf.mxu3 }
 0x26f   : > { %v1562_v38 = vpop.f32.mrf.mxu2 }
 0x270   : > { %v1340_v10 = vpop.f32.mrf.mxu1  ;;  %v8251_v13 = vadd.f32 %v1562_v38, %v1196_v51  ;;  %v1199_v59 = vpop.f32.mrf.mxu0 }
 0x271   : > { %v8249_v45 = vadd.f32 %v1706_v50, %v1340_v10 }
 0x272   : > { %10581 = vst [vmem:[#allocation63_spill] sm:$0xff] %v8251_v13 }
 0x273   : > { %10580 = vst [vmem:[#allocation62_spill] sm:$0xff] %v8249_v45  ;;  %6031 = vmatmul.msk.bf16.gmra.mxu0 %vm975_vm0, %v7262_v60  ;;  %v1711_v5 = vpop.f32.mrf.mxu3 }
 0x274   : > { %6150 = vmatmul.msk.bf16.gmra.mxu2 %vm975_vm0, %v7262_v60 }
 0x277   : > { %v1565_v42 = vpop.f32.mrf.mxu2 }
 0x278   : > { %v1343_v21 = vpop.f32.mrf.mxu1  ;;  %v8258_v0 = vadd.f32 %v1565_v42, %v1199_v59  ;;  %v1201_v26 = vpop.f32.mrf.mxu0  ;;  %6178 = vmatmul.msk.bf16.gmra.mxu3 %vm975_vm0, %v7262_v60 }
 0x279   : > { %v8256_v28 = vadd.f32 %v1709_v6, %v1343_v21  ;;  %v7263_v6 = vld [vmem:[%s7606_s27 + $0x50] sm:$0xff] }
 0x27b   : > { %10582 = vst [vmem:[#allocation64_spill] sm:$0xff] %v8256_v28  ;;  %6057 = vmatmul.msk.bf16.gmra.mxu1 %vm975_vm0, %v7259_v36  ;;  %v1714_v51 = vpop.f32.mrf.mxu3 }
 0x27f   : > { %v1567_v10 = vpop.f32.mrf.mxu2 }
 0x280   : > { %v1345_v38 = vpop.f32.mrf.mxu1  ;;  %v8264_v45 = vadd.f32 %v1567_v10, %v1201_v26  ;;  %v1814_v13 = vpop.f32.mrf.mxu0 }
 0x281   : > { %v8262_v50 = vadd.f32 %v1711_v5, %v1345_v38  ;;  %v2103_v52 = vadd.f32 %v1814_v13, %v7751_v2 }
 0x283   : > { %10583 = vst [vmem:[#allocation65_spill] sm:$0xff] %v8262_v50  ;;  %6032 = vmatmul.msk.bf16.gmra.mxu0 %vm975_vm0, %v7263_v6  ;;  %v1716_v42 = vpop.f32.mrf.mxu3 }
 0x284   : > { %6151 = vmatmul.msk.bf16.gmra.mxu2 %vm975_vm0, %v7263_v6 }
 0x287   : > { %v8272_v21 = vpop.f32.mrf.mxu2 }
 0x288   : > { %v1348_v36 = vpop.f32.mrf.mxu1  ;;  %10585 = vst [vmem:[#allocation67_spill] sm:$0xff] %v8272_v21  ;;  %v1816_v5 = vpop.f32.mrf.mxu0  ;;  %6179 = vmatmul.msk.bf16.gmra.mxu3 %vm975_vm0, %v7263_v6 }
 0x289   : > { %v8270_v59 = vadd.f32 %v1714_v51, %v1348_v36  ;;  %v2105_v26 = vadd.f32 %v1816_v5, %v7758_v8  ;;  %v7264_v51 = vld [vmem:[%s7606_s27 + $0x58] sm:$0xff] }
 0x28b   : > { %10584 = vst [vmem:[#allocation66_spill] sm:$0xff] %v8270_v59  ;;  %6058 = vmatmul.msk.bf16.gmra.mxu1 %vm975_vm0, %v7260_v35  ;;  %v1719_v2 = vpop.f32.mrf.mxu3 }
 0x28f   : > { %v8279_v10 = vpop.f32.mrf.mxu2 }
 0x290   : > { %v1350_v13 = vpop.f32.mrf.mxu1  ;;  %10587 = vst [vmem:[#allocation69_spill] sm:$0xff] %v8279_v10  ;;  %v1819_v50 = vpop.f32.mrf.mxu0 }
 0x291   : > { %v8277_v38 = vadd.f32 %v1716_v42, %v1350_v13  ;;  %v2107_v28 = vadd.f32 %v1819_v50, %v7770_v17 }
 0x293   : > { %10586 = vst [vmem:[#allocation68_spill] sm:$0xff] %v8277_v38  ;;  %6033 = vmatmul.msk.bf16.gmra.mxu0 %vm975_vm0, %v7264_v51  ;;  %v1721_v36 = vpop.f32.mrf.mxu3 }
 0x294   : > { %6152 = vmatmul.msk.bf16.gmra.mxu2 %vm975_vm0, %v7264_v51 }
 0x297   : > { %v2305_v8 = vpop.f32.mrf.mxu2 }
 0x298   : > { %v1353_v35 = vpop.f32.mrf.mxu1  ;;  %v8287_v5 = vadd.f32 %v2305_v8, %v2103_v52  ;;  %v1821_v21 = vpop.f32.mrf.mxu0  ;;  %6180 = vmatmul.msk.bf16.gmra.mxu3 %vm975_vm0, %v7264_v51  ;;  %v6242_v52 = vld [vmem:[%s10503_s1 + $0x1b0] sm:$0xf] }
 0x299   : > { %v8285_v59 = vadd.f32 %v1719_v2, %v1353_v35  ;;  %v2109_v42 = vadd.f32 %v1821_v21, %v7783_v27  ;;  %v7081_v27 = vld [vmem:[%s10503_s1 + $0x1b4] sm:$0xf]  ;;  %v7265_v35 = vld [vmem:[%s7606_s27 + $0x60] sm:$0xff] }
 0x29b   : > { %10588 = vst [vmem:[#allocation70_spill] sm:$0xff] %v8285_v59  ;;  %6059 = vmatmul.msk.bf16.gmra.mxu1 %vm975_vm0, %v7262_v60  ;;  %v2454_v17 = vpop.f32.mrf.mxu3  ;;  %v7082_v60 = vld [vmem:[%s10503_s1 + $0x1b4] sm:$0xf0] }
 0x29f   : > { %v2307_v38 = vpop.f32.mrf.mxu2 }
 0x2a0   : > { %v1355_v50 = vpop.f32.mrf.mxu1  ;;  %v8294_v10 = vadd.f32 %v2307_v38, %v2105_v26  ;;  %v1824_v2 = vpop.f32.mrf.mxu0  ;;  %v6244_v26 = vld [vmem:[%s10503_s1 + $0x1b8] sm:$0xf0] }
 0x2a1   : > { %v8292_v13 = vadd.f32 %v1721_v36, %v1355_v50  ;;  %v2111_v21 = vadd.f32 %v1824_v2, %v7789_v33  ;;  %v6243_v36 = vor.u32 %v7082_v60, %v6242_v52  ;;  %v6247_v38 = vor.u32 %v7081_v27, %v6244_v26 }
 0x2a2   : > { %10590 = vst [vmem:[#allocation72_spill] sm:$0xff] %v8294_v10 }
 0x2a3   : > { %10589 = vst [vmem:[#allocation71_spill] sm:$0xff] %v8292_v13  ;;  %6034 = vmatmul.msk.bf16.gmra.mxu0 %vm975_vm0, %v7265_v35  ;;  %v2456_v8 = vpop.f32.mrf.mxu3  ;;  %2940 = vmatpush.bf16.msrb.mxu1 %v6247_v38 }
 0x2a4   : > { %6153 = vmatmul.msk.bf16.gmra.mxu2 %vm975_vm0, %v7265_v35  ;;  %2791 = vmatpush.bf16.msra.mxu0 %v6243_v36 }
 0x2a7   : > { %v2310_v59 = vpop.f32.mrf.mxu2 }
 0x2a8   : > { %v1963_v50 = vpop.f32.mrf.mxu1  ;;  %v8313_v33 = vadd.f32 %v2310_v59, %v2107_v28  ;;  %v1826_v52 = vpop.f32.mrf.mxu0  ;;  %6181 = vmatmul.msk.bf16.gmra.mxu3 %vm975_vm0, %v7265_v35 }
 0x2a9   : > { %v2104_v13 = vadd.f32 %v1963_v50, %v7768_v15  ;;  %v2113_v60 = vadd.f32 %v1826_v52, %v7796_v40 }
 0x2ab   : > { %v8315_v2 = vadd.f32 %v2454_v17, %v2104_v13  ;;  %6060 = vmatmul.msk.bf16.gmra.mxu1 %vm975_vm0, %v7263_v6  ;;  %v2459_v27 = vpop.f32.mrf.mxu3  ;;  %v7266_v17 = vld [vmem:[%s7606_s27 + $0x68] sm:$0xff] }
 0x2af   : > { %v2312_v38 = vpop.f32.mrf.mxu2 }
 0x2b0   : > { %v1965_v26 = vpop.f32.mrf.mxu1  ;;  %v8321_v10 = vadd.f32 %v2312_v38, %v2109_v42  ;;  %v1829_v28 = vpop.f32.mrf.mxu0 }
 0x2b1   : > { %v2106_v36 = vadd.f32 %v1965_v26, %v7780_v24  ;;  %v2115_v59 = vadd.f32 %v1829_v28, %v7802_v47 }
 0x2b3   : > { %v8323_v15 = vadd.f32 %v2456_v8, %v2106_v36  ;;  %6035 = vmatmul.msk.bf16.gmra.mxu0 %vm975_vm0, %v7266_v17  ;;  %v2461_v40 = vpop.f32.mrf.mxu3 }
 0x2b4   : > { %6154 = vmatmul.msk.bf16.gmra.mxu2 %vm975_vm0, %v7266_v17 }
 0x2b7   : > { %v2315_v50 = vpop.f32.mrf.mxu2 }
 0x2b8   : > { %v1968_v6 = vpop.f32.mrf.mxu1  ;;  %v8330_v24 = vadd.f32 %v2315_v50, %v2111_v21  ;;  %v1831_v8 = vpop.f32.mrf.mxu0  ;;  %6182 = vmatmul.msk.bf16.gmra.mxu3 %vm975_vm0, %v7266_v17 }
 0x2b9   : > { %v2108_v13 = vadd.f32 %v1968_v6, %v7787_v31  ;;  %v2117_v47 = vadd.f32 %v1831_v8, %v7809_v57  ;;  %v7267_v6 = vld [vmem:[%s7606_s27 + $0x70] sm:$0xff] }
 0x2bb   : > { %v8332_v42 = vadd.f32 %v2459_v27, %v2108_v13  ;;  %6061 = vmatmul.msk.bf16.gmra.mxu1 %vm975_vm0, %v7264_v51  ;;  %v2464_v52 = vpop.f32.mrf.mxu3 }
 0x2bf   : > { %v2317_v38 = vpop.f32.mrf.mxu2 }
 0x2c0   : > { %v1970_v26 = vpop.f32.mrf.mxu1  ;;  %v8338_v28 = vadd.f32 %v2317_v38, %v2113_v60  ;;  %v1834_v21 = vpop.f32.mrf.mxu0 }
 0x2c1   : > { %v2110_v36 = vadd.f32 %v1970_v26, %v7793_v37  ;;  %v2119_v27 = vadd.f32 %v1834_v21, %v7815_v3 }
 0x2c3   : > { %v8340_v31 = vadd.f32 %v2461_v40, %v2110_v36  ;;  %6036 = vmatmul.msk.bf16.gmra.mxu0 %vm975_vm0, %v7267_v6  ;;  %v2466_v57 = vpop.f32.mrf.mxu3 }
 0x2c4   : > { %6155 = vmatmul.msk.bf16.gmra.mxu2 %vm975_vm0, %v7267_v6 }
 0x2c7   : > { %v2320_v50 = vpop.f32.mrf.mxu2 }
 0x2c8   : > { %v1973_v51 = vpop.f32.mrf.mxu1  ;;  %v8347_v37 = vadd.f32 %v2320_v50, %v2115_v59  ;;  %v1836_v40 = vpop.f32.mrf.mxu0  ;;  %6183 = vmatmul.msk.bf16.gmra.mxu3 %vm975_vm0, %v7267_v6 }
 0x2c9   : > { %v2112_v13 = vadd.f32 %v1973_v51, %v7800_v44  ;;  %v2121_v3 = vadd.f32 %v1836_v40, %v7822_v12  ;;  %v7268_v51 = vld [vmem:[%s7606_s27 + $0x78] sm:$0xff] }
 0x2cb   : > { %v8349_v60 = vadd.f32 %v2464_v52, %v2112_v13  ;;  %6062 = vmatmul.msk.bf16.gmra.mxu1 %vm975_vm0, %v7265_v35  ;;  %v2469_v8 = vpop.f32.mrf.mxu3 }
 0x2cf   : > { %v2322_v38 = vpop.f32.mrf.mxu2 }
 0x2d0   : > { %v1975_v26 = vpop.f32.mrf.mxu1  ;;  %v8355_v21 = vadd.f32 %v2322_v38, %v2117_v47  ;;  %v1839_v59 = vpop.f32.mrf.mxu0 }
 0x2d1   : > { %v2114_v36 = vadd.f32 %v1975_v26, %v7806_v54  ;;  %v2123_v52 = vadd.f32 %v1839_v59, %v7828_v20 }
 0x2d3   : > { %v8357_v44 = vadd.f32 %v2466_v57, %v2114_v36  ;;  %6037 = vmatmul.msk.bf16.gmra.mxu0 %vm975_vm0, %v7268_v51  ;;  %v2471_v12 = vpop.f32.mrf.mxu3 }
 0x2d4   : > { %6156 = vmatmul.msk.bf16.gmra.mxu2 %vm975_vm0, %v7268_v51 }
 0x2d7   : > { %v2325_v50 = vpop.f32.mrf.mxu2 }
 0x2d8   : > { %v1978_v35 = vpop.f32.mrf.mxu1  ;;  %v8364_v54 = vadd.f32 %v2325_v50, %v2119_v27  ;;  %v1841_v57 = vpop.f32.mrf.mxu0  ;;  %6184 = vmatmul.msk.bf16.gmra.mxu3 %vm975_vm0, %v7268_v51 }
 0x2d9   : > { %v2116_v13 = vadd.f32 %v1978_v35, %v7813_v63  ;;  %v2125_v20 = vadd.f32 %v1841_v57, %v7841_v34  ;;  %v7269_v35 = vld [vmem:[%s7606_s27 + $0x80] sm:$0xff] }
 0x2db   : > { %v8366_v47 = vadd.f32 %v2469_v8, %v2116_v13  ;;  %6063 = vmatmul.msk.bf16.gmra.mxu1 %vm975_vm0, %v7266_v17  ;;  %v2474_v40 = vpop.f32.mrf.mxu3 }
 0x2df   : > { %v2327_v38 = vpop.f32.mrf.mxu2 }
 0x2e0   : > { %v1980_v26 = vpop.f32.mrf.mxu1  ;;  %v8372_v59 = vadd.f32 %v2327_v38, %v2121_v3  ;;  %v1844_v27 = vpop.f32.mrf.mxu0 }
 0x2e1   : > { %v2118_v36 = vadd.f32 %v1980_v26, %v7819_v9  ;;  %v2127_v8 = vadd.f32 %v1844_v27, %v7853_v48  ;;  %v6234_v48 = vld [vmem:[%s10503_s1 + $0x1a0] sm:$0xf] }
 0x2e3   : > { %v8374_v63 = vadd.f32 %v2471_v12, %v2118_v36  ;;  %6038 = vmatmul.msk.bf16.gmra.mxu0 %vm975_vm0, %v7269_v35  ;;  %v2476_v34 = vpop.f32.mrf.mxu3 }
 0x2e4   : > { %6157 = vmatmul.msk.bf16.gmra.mxu2 %vm975_vm0, %v7269_v35 }
 0x2e7   : > { %v2330_v50 = vpop.f32.mrf.mxu2 }
 0x2e8   : > { %v1983_v17 = vpop.f32.mrf.mxu1  ;;  %v8381_v57 = vadd.f32 %v2330_v50, %v2123_v52  ;;  %v1846_v3 = vpop.f32.mrf.mxu0  ;;  %6185 = vmatmul.msk.bf16.gmra.mxu3 %vm975_vm0, %v7269_v35  ;;  %v7079_v52 = vld [vmem:[%s10503_s1 + $0x1a4] sm:$0xf] }
 0x2e9   : > { %v2120_v13 = vadd.f32 %v1983_v17, %v7826_v18  ;;  %v2129_v12 = vadd.f32 %v1846_v3, %v7860_v62  ;;  %v7080_v18 = vld [vmem:[%s10503_s1 + $0x1a4] sm:$0xf0]  ;;  %v6236_v62 = vld [vmem:[%s10503_s1 + $0x1a8] sm:$0xf0] }
 0x2eb   : > { %v8383_v9 = vadd.f32 %v2474_v40, %v2120_v13  ;;  %6064 = vmatmul.msk.bf16.gmra.mxu1 %vm975_vm0, %v7267_v6  ;;  %v6235_v40 = vor.u32 %v7080_v18, %v6234_v48  ;;  %v6239_v6 = vor.u32 %v7079_v52, %v6236_v62  ;;  %v2479_v26 = vpop.f32.mrf.mxu3  ;;  %v7270_v48 = vld [vmem:[%s7606_s27 + $0x88] sm:$0xff] }
 0x2ed   : > { %2792 = vmatpush.bf16.msra.mxu0 %v6235_v40  ;;  %2941 = vmatpush.bf16.msrb.mxu1 %v6239_v6 }
 0x2ef   : > { %v2332_v27 = vpop.f32.mrf.mxu2 }
 0x2f0   : > { %v1985_v36 = vpop.f32.mrf.mxu1  ;;  %v8401_v17 = vadd.f32 %v2332_v27, %v2125_v20  ;;  %v1849_v50 = vpop.f32.mrf.mxu0 }
 0x2f1   : > { %v2122_v38 = vadd.f32 %v1985_v36, %v7838_v29  ;;  %v2131_v3 = vadd.f32 %v1849_v50, %v7866_v11 }
 0x2f3   : > { %v8403_v13 = vadd.f32 %v2476_v34, %v2122_v38  ;;  %6039 = vmatmul.msk.bf16.gmra.mxu0 %vm975_vm0, %v7270_v48  ;;  %v2481_v18 = vpop.f32.mrf.mxu3 }
 0x2f4   : > { %6158 = vmatmul.msk.bf16.gmra.mxu2 %vm975_vm0, %v7270_v48 }
 0x2f7   : > { %v2335_v62 = vpop.f32.mrf.mxu2 }
 0x2f8   : > { %v1988_v52 = vpop.f32.mrf.mxu1  ;;  %v8410_v29 = vadd.f32 %v2335_v62, %v2127_v8  ;;  %v1851_v34 = vpop.f32.mrf.mxu0  ;;  %6186 = vmatmul.msk.bf16.gmra.mxu3 %vm975_vm0, %v7270_v48 }
 0x2f9   : > { %v2124_v40 = vadd.f32 %v1988_v52, %v7851_v43  ;;  %v2133_v11 = vadd.f32 %v1851_v34, %v7873_v23  ;;  %v7271_v52 = vld [vmem:[%s7606_s27 + $0x90] sm:$0xff] }
 0x2fb   : > { %v8412_v20 = vadd.f32 %v2479_v26, %v2124_v40  ;;  %6065 = vmatmul.msk.bf16.gmra.mxu1 %vm975_vm0, %v7268_v51  ;;  %v2484_v6 = vpop.f32.mrf.mxu3 }
 0x2ff   : > { %v2337_v27 = vpop.f32.mrf.mxu2 }
 0x300   : > { %v1990_v36 = vpop.f32.mrf.mxu1  ;;  %v8418_v50 = vadd.f32 %v2337_v27, %v2129_v12  ;;  %v1854_v8 = vpop.f32.mrf.mxu0 }
 0x301   : > { %v2126_v38 = vadd.f32 %v1990_v36, %v7857_v56  ;;  %v2135_v26 = vadd.f32 %v1854_v8, %v7879_v32 }
 0x303   : > { %v8420_v43 = vadd.f32 %v2481_v18, %v2126_v38  ;;  %6040 = vmatmul.msk.bf16.gmra.mxu0 %vm975_vm0, %v7271_v52  ;;  %v2486_v23 = vpop.f32.mrf.mxu3 }
 0x304   : > { %6159 = vmatmul.msk.bf16.gmra.mxu2 %vm975_vm0, %v7271_v52 }
 0x307   : > { %v2340_v62 = vpop.f32.mrf.mxu2 }
 0x308   : > { %v1993_v51 = vpop.f32.mrf.mxu1  ;;  %v8427_v56 = vadd.f32 %v2340_v62, %v2131_v3  ;;  %v1856_v18 = vpop.f32.mrf.mxu0  ;;  %6187 = vmatmul.msk.bf16.gmra.mxu3 %vm975_vm0, %v7271_v52 }
 0x309   : > { %v2128_v40 = vadd.f32 %v1993_v51, %v7864_v7  ;;  %v2137_v32 = vadd.f32 %v1856_v18, %v7886_v49  ;;  %v7272_v51 = vld [vmem:[%s7606_s27 + $0x98] sm:$0xff] }
 0x30b   : > { %v8429_v12 = vadd.f32 %v2484_v6, %v2128_v40  ;;  %6066 = vmatmul.msk.bf16.gmra.mxu1 %vm975_vm0, %v7269_v35  ;;  %v2489_v34 = vpop.f32.mrf.mxu3 }
 0x30f   : > { %v2342_v27 = vpop.f32.mrf.mxu2 }
 0x310   : > { %v1995_v36 = vpop.f32.mrf.mxu1  ;;  %v8435_v8 = vadd.f32 %v2342_v27, %v2133_v11  ;;  %v1859_v3 = vpop.f32.mrf.mxu0 }
 0x311   : > { %v2130_v38 = vadd.f32 %v1995_v36, %v7870_v19  ;;  %v2139_v6 = vadd.f32 %v1859_v3, %v7892_v61 }
 0x313   : > { %v8437_v7 = vadd.f32 %v2486_v23, %v2130_v38  ;;  %6041 = vmatmul.msk.bf16.gmra.mxu0 %vm975_vm0, %v7272_v51  ;;  %v2491_v49 = vpop.f32.mrf.mxu3 }
 0x314   : > { %6160 = vmatmul.msk.bf16.gmra.mxu2 %vm975_vm0, %v7272_v51 }
 0x317   : > { %v2345_v62 = vpop.f32.mrf.mxu2 }
 0x318   : > { %v1998_v35 = vpop.f32.mrf.mxu1  ;;  %v8444_v19 = vadd.f32 %v2345_v62, %v2135_v26  ;;  %v1861_v23 = vpop.f32.mrf.mxu0  ;;  %6188 = vmatmul.msk.bf16.gmra.mxu3 %vm975_vm0, %v7272_v51 }
 0x319   : > { %v2132_v40 = vadd.f32 %v1998_v35, %v7877_v30  ;;  %v2141_v61 = vadd.f32 %v1861_v23, %v7899_v25  ;;  %v7273_v35 = vld [vmem:[%s7606_s27 + $0xa0] sm:$0xff] }
 0x31b   : > { %v8446_v11 = vadd.f32 %v2489_v34, %v2132_v40  ;;  %6067 = vmatmul.msk.bf16.gmra.mxu1 %vm975_vm0, %v7270_v48  ;;  %v2494_v18 = vpop.f32.mrf.mxu3 }
 0x31f   : > { %v2347_v27 = vpop.f32.mrf.mxu2 }
 0x320   : > { %v2000_v36 = vpop.f32.mrf.mxu1  ;;  %v8452_v3 = vadd.f32 %v2347_v27, %v2137_v32  ;;  %v1864_v26 = vpop.f32.mrf.mxu0 }
 0x321   : > { %v2134_v38 = vadd.f32 %v2000_v36, %v7883_v41  ;;  %v2143_v34 = vadd.f32 %v1864_v26, %v7911_v53 }
 0x322   : > { %10591 = vst [vmem:[#allocation73_spill] sm:$0xff] %v8452_v3  ;;  %v10598_v3 = vld [vmem:[#allocation6_spill] sm:$0xff] }
 0x323   : > { %v8454_v30 = vadd.f32 %v2491_v49, %v2134_v38  ;;  %6042 = vmatmul.msk.bf16.gmra.mxu0 %vm975_vm0, %v7273_v35  ;;  %v2496_v25 = vpop.f32.mrf.mxu3 }
 0x324   : > { %6161 = vmatmul.msk.bf16.gmra.mxu2 %vm975_vm0, %v7273_v35 }
 0x327   : > { %v2350_v62 = vpop.f32.mrf.mxu2 }
 0x328   : > { %v2003_v48 = vpop.f32.mrf.mxu1  ;;  %v8461_v41 = vadd.f32 %v2350_v62, %v2139_v6  ;;  %v1866_v49 = vpop.f32.mrf.mxu0  ;;  %6189 = vmatmul.msk.bf16.gmra.mxu3 %vm975_vm0, %v7273_v35  ;;  %v10595_v62 = vld [vmem:[#allocation5_spill] sm:$0xff] }
 0x329   : > { %v2136_v40 = vadd.f32 %v2003_v48, %v7890_v1  ;;  %v2145_v53 = vadd.f32 %v1866_v49, %v7924_v22  ;;  %v7274_v48 = vld [vmem:[%s7606_s27 + $0xa8] sm:$0xff] }
 0x32a   : > { %10592 = vst [vmem:[#allocation74_spill] sm:$0xff] %v8461_v41  ;;  %v10597_v41 = vld [vmem:[#allocation9_spill] sm:$0xff] }
 0x32b   : > { %v8463_v32 = vadd.f32 %v2494_v18, %v2136_v40  ;;  %6068 = vmatmul.msk.bf16.gmra.mxu1 %vm975_vm0, %v7271_v52  ;;  %v2499_v23 = vpop.f32.mrf.mxu3  ;;  %v6226_v52 = vld [vmem:[%s10503_s1 + $0x190] sm:$0xf]  ;;  %v6228_v40 = vld [vmem:[%s10503_s1 + $0x198] sm:$0xf0] }
 0x32f   : > { %v2352_v27 = vpop.f32.mrf.mxu2 }
 0x330   : > { %v2005_v36 = vpop.f32.mrf.mxu1  ;;  %v8469_v26 = vadd.f32 %v2352_v27, %v2141_v61  ;;  %v1869_v6 = vpop.f32.mrf.mxu0  ;;  %v7077_v61 = vld [vmem:[%s10503_s1 + $0x194] sm:$0xf] }
 0x331   : > { %v2138_v38 = vadd.f32 %v2005_v36, %v7896_v14  ;;  %v2147_v18 = vadd.f32 %v1869_v6, %v7930_v58  ;;  %v7078_v14 = vld [vmem:[%s10503_s1 + $0x194] sm:$0xf0]  ;;  %v6231_v36 = vor.u32 %v7077_v61, %v6228_v40 }
 0x332   : > { %10593 = vst [vmem:[#allocation75_spill] sm:$0xff] %v8469_v26  ;;  %v6227_v58 = vor.u32 %v7078_v14, %v6226_v52 }
 0x333   : > { %v8471_v1 = vadd.f32 %v2496_v25, %v2138_v38  ;;  %6043 = vmatmul.msk.bf16.gmra.mxu0 %vm975_vm0, %v7274_v48  ;;  %v2501_v22 = vpop.f32.mrf.mxu3  ;;  %2942 = vmatpush.bf16.msrb.mxu1 %v6231_v36 }
 0x334   : > { %6162 = vmatmul.msk.bf16.gmra.mxu2 %vm975_vm0, %v7274_v48  ;;  %2793 = vmatpush.bf16.msra.mxu0 %v6227_v58 }
 0x335   : > { %10594 = vst [vmem:[#allocation76_spill] sm:$0xff] %v8471_v1 }
 0x337   : > { %v2355_v38 = vpop.f32.mrf.mxu2 }
 0x338   : > { %v2008_v25 = vpop.f32.mrf.mxu1  ;;  %v8490_v27 = vadd.f32 %v2355_v38, %v2143_v34  ;;  %v1871_v26 = vpop.f32.mrf.mxu0  ;;  %6190 = vmatmul.msk.bf16.gmra.mxu3 %vm975_vm0, %v7274_v48 }
 0x339   : > { %v2140_v49 = vadd.f32 %v2008_v25, %v10595_v62  ;;  %v2149_v1 = vadd.f32 %v1871_v26, %v10597_v41  ;;  %v10602_v26 = vld [vmem:[#allocation7_spill] sm:$0xff] }
 0x33a   : > { %10596 = vst [vmem:[#allocation5_spill] sm:$0xff] %v8490_v27 }
 0x33b   : > { %v8492_v6 = vadd.f32 %v2499_v23, %v2140_v49  ;;  %6069 = vmatmul.msk.bf16.gmra.mxu1 %vm975_vm0, %v7272_v51  ;;  %v2504_v52 = vpop.f32.mrf.mxu3  ;;  %v10601_v23 = vld [vmem:[#allocation11_spill] sm:$0xff]  ;;  %v7275_v49 = vld [vmem:[%s7606_s27 + $0xb0] sm:$0xff] }
 0x33f   : > { %v2357_v61 = vpop.f32.mrf.mxu2 }
 0x340   : > { %v2010_v14 = vpop.f32.mrf.mxu1  ;;  %v8498_v40 = vadd.f32 %v2357_v61, %v2145_v53  ;;  %v1874_v34 = vpop.f32.mrf.mxu0 }
 0x341   : > { %v2142_v25 = vadd.f32 %v2010_v14, %v10598_v3  ;;  %v2151_v62 = vadd.f32 %v1874_v34, %v10601_v23  ;;  %v10605_v14 = vld [vmem:[#allocation13_spill] sm:$0xff]  ;;  %v10606_v23 = vld [vmem:[#allocation8_spill] sm:$0xff] }
 0x342   : > { %10599 = vst [vmem:[#allocation9_spill] sm:$0xff] %v8498_v40 }
 0x343   : > { %v8500_v58 = vadd.f32 %v2501_v22, %v2142_v25  ;;  %6044 = vmatmul.msk.bf16.gmra.mxu0 %vm975_vm0, %v7275_v49  ;;  %v2506_v51 = vpop.f32.mrf.mxu3 }
 0x344   : > { %6163 = vmatmul.msk.bf16.gmra.mxu2 %vm975_vm0, %v7275_v49 }
 0x345   : > { %10600 = vst [vmem:[#allocation6_spill] sm:$0xff] %v8500_v58 }
 0x347   : > { %v2360_v38 = vpop.f32.mrf.mxu2 }
 0x348   : > { %v2013_v41 = vpop.f32.mrf.mxu1  ;;  %v8507_v3 = vadd.f32 %v2360_v38, %v2147_v18  ;;  %v1876_v22 = vpop.f32.mrf.mxu0  ;;  %6191 = vmatmul.msk.bf16.gmra.mxu3 %vm975_vm0, %v7275_v49 }
 0x349   : > { %v2144_v36 = vadd.f32 %v2013_v41, %v10602_v26  ;;  %v2153_v25 = vadd.f32 %v1876_v22, %v10605_v14  ;;  %v10609_v26 = vld [vmem:[#allocation15_spill] sm:$0xff]  ;;  %v10610_v22 = vld [vmem:[#allocation10_spill] sm:$0xff] }
 0x34a   : > { %10603 = vst [vmem:[#allocation11_spill] sm:$0xff] %v8507_v3 }
 0x34b   : > { %v8509_v53 = vadd.f32 %v2504_v52, %v2144_v36  ;;  %6070 = vmatmul.msk.bf16.gmra.mxu1 %vm975_vm0, %v7273_v35  ;;  %v2509_v61 = vpop.f32.mrf.mxu3  ;;  %v7276_v36 = vld [vmem:[%s7606_s27 + $0xb8] sm:$0xff] }
 0x34d   : > { %10604 = vst [vmem:[#allocation7_spill] sm:$0xff] %v8509_v53 }
 0x34f   : > { %v2362_v27 = vpop.f32.mrf.mxu2 }
 0x350   : > { %v2015_v34 = vpop.f32.mrf.mxu1  ;;  %v8515_v58 = vadd.f32 %v2362_v27, %v2149_v1  ;;  %v1879_v18 = vpop.f32.mrf.mxu0  ;;  %v10613_v27 = vld [vmem:[#allocation17_spill] sm:$0xff] }
 0x351   : > { %v2146_v40 = vadd.f32 %v2015_v34, %v10606_v23  ;;  %v2155_v52 = vadd.f32 %v1879_v18, %v10609_v26  ;;  %v10614_v18 = vld [vmem:[#allocation12_spill] sm:$0xff] }
 0x352   : > { %10607 = vst [vmem:[#allocation13_spill] sm:$0xff] %v8515_v58 }
 0x353   : > { %v8517_v41 = vadd.f32 %v2506_v51, %v2146_v40  ;;  %6045 = vmatmul.msk.bf16.gmra.mxu0 %vm975_vm0, %v7276_v36  ;;  %v2511_v35 = vpop.f32.mrf.mxu3 }
 0x354   : > { %6164 = vmatmul.msk.bf16.gmra.mxu2 %vm975_vm0, %v7276_v36 }
 0x355   : > { %10608 = vst [vmem:[#allocation8_spill] sm:$0xff] %v8517_v41 }
 0x357   : > { %v2365_v3 = vpop.f32.mrf.mxu2 }
 0x358   : > { %v2018_v38 = vpop.f32.mrf.mxu1  ;;  %v8524_v53 = vadd.f32 %v2365_v3, %v2151_v62  ;;  %v1881_v1 = vpop.f32.mrf.mxu0  ;;  %6192 = vmatmul.msk.bf16.gmra.mxu3 %vm975_vm0, %v7276_v36  ;;  %v6394_v3 = vld [vmem:[%s10505_s3 + $0xf0] sm:$0xf] }
 0x359   : > { %v2148_v14 = vadd.f32 %v2018_v38, %v10610_v22  ;;  %v2157_v40 = vadd.f32 %v1881_v1, %v10613_v27  ;;  %v10617_v22 = vld [vmem:[#allocation19_spill] sm:$0xff] }
 0x35a   : > { %10611 = vst [vmem:[#allocation15_spill] sm:$0xff] %v8524_v53  ;;  %v10621_v53 = vld [vmem:[#allocation16_spill] sm:$0xff] }
 0x35b   : > { %v8526_v34 = vadd.f32 %v2509_v61, %v2148_v14  ;;  %6071 = vmatmul.msk.bf16.gmra.mxu1 %vm975_vm0, %v7274_v48  ;;  %v2514_v51 = vpop.f32.mrf.mxu3  ;;  %v7118_v48 = vld [vmem:[%s10505_s3 + $0xf4] sm:$0xf0]  ;;  %v7117_v61 = vld [vmem:[%s10505_s3 + $0xf4] sm:$0xf] }
 0x35c   : > { %v6395_v1 = vor.u32 %v7118_v48, %v6394_v3 }
 0x35d   : > { %10612 = vst [vmem:[#allocation10_spill] sm:$0xff] %v8526_v34 }
 0x35e   : > { %3712 = vmatpush.bf16.msra.mxu2 %v6395_v1 }
 0x35f   : > { %v2367_v58 = vpop.f32.mrf.mxu2 }
 0x360   : > { %v2020_v23 = vpop.f32.mrf.mxu1  ;;  %v8532_v41 = vadd.f32 %v2367_v58, %v2153_v25  ;;  %v1884_v62 = vpop.f32.mrf.mxu0  ;;  %v6396_v58 = vld [vmem:[%s10505_s3 + $0xf8] sm:$0xf0] }
 0x361   : > { %v2150_v26 = vadd.f32 %v2020_v23, %v10614_v18  ;;  %v2159_v14 = vadd.f32 %v1884_v62, %v10617_v22  ;;  %v6399_v25 = vor.u32 %v7117_v61, %v6396_v58  ;;  %v10618_v18 = vld [vmem:[#allocation14_spill] sm:$0xff]  ;;  %v10620_v61 = vld [vmem:[#allocation21_spill] sm:$0xff] }
 0x362   : > { %10615 = vst [vmem:[#allocation17_spill] sm:$0xff] %v8532_v41 }
 0x363   : > { %v8534_v38 = vadd.f32 %v2511_v35, %v2150_v26  ;;  %v7277_v35 = vld [vmem:[%s7606_s27 + $0xc0] sm:$0xff]  ;;  %v2516_v27 = vpop.f32.mrf.mxu3  ;;  %3771 = vmatpush.bf16.msra.mxu3 %v6399_v25 }
 0x364   : > { %6046 = vmatmul.msk.bf16.gmra.mxu0 %vm975_vm0, %v7277_v35  ;;  %6165 = vmatmul.msk.bf16.gmra.mxu2 %vm975_vm0, %v7277_v35 }
 0x365   : > { %10616 = vst [vmem:[#allocation12_spill] sm:$0xff] %v8534_v38 }
 0x367   : > { %v2370_v41 = vpop.f32.mrf.mxu2 }
 0x368   : > { %v2023_v23 = vpop.f32.mrf.mxu1  ;;  %v8553_v62 = vadd.f32 %v2370_v41, %v2155_v52  ;;  %v1886_v48 = vpop.f32.mrf.mxu0  ;;  %6193 = vmatmul.msk.bf16.gmra.mxu3 %vm975_vm0, %v7277_v35 }
 0x369   : > { %v2152_v26 = vadd.f32 %v2023_v23, %v10618_v18  ;;  %v2161_v22 = vadd.f32 %v1886_v48, %v10620_v61 }
 0x36a   : > { %10619 = vst [vmem:[#allocation19_spill] sm:$0xff] %v8553_v62 }
 0x36b   : > { %v8555_v3 = vadd.f32 %v2514_v51, %v2152_v26  ;;  %6072 = vmatmul.msk.bf16.gmra.mxu1 %vm975_vm0, %v7275_v49  ;;  %v2519_v1 = vpop.f32.mrf.mxu3  ;;  %v7278_v51 = vld [vmem:[%s7606_s27 + $0xc8] sm:$0xff]  ;;  %v10624_v26 = vld [vmem:[#allocation18_spill] sm:$0xff] }
 0x36f   : > { %v2372_v38 = vpop.f32.mrf.mxu2 }
 0x370   : > { %v2025_v58 = vpop.f32.mrf.mxu1  ;;  %v8561_v34 = vadd.f32 %v2372_v38, %v2157_v40  ;;  %v1889_v41 = vpop.f32.mrf.mxu0  ;;  %v10626_v38 = vld [vmem:[#allocation24_spill] sm:$0xff] }
 0x371   : > { %v2154_v25 = vadd.f32 %v2025_v58, %v10621_v53  ;;  %v2163_v52 = vadd.f32 %v1889_v41, %v8006_v55 }
 0x372   : > { %10622 = vst [vmem:[#allocation14_spill] sm:$0xff] %v8561_v34 }
 0x373   : > { %v8563_v23 = vadd.f32 %v2516_v27, %v2154_v25  ;;  %v2521_v49 = vpop.f32.mrf.mxu3  ;;  %v10627_v25 = vld [vmem:[#allocation20_spill] sm:$0xff] }
 0x374   : > { %6047 = vmatmul.msk.bf16.gmra.mxu0 %vm975_vm0, %v7278_v51  ;;  %6166 = vmatmul.msk.bf16.gmra.mxu2 %vm975_vm0, %v7278_v51 }
 0x375   : > { %10623 = vst [vmem:[#allocation21_spill] sm:$0xff] %v8563_v23 }
 0x377   : > { %v2375_v61 = vpop.f32.mrf.mxu2 }
 0x378   : > { %v2028_v18 = vpop.f32.mrf.mxu1  ;;  %v8570_v62 = vadd.f32 %v2375_v61, %v2159_v14  ;;  %v1891_v40 = vpop.f32.mrf.mxu0  ;;  %6194 = vmatmul.msk.bf16.gmra.mxu3 %vm975_vm0, %v7278_v51 }
 0x379   : > { %v2156_v48 = vadd.f32 %v2028_v18, %v10624_v26  ;;  %v2165_v27 = vadd.f32 %v1891_v40, %v10626_v38  ;;  %v7075_v26 = vld [vmem:[%s10503_s1 + $0x184] sm:$0xf] }
 0x37a   : > { %10625 = vst [vmem:[#allocation16_spill] sm:$0xff] %v8570_v62  ;;  %v10636_v62 = vld [vmem:[#allocation23_spill] sm:$0xff] }
 0x37b   : > { %v8572_v53 = vadd.f32 %v2519_v1, %v2156_v48  ;;  %6073 = vmatmul.msk.bf16.gmra.mxu1 %vm975_vm0, %v7276_v36  ;;  %v2524_v55 = vpop.f32.mrf.mxu3  ;;  %v6218_v1 = vld [vmem:[%s10503_s1 + $0x180] sm:$0xf]  ;;  %v7076_v36 = vld [vmem:[%s10503_s1 + $0x184] sm:$0xf0]  ;;  %v10630_v48 = vld [vmem:[#allocation26_spill] sm:$0xff] }
 0x37c   : > { %v6219_v40 = vor.u32 %v7076_v36, %v6218_v1 }
 0x37e   : > { %2794 = vmatpush.bf16.msra.mxu0 %v6219_v40 }
 0x37f   : > { %v2377_v34 = vpop.f32.mrf.mxu2 }
 0x380   : > { %v2030_v58 = vpop.f32.mrf.mxu1  ;;  %v8578_v23 = vadd.f32 %v2377_v34, %v2161_v22  ;;  %v1894_v14 = vpop.f32.mrf.mxu0  ;;  %v6220_v34 = vld [vmem:[%s10503_s1 + $0x188] sm:$0xf0] }
 0x381   : > { %v2158_v41 = vadd.f32 %v2030_v58, %v10627_v25  ;;  %v2167_v61 = vadd.f32 %v1894_v14, %v10630_v48  ;;  %v6223_v22 = vor.u32 %v7075_v26, %v6220_v34  ;;  %v10631_v25 = vld [vmem:[#allocation22_spill] sm:$0xff]  ;;  %v10634_v26 = vld [vmem:[#allocation28_spill] sm:$0xff] }
 0x382   : > { %10628 = vst [vmem:[#allocation18_spill] sm:$0xff] %v8578_v23 }
 0x383   : > { %v8580_v18 = vadd.f32 %v2521_v49, %v2158_v41  ;;  %v7279_v49 = vld [vmem:[%s7606_s27 + $0xd0] sm:$0xff]  ;;  %v2526_v38 = vpop.f32.mrf.mxu3  ;;  %2943 = vmatpush.bf16.msrb.mxu1 %v6223_v22 }
 0x384   : > { %6048 = vmatmul.msk.bf16.gmra.mxu0 %vm975_vm0, %v7279_v49  ;;  %6167 = vmatmul.msk.bf16.gmra.mxu2 %vm975_vm0, %v7279_v49 }
 0x385   : > { %10629 = vst [vmem:[#allocation24_spill] sm:$0xff] %v8580_v18 }
 0x387   : > { %v2380_v23 = vpop.f32.mrf.mxu2 }
 0x388   : > { %v2033_v58 = vpop.f32.mrf.mxu1  ;;  %v8599_v14 = vadd.f32 %v2380_v23, %v2163_v52  ;;  %v1896_v36 = vpop.f32.mrf.mxu0  ;;  %6195 = vmatmul.msk.bf16.gmra.mxu3 %vm975_vm0, %v7279_v49  ;;  %v10637_v52 = vld [vmem:[#allocation30_spill] sm:$0xff] }
 0x389   : > { %v2160_v41 = vadd.f32 %v2033_v58, %v10631_v25  ;;  %v8605_v48 = vadd.f32 %v1896_v36, %v10634_v26  ;;  %v10638_v26 = vld [vmem:[#allocation25_spill] sm:$0xff] }
 0x38a   : > { %10632 = vst [vmem:[#allocation20_spill] sm:$0xff] %v8599_v14 }
 0x38b   : > { %v8601_v1 = vadd.f32 %v2524_v55, %v2160_v41  ;;  %6074 = vmatmul.msk.bf16.gmra.mxu1 %vm975_vm0, %v7277_v35  ;;  %10635 = vst [vmem:[#allocation22_spill] sm:$0xff] %v8605_v48  ;;  %v2529_v34 = vpop.f32.mrf.mxu3  ;;  %v7280_v41 = vld [vmem:[%s7606_s27 + $0xd8] sm:$0xff] }
 0x38d   : > { %10633 = vst [vmem:[#allocation26_spill] sm:$0xff] %v8601_v1 }
 0x38f   : > { %v2382_v18 = vpop.f32.mrf.mxu2 }
 0x390   : > { %v2035_v40 = vpop.f32.mrf.mxu1  ;;  %v8609_v58 = vadd.f32 %v2382_v18, %v2165_v27  ;;  %v1899_v23 = vpop.f32.mrf.mxu0  ;;  %v6386_v18 = vld [vmem:[%s10505_s3 + $0xe0] sm:$0xf] }
 0x391   : > { %v2162_v22 = vadd.f32 %v2035_v40, %v10636_v62  ;;  %v2171_v55 = vadd.f32 %v1899_v23, %v10637_v52  ;;  %v7115_v40 = vld [vmem:[%s10505_s3 + $0xe4] sm:$0xf] }
 0x392   : > { %v10642_v52 = vld [vmem:[#allocation27_spill] sm:$0xff] }
 0x393   : > { %v8611_v25 = vadd.f32 %v2526_v38, %v2162_v22  ;;  %v2531_v35 = vpop.f32.mrf.mxu3  ;;  %v7116_v38 = vld [vmem:[%s10505_s3 + $0xe4] sm:$0xf0] }
 0x394   : > { %6049 = vmatmul.msk.bf16.gmra.mxu0 %vm975_vm0, %v7280_v41  ;;  %6168 = vmatmul.msk.bf16.gmra.mxu2 %vm975_vm0, %v7280_v41 }
 0x397   : > { %v2385_v14 = vpop.f32.mrf.mxu2 }
 0x398   : > { %v2038_v36 = vpop.f32.mrf.mxu1  ;;  %v8618_v1 = vadd.f32 %v2385_v14, %v2167_v61  ;;  %v1901_v27 = vpop.f32.mrf.mxu0  ;;  %v10640_v61 = vld [vmem:[#allocation32_spill] sm:$0xff]  ;;  %6196 = vmatmul.msk.bf16.gmra.mxu3 %vm975_vm0, %v7280_v41 }
 0x399   : > { %v2164_v48 = vadd.f32 %v2038_v36, %v10638_v26  ;;  %v8633_v14 = vadd.f32 %v1901_v27, %v10640_v61 }
 0x39a   : > { %10639 = vst [vmem:[#allocation28_spill] sm:$0xff] %v8618_v1 }
 0x39b   : > { %v8620_v62 = vadd.f32 %v2529_v34, %v2164_v48  ;;  %6075 = vmatmul.msk.bf16.gmra.mxu1 %vm975_vm0, %v7278_v51  ;;  %10641 = vst [vmem:[#allocation23_spill] sm:$0xff] %v8633_v14  ;;  %v6387_v48 = vor.u32 %v7116_v38, %v6386_v18  ;;  %v6388_v51 = vld [vmem:[%s10505_s3 + $0xe8] sm:$0xf0]  ;;  %v2534_v22 = vpop.f32.mrf.mxu3  ;;  %v7281_v14 = vld [vmem:[%s7606_s27 + $0xe0] sm:$0xff] }
 0x39c   : > { %v6391_v34 = vor.u32 %v7115_v40, %v6388_v51  ;;  %v10646_v40 = vld [vmem:[#allocation29_spill] sm:$0xff] }
 0x39d   : > { %3713 = vmatpush.bf16.msra.mxu2 %v6387_v48 }
 0x39e   : > { %3772 = vmatpush.bf16.msra.mxu3 %v6391_v34 }
 0x39f   : > { %v8640_v26 = vpop.f32.mrf.mxu2 }
 0x3a0   : > { %v2040_v23 = vpop.f32.mrf.mxu1  ;;  %10643 = vst [vmem:[#allocation30_spill] sm:$0xff] %v8640_v26  ;;  %v1904_v27 = vpop.f32.mrf.mxu0  ;;  %v10651_v26 = vld [vmem:[#allocation31_spill] sm:$0xff] }
 0x3a1   : > { %v2166_v36 = vadd.f32 %v2040_v23, %v10642_v52  ;;  %v2175_v61 = vadd.f32 %v1904_v27, %v8093_v4  ;;  %v10649_v4 = vld [vmem:[#allocation35_spill] sm:$0xff] }
 0x3a3   : > { %v8642_v1 = vadd.f32 %v2531_v35, %v2166_v36  ;;  %v8648_v18 = vpop.f32.mrf.mxu3 }
 0x3a4   : > { %6050 = vmatmul.msk.bf16.gmra.mxu0 %vm975_vm0, %v7281_v14  ;;  %6169 = vmatmul.msk.bf16.gmra.mxu2 %vm975_vm0, %v7281_v14  ;;  %10645 = vst [vmem:[#allocation32_spill] sm:$0xff] %v8648_v18 }
 0x3a5   : > { %10644 = vst [vmem:[#allocation25_spill] sm:$0xff] %v8642_v1 }
 0x3a7   : > { %v2390_v51 = vpop.f32.mrf.mxu2 }
 0x3a8   : > { %v2043_v38 = vpop.f32.mrf.mxu1  ;;  %v8651_v34 = vadd.f32 %v2390_v51, %v2171_v55  ;;  %v1906_v35 = vpop.f32.mrf.mxu0  ;;  %6197 = vmatmul.msk.bf16.gmra.mxu3 %vm975_vm0, %v7281_v14  ;;  %v10656_v51 = vld [vmem:[#allocation33_spill] sm:$0xff] }
 0x3a9   : > { %v2168_v48 = vadd.f32 %v2043_v38, %v10646_v40  ;;  %v8657_v52 = vadd.f32 %v1906_v35, %v10649_v4  ;;  %v7024_v38 = vld [vmem:[%s7606_s27 + $0xe8] sm:$0xff]  ;;  %v10654_v40 = vld [vmem:[#allocation37_spill] sm:$0xff] }
 0x3aa   : > { %10647 = vst [vmem:[#allocation27_spill] sm:$0xff] %v8651_v34 }
 0x3ab   : > { %v8653_v23 = vadd.f32 %v2534_v22, %v2168_v48  ;;  %6076 = vmatmul.msk.bf16.gmra.mxu1 %vm975_vm0, %v7279_v49  ;;  %10650 = vst [vmem:[#allocation35_spill] sm:$0xff] %v8657_v52  ;;  %v2539_v36 = vpop.f32.mrf.mxu3 }
 0x3ad   : > { %10648 = vst [vmem:[#allocation29_spill] sm:$0xff] %v8653_v23 }
 0x3af   : > { %v8663_v1 = vpop.f32.mrf.mxu2 }
 0x3b0   : > { %v2045_v27 = vpop.f32.mrf.mxu1  ;;  %10653 = vst [vmem:[#allocation77_spill] sm:$0xff] %v8663_v1  ;;  %v1909_v55 = vpop.f32.mrf.mxu0  ;;  %v10658_v1 = vld [vmem:[#allocation39_spill] sm:$0xff] }
 0x3b1   : > { %v8661_v18 = vadd.f32 %v2045_v27, %v10651_v26  ;;  %v2179_v22 = vadd.f32 %v1909_v55, %v10654_v40 }
 0x3b3   : > { %10652 = vst [vmem:[#allocation31_spill] sm:$0xff] %v8661_v18  ;;  %v8669_v49 = vpop.f32.mrf.mxu3  ;;  %v10660_v18 = vld [vmem:[#allocation34_spill] sm:$0xff] }
 0x3b4   : > { %6051 = vmatmul.msk.bf16.gmra.mxu0 %vm975_vm0, %v7024_v38  ;;  %6170 = vmatmul.msk.bf16.gmra.mxu2 %vm975_vm0, %v7024_v38  ;;  %10655 = vst [vmem:[#allocation37_spill] sm:$0xff] %v8669_v49 }
 0x3b7   : > { %v2395_v4 = vpop.f32.mrf.mxu2 }
 0x3b8   : > { %v2048_v48 = vpop.f32.mrf.mxu1  ;;  %v8672_v52 = vadd.f32 %v2395_v4, %v2175_v61  ;;  %v1911_v27 = vpop.f32.mrf.mxu0  ;;  %6198 = vmatmul.msk.bf16.gmra.mxu3 %vm975_vm0, %v7024_v38  ;;  %v7025_v61 = vld [vmem:[%s7606_s27 + $0xf0] sm:$0xff] }
 0x3b9   : > { %v2172_v35 = vadd.f32 %v2048_v48, %v10656_v51  ;;  %v8678_v55 = vadd.f32 %v1911_v27, %v10658_v1  ;;  %v10663_v51 = vld [vmem:[#allocation36_spill] sm:$0xff] }
 0x3ba   : > { %10657 = vst [vmem:[#allocation33_spill] sm:$0xff] %v8672_v52 }
 0x3bb   : > { %v8674_v26 = vadd.f32 %v2539_v36, %v2172_v35  ;;  %6077 = vmatmul.msk.bf16.gmra.mxu1 %vm975_vm0, %v7280_v41  ;;  %10659 = vst [vmem:[#allocation39_spill] sm:$0xff] %v8678_v55  ;;  %v2544_v40 = vpop.f32.mrf.mxu3  ;;  %v10666_v55 = vld [vmem:[#allocation42_spill] sm:$0xff] }
 0x3bf   : > { %v8684_v23 = vpop.f32.mrf.mxu2 }
 0x3c0   : > { %v2050_v34 = vpop.f32.mrf.mxu1  ;;  %10661 = vst [vmem:[#allocation34_spill] sm:$0xff] %v8684_v23  ;;  %v1914_v48 = vpop.f32.mrf.mxu0  ;;  %v10668_v23 = vld [vmem:[#allocation38_spill] sm:$0xff] }
 0x3c1   : > { %v8682_v49 = vadd.f32 %v2050_v34, %v10660_v18  ;;  %v2183_v36 = vadd.f32 %v1914_v48, %v8144_v39 }
 0x3c3   : > { %v8691_v1 = vpop.f32.mrf.mxu3 }
 0x3c4   : > { %6264 = vmatmul.msk.bf16.vlgmr.msra.gmra.mxu0 %vm975_vm0, %v8195_v46  ;;  %6171 = vmatmul.msk.bf16.gmra.mxu2 %vm975_vm0, %v7025_v61  ;;  %10662 = vst [vmem:[#allocation78_spill] sm:$0xff] %v8691_v1 }
 0x3c7   : > { %v2400_v4 = vpop.f32.mrf.mxu2 }
 0x3c8   : > { %v2053_v41 = vpop.f32.mrf.mxu1  ;;  %v8694_v27 = vadd.f32 %v2400_v4, %v2179_v22  ;;  %v1916_v34 = vpop.f32.mrf.mxu0  ;;  %6199 = vmatmul.msk.bf16.gmra.mxu3 %vm975_vm0, %v7025_v61  ;;  %v6378_v22 = vld [vmem:[%s10505_s3 + $0xd0] sm:$0xf] }
 0x3c9   : > { %v2176_v35 = vadd.f32 %v2053_v41, %v10663_v51  ;;  %v8700_v39 = vadd.f32 %v1916_v34, %v10666_v55  ;;  %v7113_v55 = vld [vmem:[%s10505_s3 + $0xd4] sm:$0xf] }
 0x3ca   : > { %10664 = vst [vmem:[#allocation36_spill] sm:$0xff] %v8694_v27 }
 0x3cb   : > { %v8696_v18 = vadd.f32 %v2544_v40, %v2176_v35  ;;  %6078 = vmatmul.msk.bf16.gmra.mxu1 %vm975_vm0, %v7281_v14  ;;  %10667 = vst [vmem:[#allocation42_spill] sm:$0xff] %v8700_v39  ;;  %v2549_v46 = vpop.f32.mrf.mxu3  ;;  %v7114_v14 = vld [vmem:[%s10505_s3 + $0xd4] sm:$0xf0]  ;;  %v10671_v35 = vld [vmem:[#allocation56_spill] sm:$0xff] }
 0x3cc   : > { %v6379_v61 = vor.u32 %v7114_v14, %v6378_v22  ;;  %v10676_v22 = vld [vmem:[#allocation45_spill] sm:$0xff] }
 0x3cd   : > { %10665 = vst [vmem:[#allocation79_spill] sm:$0xff] %v8696_v18 }
 0x3ce   : > { %3714 = vmatpush.bf16.msra.mxu2 %v6379_v61 }
 0x3cf   : > { %v8706_v52 = vpop.f32.mrf.mxu2 }
 0x3d0   : > { %v2055_v48 = vpop.f32.mrf.mxu1  ;;  %10670 = vst [vmem:[#allocation80_spill] sm:$0xff] %v8706_v52  ;;  %v1919_v41 = vpop.f32.mrf.mxu0 }
 0x3d1   : > { %v8704_v1 = vadd.f32 %v2055_v48, %v10668_v23  ;;  %v2187_v40 = vadd.f32 %v1919_v41, %v8160_v16  ;;  %v6380_v23 = vld [vmem:[%s10505_s3 + $0xd8] sm:$0xf0]  ;;  %v10673_v48 = vld [vmem:[#allocation40_spill] sm:$0xff] }
 0x3d2   : > { %v6383_v51 = vor.u32 %v7113_v55, %v6380_v23  ;;  %v10678_v23 = vld [vmem:[#allocation41_spill] sm:$0xff] }
 0x3d3   : > { %10669 = vst [vmem:[#allocation38_spill] sm:$0xff] %v8704_v1  ;;  %v8723_v4 = vpop.f32.mrf.mxu3 }
 0x3d4   : > { %6265 = vmatmul.msk.bf16.gmra.mxu0 %vm975_vm0, %v10671_v35  ;;  %10672 = vst [vmem:[#allocation56_spill] sm:$0xff] %v8723_v4  ;;  %3773 = vmatpush.bf16.msra.mxu3 %v6383_v51 }
 0x3d7   : > { %v2405_v52 = vpop.f32.mrf.mxu2 }
 0x3d8   : > { %v2058_v34 = vpop.f32.mrf.mxu1  ;;  %v8726_v27 = vadd.f32 %v2405_v52, %v2183_v36  ;;  %v1921_v41 = vpop.f32.mrf.mxu0  ;;  %v10682_v36 = vld [vmem:[#allocation61_spill] sm:$0xff] }
 0x3d9   : > { %v2180_v39 = vadd.f32 %v2058_v34, %v10673_v48  ;;  %v8732_v14 = vadd.f32 %v1921_v41, %v10676_v22  ;;  %v10681_v48 = vld [vmem:[#allocation47_spill] sm:$0xff] }
 0x3da   : > { %10674 = vst [vmem:[#allocation40_spill] sm:$0xff] %v8726_v27 }
 0x3db   : > { %v8728_v16 = vadd.f32 %v2549_v46, %v2180_v39  ;;  %6079 = vmatmul.msk.bf16.gmra.mxu1 %vm975_vm0, %v7024_v38  ;;  %10677 = vst [vmem:[#allocation45_spill] sm:$0xff] %v8732_v14  ;;  %v2554_v55 = vpop.f32.mrf.mxu3  ;;  %v10684_v46 = vld [vmem:[#allocation43_spill] sm:$0xff] }
 0x3dd   : > { %10675 = vst [vmem:[#allocation81_spill] sm:$0xff] %v8728_v16 }
 0x3df   : > { %v8737_v51 = vpop.f32.mrf.mxu2 }
 0x3e0   : > { %v2060_v61 = vpop.f32.mrf.mxu1  ;;  %10680 = vst [vmem:[#allocation82_spill] sm:$0xff] %v8737_v51  ;;  %v10687_v51 = vld [vmem:[#allocation49_spill] sm:$0xff] }
 0x3e1   : > { %v8735_v35 = vadd.f32 %v2060_v61, %v10678_v23  ;;  %v1924_v34 = vpop.f32.mrf.mxu0  ;;  %v7282_v23 = vld [vmem:[%s7606_s27 + $0x20] sm:$0xff] }
 0x3e2   : > { %v2191_v52 = vadd.f32 %v1924_v34, %v10681_v48 }
 0x3e3   : > { %10679 = vst [vmem:[#allocation41_spill] sm:$0xff] %v8735_v35  ;;  %v8742_v39 = vpop.f32.mrf.mxu3 }
 0x3e4   : > { %6266 = vmatmul.msk.bf16.gmra.mxu0 %vm975_vm0, %v10682_v36  ;;  %10683 = vst [vmem:[#allocation47_spill] sm:$0xff] %v8742_v39  ;;  %v10689_v39 = vld [vmem:[#allocation44_spill] sm:$0xff] }
 0x3e7   : > { %v2410_v22 = vpop.f32.mrf.mxu2 }
 0x3e8   : > { %v2063_v38 = vpop.f32.mrf.mxu1  ;;  %v8745_v14 = vadd.f32 %v2410_v22, %v2187_v40  ;;  %v10692_v40 = vld [vmem:[#allocation51_spill] sm:$0xff] }
 0x3e9   : > { %v2184_v41 = vadd.f32 %v2063_v38, %v10684_v46  ;;  %v1926_v61 = vpop.f32.mrf.mxu0 }
 0x3ea   : > { %10685 = vst [vmem:[#allocation61_spill] sm:$0xff] %v8745_v14  ;;  %v8752_v34 = vadd.f32 %v1926_v61, %v10687_v51  ;;  %v10694_v51 = vld [vmem:[#allocation46_spill] sm:$0xff] }
 0x3eb   : > { %v8747_v27 = vadd.f32 %v2554_v55, %v2184_v41  ;;  %6292 = vmatmul.msk.bf16.vlgmr.msrb.gmra.mxu1 %vm975_vm0, %v7282_v23  ;;  %v2559_v48 = vpop.f32.mrf.mxu3  ;;  %v7283_v55 = vld [vmem:[%s7606_s27 + $0x38] sm:$0xff] }
 0x3ec   : > { %10688 = vst [vmem:[#allocation49_spill] sm:$0xff] %v8752_v34 }
 0x3ed   : > { %10686 = vst [vmem:[#allocation43_spill] sm:$0xff] %v8747_v27 }
 0x3ef   : > { %v8757_v35 = vpop.f32.mrf.mxu2 }
 0x3f0   : > { %v2065_v36 = vpop.f32.mrf.mxu1  ;;  %10691 = vst [vmem:[#allocation83_spill] sm:$0xff] %v8757_v35  ;;  %v10697_v35 = vld [vmem:[#allocation53_spill] sm:$0xff] }
 0x3f1   : > { %v8755_v4 = vadd.f32 %v2065_v36, %v10689_v39  ;;  %v1929_v38 = vpop.f32.mrf.mxu0  ;;  %v7284_v36 = vld [vmem:[%s7606_s27 + $0x28] sm:$0xff] }
 0x3f2   : > { %v2195_v46 = vadd.f32 %v1929_v38, %v10692_v40 }
 0x3f3   : > { %10690 = vst [vmem:[#allocation44_spill] sm:$0xff] %v8755_v4  ;;  %v8762_v41 = vpop.f32.mrf.mxu3 }
 0x3f4   : > { %6267 = vmatmul.msk.bf16.gmra.mxu0 %vm975_vm0, %v7283_v55  ;;  %10693 = vst [vmem:[#allocation51_spill] sm:$0xff] %v8762_v41  ;;  %v10699_v41 = vld [vmem:[#allocation48_spill] sm:$0xff] }
 0x3f7   : > { %v2415_v23 = vpop.f32.mrf.mxu2 }
 0x3f8   : > { %v2068_v22 = vpop.f32.mrf.mxu1  ;;  %v8765_v34 = vadd.f32 %v2415_v23, %v2191_v52  ;;  %v10702_v52 = vld [vmem:[#allocation55_spill] sm:$0xff] }
 0x3f9   : > { %v2188_v61 = vadd.f32 %v2068_v22, %v10694_v51  ;;  %v1931_v39 = vpop.f32.mrf.mxu0 }
 0x3fa   : > { %10695 = vst [vmem:[#allocation46_spill] sm:$0xff] %v8765_v34  ;;  %v8772_v38 = vadd.f32 %v1931_v39, %v10697_v35 }
 0x3fb   : > { %v8767_v14 = vadd.f32 %v2559_v48, %v2188_v61  ;;  %6293 = vmatmul.msk.bf16.gmra.mxu1 %vm975_vm0, %v7284_v36  ;;  %v2564_v40 = vpop.f32.mrf.mxu3  ;;  %v7285_v48 = vld [vmem:[%s7606_s27 + $0x40] sm:$0xff]  ;;  %v10704_v36 = vld [vmem:[#allocation50_spill] sm:$0xff] }
 0x3fc   : > { %10698 = vst [vmem:[#allocation53_spill] sm:$0xff] %v8772_v38 }
 0x3fd   : > { %10696 = vst [vmem:[#allocation84_spill] sm:$0xff] %v8767_v14  ;;  %v10712_v14 = vld [vmem:[#allocation60_spill] sm:$0xff] }
 0x3ff   : > { %v8777_v16 = vpop.f32.mrf.mxu2 }
 0x400   : > { %v2070_v4 = vpop.f32.mrf.mxu1  ;;  %10701 = vst [vmem:[#allocation85_spill] sm:$0xff] %v8777_v16 }
 0x401   : > { %v8775_v27 = vadd.f32 %v2070_v4, %v10699_v41  ;;  %v1934_v22 = vpop.f32.mrf.mxu0  ;;  %v7286_v41 = vld [vmem:[%s7606_s27 + $0x30] sm:$0xff] }
 0x402   : > { %v2199_v51 = vadd.f32 %v1934_v22, %v10702_v52  ;;  %v6370_v22 = vld [vmem:[%s10505_s3 + $0xc0] sm:$0xf]  ;;  %v7112_v52 = vld [vmem:[%s10505_s3 + $0xc4] sm:$0xf0] }
 0x403   : > { %10700 = vst [vmem:[#allocation48_spill] sm:$0xff] %v8775_v27  ;;  %v8782_v61 = vpop.f32.mrf.mxu3 }
 0x404   : > { %6268 = vmatmul.msk.bf16.gmra.mxu0 %vm975_vm0, %v7285_v48  ;;  %10703 = vst [vmem:[#allocation55_spill] sm:$0xff] %v8782_v61  ;;  %v10709_v61 = vld [vmem:[#allocation52_spill] sm:$0xff] }
 0x407   : > { %v2420_v39 = vpop.f32.mrf.mxu2 }
 0x408   : > { %v2073_v23 = vpop.f32.mrf.mxu1  ;;  %v8785_v38 = vadd.f32 %v2420_v39, %v2195_v46  ;;  %v7111_v46 = vld [vmem:[%s10505_s3 + $0xc4] sm:$0xf] }
 0x409   : > { %v2192_v35 = vadd.f32 %v2073_v23, %v10704_v36  ;;  %v1936_v4 = vpop.f32.mrf.mxu0  ;;  %v10707_v23 = vld [vmem:[#allocation58_spill] sm:$0xff]  ;;  %v6371_v36 = vor.u32 %v7112_v52, %v6370_v22 }
 0x40a   : > { %10705 = vst [vmem:[#allocation50_spill] sm:$0xff] %v8785_v38 }
 0x40b   : > { %v8787_v34 = vadd.f32 %v2564_v40, %v2192_v35  ;;  %6294 = vmatmul.msk.bf16.gmra.mxu1 %vm975_vm0, %v7286_v41  ;;  %v8801_v40 = vadd.f32 %v1936_v4, %v10707_v23  ;;  %v6372_v35 = vld [vmem:[%s10505_s3 + $0xc8] sm:$0xf0]  ;;  %3715 = vmatpush.bf16.msra.mxu2 %v6371_v36  ;;  %v2569_v41 = vpop.f32.mrf.mxu3 }
 0x40c   : > { %v6375_v39 = vor.u32 %v7111_v46, %v6372_v35  ;;  %v7287_v4 = vld [vmem:[%s7606_s27 + $0x48] sm:$0xff]  ;;  %v10714_v46 = vld [vmem:[#allocation54_spill] sm:$0xff] }
 0x40d   : > { %10706 = vst [vmem:[#allocation86_spill] sm:$0xff] %v8787_v34 }
 0x40e   : > { %10708 = vst [vmem:[#allocation58_spill] sm:$0xff] %v8801_v40  ;;  %3774 = vmatpush.bf16.msra.mxu3 %v6375_v39 }
 0x40f   : > { %v8809_v34 = vpop.f32.mrf.mxu2 }
 0x410   : > { %v2075_v38 = vpop.f32.mrf.mxu1  ;;  %10711 = vst [vmem:[#allocation87_spill] sm:$0xff] %v8809_v34  ;;  %v10718_v34 = vld [vmem:[#allocation57_spill] sm:$0xff] }
 0x411   : > { %v8807_v16 = vadd.f32 %v2075_v38, %v10709_v61  ;;  %v1939_v27 = vpop.f32.mrf.mxu0  ;;  %v10716_v61 = vld [vmem:[#allocation63_spill] sm:$0xff] }
 0x412   : > { %v2203_v1 = vadd.f32 %v1939_v27, %v10712_v14 }
 0x413   : > { %10710 = vst [vmem:[#allocation52_spill] sm:$0xff] %v8807_v16  ;;  %v8814_v22 = vpop.f32.mrf.mxu3 }
 0x414   : > { %6269 = vmatmul.msk.bf16.gmra.mxu0 %vm975_vm0, %v7287_v4  ;;  %10713 = vst [vmem:[#allocation60_spill] sm:$0xff] %v8814_v22 }
 0x417   : > { %v2425_v36 = vpop.f32.mrf.mxu2 }
 0x418   : > { %v2078_v52 = vpop.f32.mrf.mxu1  ;;  %v8817_v35 = vadd.f32 %v2425_v36, %v2199_v51  ;;  %v7288_v51 = vld [vmem:[%s7606_s27 + $0x50] sm:$0xff] }
 0x419   : > { %v2196_v23 = vadd.f32 %v2078_v52, %v10714_v46  ;;  %v1941_v38 = vpop.f32.mrf.mxu0  ;;  %v10722_v46 = vld [vmem:[#allocation59_spill] sm:$0xff] }
 0x41a   : > { %10715 = vst [vmem:[#allocation54_spill] sm:$0xff] %v8817_v35  ;;  %v8823_v40 = vadd.f32 %v1941_v38, %v10716_v61  ;;  %v10728_v35 = vld [vmem:[#allocation67_spill] sm:$0xff] }
 0x41b   : > { %v8819_v39 = vadd.f32 %v2569_v41, %v2196_v23  ;;  %6295 = vmatmul.msk.bf16.gmra.mxu1 %vm975_vm0, %v7283_v55  ;;  %v2574_v27 = vpop.f32.mrf.mxu3 }
 0x41c   : > { %10717 = vst [vmem:[#allocation63_spill] sm:$0xff] %v8823_v40  ;;  %v10726_v40 = vld [vmem:[#allocation62_spill] sm:$0xff] }
 0x41f   : > { %v8828_v22 = vpop.f32.mrf.mxu2 }
 0x420   : > { %v2080_v14 = vpop.f32.mrf.mxu1  ;;  %10720 = vst [vmem:[#allocation88_spill] sm:$0xff] %v8828_v22 }
 0x421   : > { %v8826_v16 = vadd.f32 %v2080_v14, %v10718_v34  ;;  %v1944_v18 = vpop.f32.mrf.mxu0 }
 0x422   : > { %v2207_v52 = vadd.f32 %v1944_v18, %v8258_v0 }
 0x423   : > { %10719 = vst [vmem:[#allocation57_spill] sm:$0xff] %v8826_v16  ;;  %v8833_v41 = vpop.f32.mrf.mxu3 }
 0x424   : > { %6270 = vmatmul.msk.bf16.gmra.mxu0 %vm975_vm0, %v7288_v51  ;;  %10721 = vst [vmem:[#allocation89_spill] sm:$0xff] %v8833_v41  ;;  %v10727_v41 = vld [vmem:[#allocation3_spill] sm:$0xff] }
 0x425   : > { %v1571_v16 = vadd.f32 %v10728_v35, %v10727_v41 }
 0x427   : > { %v2430_v36 = vpop.f32.mrf.mxu2 }
 0x428   : > { %v2083_v55 = vpop.f32.mrf.mxu1  ;;  %v8836_v38 = vadd.f32 %v2430_v36, %v2203_v1 }
 0x429   : > { %v2200_v23 = vadd.f32 %v2083_v55, %v10722_v46  ;;  %v1946_v34 = vpop.f32.mrf.mxu0 }
 0x42a   : > { %10723 = vst [vmem:[#allocation59_spill] sm:$0xff] %v8836_v38  ;;  %v8842_v14 = vadd.f32 %v1946_v34, %v8264_v45  ;;  %v10731_v45 = vld [vmem:[#allocation4_spill] sm:$0xff]  ;;  %v10732_v34 = vld [vmem:[#allocation69_spill] sm:$0xff] }
 0x42b   : > { %v8838_v61 = vadd.f32 %v2574_v27, %v2200_v23  ;;  %6296 = vmatmul.msk.bf16.gmra.mxu1 %vm975_vm0, %v7285_v48  ;;  %v2579_v18 = vpop.f32.mrf.mxu3  ;;  %v7289_v27 = vld [vmem:[%s7606_s27 + $0x58] sm:$0xff]  ;;  %v10730_v48 = vld [vmem:[#allocation64_spill] sm:$0xff] }
 0x42c   : > { %10725 = vst [vmem:[#allocation91_spill] sm:$0xff] %v8842_v14  ;;  %v1573_v14 = vadd.f32 %v10732_v34, %v10731_v45 }
 0x42d   : > { %10724 = vst [vmem:[#allocation90_spill] sm:$0xff] %v8838_v61 }
 0x42f   : > { %v8849_v55 = vpop.f32.mrf.mxu2 }
 0x430   : > { %v2085_v0 = vpop.f32.mrf.mxu1  ;;  %10729 = vst [vmem:[#allocation62_spill] sm:$0xff] %v8849_v55 }
 0x431   : > { %v8845_v22 = vadd.f32 %v2085_v0, %v10726_v40  ;;  %v1949_v1 = vpop.f32.mrf.mxu0 }
 0x432   : > { %v2211_v46 = vadd.f32 %v1949_v1, %v1571_v16  ;;  %v10737_v1 = vld [vmem:[#allocation65_spill] sm:$0xff] }
 0x433   : > { %v8856_v61 = vpop.f32.mrf.mxu3 }
 0x434   : > { %6271 = vmatmul.msk.bf16.gmra.mxu0 %vm975_vm0, %v7289_v27  ;;  %10733 = vst [vmem:[#allocation3_spill] sm:$0xff] %v8856_v61 }
 0x437   : > { %v2435_v38 = vpop.f32.mrf.mxu2 }
 0x438   : > { %v2088_v23 = vpop.f32.mrf.mxu1  ;;  %v8858_v40 = vadd.f32 %v2435_v38, %v2207_v52  ;;  %v7110_v52 = vld [vmem:[%s10505_s3 + $0xb4] sm:$0xf0]  ;;  %v7109_v38 = vld [vmem:[%s10505_s3 + $0xb4] sm:$0xf] }
 0x439   : > { %v2204_v36 = vadd.f32 %v2088_v23, %v10730_v48  ;;  %v1951_v35 = vpop.f32.mrf.mxu0  ;;  %v6362_v23 = vld [vmem:[%s10505_s3 + $0xb0] sm:$0xf] }
 0x43a   : > { %10734 = vst [vmem:[#allocation67_spill] sm:$0xff] %v8858_v40  ;;  %v8863_v16 = vadd.f32 %v1951_v35, %v1573_v14  ;;  %v6363_v14 = vor.u32 %v7110_v52, %v6362_v23  ;;  %v7290_v35 = vld [vmem:[%s7606_s27 + $0x60] sm:$0xff] }
 0x43b   : > { %v8860_v0 = vadd.f32 %v2579_v18, %v2204_v36  ;;  %6297 = vmatmul.msk.bf16.gmra.mxu1 %vm975_vm0, %v7287_v4  ;;  %v6364_v18 = vld [vmem:[%s10505_s3 + $0xb8] sm:$0xf0]  ;;  %v2584_v34 = vpop.f32.mrf.mxu3 }
 0x43c   : > { %10736 = vst [vmem:[#allocation4_spill] sm:$0xff] %v8863_v16  ;;  %v6367_v36 = vor.u32 %v7109_v38, %v6364_v18  ;;  %3716 = vmatpush.bf16.msra.mxu2 %v6363_v14  ;;  %v10743_v38 = vld [vmem:[#allocation72_spill] sm:$0xff] }
 0x43d   : > { %10735 = vst [vmem:[#allocation64_spill] sm:$0xff] %v8860_v0 }
 0x43e   : > { %3775 = vmatpush.bf16.msra.mxu3 %v6367_v36 }
 0x43f   : > { %v8877_v4 = vpop.f32.mrf.mxu2 }
 0x440   : > { %v2090_v41 = vpop.f32.mrf.mxu1  ;;  %10739 = vst [vmem:[#allocation65_spill] sm:$0xff] %v8877_v4 }
 0x441   : > { %v8866_v55 = vadd.f32 %v2090_v41, %v10737_v1  ;;  %v2796_v48 = vpop.f32.mrf.mxu0  ;;  %v10740_v1 = vld [vmem:[#allocation66_spill] sm:$0xff] }
 0x442   : > { %v3085_v45 = vadd.f32 %v2796_v48, %v8287_v5  ;;  %v10745_v48 = vld [vmem:[#allocation68_spill] sm:$0xff] }
 0x443   : > { %10738 = vst [vmem:[#allocation69_spill] sm:$0xff] %v8866_v55  ;;  %v8892_v18 = vpop.f32.mrf.mxu3 }
 0x444   : > { %6272 = vmatmul.msk.bf16.gmra.mxu0 %vm975_vm0, %v7290_v35  ;;  %10744 = vst [vmem:[#allocation72_spill] sm:$0xff] %v8892_v18 }
 0x447   : > { %v2440_v4 = vpop.f32.mrf.mxu2 }
 0x448   : > { %v2093_v41 = vpop.f32.mrf.mxu1  ;;  %v8886_v23 = vadd.f32 %v2440_v4, %v2211_v46  ;;  %v10747_v4 = vld [vmem:[#allocation70_spill] sm:$0xff] }
 0x449   : > { %v2208_v16 = vadd.f32 %v2093_v41, %v10740_v1  ;;  %v2798_v40 = vpop.f32.mrf.mxu0  ;;  %v7291_v1 = vld [vmem:[%s7606_s27 + $0x68] sm:$0xff] }
 0x44a   : > { %10741 = vst [vmem:[#allocation66_spill] sm:$0xff] %v8886_v23  ;;  %v3087_v5 = vadd.f32 %v2798_v40, %v10743_v38 }
 0x44b   : > { %v8888_v52 = vadd.f32 %v2584_v34, %v2208_v16  ;;  %6298 = vmatmul.msk.bf16.gmra.mxu1 %vm975_vm0, %v7288_v51  ;;  %v2589_v16 = vpop.f32.mrf.mxu3 }
 0x44d   : > { %10742 = vst [vmem:[#allocation92_spill] sm:$0xff] %v8888_v52 }
 0x450   : > { %v2095_v14 = vpop.f32.mrf.mxu1 }
 0x451   : > { %v8895_v36 = vadd.f32 %v2095_v14, %v10745_v48  ;;  %v2801_v61 = vpop.f32.mrf.mxu0  ;;  %v10749_v48 = vld [vmem:[#allocation71_spill] sm:$0xff] }
 0x452   : > { %v3089_v41 = vadd.f32 %v2801_v61, %v8313_v33  ;;  %v3197_v33 = vld [vmem:[%s10504_s2] sm:$0x3] }
 0x453   : > { %10746 = vst [vmem:[#allocation68_spill] sm:$0xff] %v8895_v36  ;;  %v8911_v18 = vperm.slane %v3197_v33, 0  ;;  %v8914_v36 = vld [vmem:[%s7606_s27 + $0x70] sm:$0xff] }
 0x454   : > { %6273 = vmatmul.msk.bf16.gmra.mxu0 %vm975_vm0, %v7291_v1 }
 0x458   : > { %v2098_v46 = vpop.f32.mrf.mxu1 }
 0x459   : > { %v2212_v34 = vadd.f32 %v2098_v46, %v10747_v4  ;;  %v2803_v40 = vpop.f32.mrf.mxu0  ;;  %v8918_v46 = vperm.slane %v3197_v33, 1 }
 0x45a   : > { %v3091_v38 = vadd.f32 %v2803_v40, %v8321_v10  ;;  %v3203_v10 = vadd.f32 %v8911_v18, %v3085_v45 }
 0x45b   : > { %v8901_v51 = vadd.f32 %v2589_v16, %v2212_v34  ;;  %6299 = vmatmul.msk.bf16.gmra.mxu1 %vm975_vm0, %v7289_v27 }
 0x45c   : > { %v3315_v40 = vmax.f32 %v3203_v10, 0.0  ;;  %v3207_v10 = vadd.f32 %v8911_v18, %v3089_v41 }
 0x45d   : > { %10748 = vst [vmem:[#allocation70_spill] sm:$0xff] %v8901_v51  ;;  %v3205_v51 = vadd.f32 %v8911_v18, %v3087_v5 }
 0x45f   : > { %v3317_v45 = vmax.f32 %v3205_v51, 0.0 }
 0x460   : > { %v2100_v14 = vpop.f32.mrf.mxu1 }
 0x461   : > { %v8906_v23 = vadd.f32 %v2100_v14, %v10749_v48  ;;  %v2806_v61 = vpop.f32.mrf.mxu0 }
 0x462   : > { %v3093_v41 = vadd.f32 %v2806_v61, %v8330_v24  ;;  %v6356_v24 = vld [vmem:[%s10505_s3 + $0xa8] sm:$0xf0]  ;;  %v8959_v61 = vld [vmem:[%s7606_s27 + $0x80] sm:$0xff] }
 0x463   : > { %10750 = vst [vmem:[#allocation71_spill] sm:$0xff] %v8906_v23 }
 0x464   : > { %6274 = vmatmul.msk.bf16.gmra.mxu0 %vm975_vm0, %v8914_v36 }
 0x468   : > { %v2945_v27 = vpop.f32.mrf.mxu1 }
 0x469   : > { %v3086_v16 = vadd.f32 %v2945_v27, %v8315_v2  ;;  %v2808_v34 = vpop.f32.mrf.mxu0  ;;  %v8930_v2 = vld [vmem:[%s7606_s27 + $0x78] sm:$0xff] }
 0x46b   : > { %v3204_v4 = vadd.f32 %v8918_v46, %v3086_v16  ;;  %6300 = vmatmul.msk.bf16.gmra.mxu1 %vm975_vm0, %v7290_v35 }
 0x46d   : > { %v3316_v14 = vmax.f32 %v3204_v4, 0.0 }
 0x46f   : > { %v3427_v48 = vmax.f32 %v3315_v40, %v3316_v14  ;;  %v3209_v40 = vadd.f32 %v8911_v18, %v3091_v38  ;;  %v7107_v38 = vld [vmem:[%s10505_s3 + $0xa4] sm:$0xf] }
 0x470   : > { %v2947_v23 = vpop.f32.mrf.mxu1 }
 0x471   : > { %v3088_v33 = vadd.f32 %v2947_v23, %v8323_v15  ;;  %v8927_v55 = vpop.f32.mrf.mxu0  ;;  %v3319_v23 = vmax.f32 %v3207_v10, 0.0  ;;  %v6359_v10 = vor.u32 %v7107_v38, %v6356_v24  ;;  %v7103_v24 = vld [vmem:[%s10505_s3 + $0x84] sm:$0xf] }
 0x473   : > { %v3206_v52 = vadd.f32 %v8918_v46, %v3088_v33  ;;  %3776 = vmatpush.bf16.msra.mxu3 %v6359_v10 }
 0x474   : > { %6275 = vmatmul.msk.bf16.gmra.mxu0 %vm975_vm0, %v8930_v2 }
 0x475   : > { %v3318_v0 = vmax.f32 %v3206_v52, 0.0 }
 0x477   : > { %v3428_v35 = vmax.f32 %v3317_v45, %v3318_v0  ;;  %v7108_v45 = vld [vmem:[%s10505_s3 + $0xa4] sm:$0xf0] }
 0x478   : > { %v2950_v27 = vpop.f32.mrf.mxu1 }
 0x479   : > { %v3090_v16 = vadd.f32 %v2950_v27, %v8332_v42  ;;  %v8937_v15 = vpop.f32.mrf.mxu0 }
 0x47b   : > { %v3208_v5 = vadd.f32 %v8918_v46, %v3090_v16  ;;  %6301 = vmatmul.msk.bf16.gmra.mxu1 %vm975_vm0, %v7291_v1  ;;  %v6354_v1 = vld [vmem:[%s10505_s3 + $0xa0] sm:$0xf]  ;;  %v3211_v16 = vadd.f32 %v8911_v18, %v3093_v41  ;;  %v7105_v41 = vld [vmem:[%s10505_s3 + $0x94] sm:$0xf] }
 0x47c   : > { %v6355_v27 = vor.u32 %v7108_v45, %v6354_v1  ;;  %v6348_v1 = vld [vmem:[%s10505_s3 + $0x98] sm:$0xf0] }
 0x47d   : > { %v3320_v51 = vmax.f32 %v3208_v5, 0.0  ;;  %v6351_v45 = vor.u32 %v7105_v41, %v6348_v1  ;;  %v3323_v38 = vmax.f32 %v3211_v16, 0.0  ;;  %v3097_v1 = vadd.f32 %v8927_v55, %v8347_v37 }
 0x47e   : > { %3717 = vmatpush.bf16.msra.mxu2 %v6355_v27  ;;  %v3099_v37 = vadd.f32 %v8937_v15, %v8355_v21 }
 0x47f   : > { %v3429_v52 = vmax.f32 %v3319_v23, %v3320_v51  ;;  %v6346_v51 = vld [vmem:[%s10505_s3 + $0x90] sm:$0xf]  ;;  %3777 = vmatpush.bf16.msra.mxu3 %v6351_v45 }
 0x480   : > { %v2952_v4 = vpop.f32.mrf.mxu1 }
 0x481   : > { %v3483_v14 = vmax.f32 %v3427_v48, %v3429_v52  ;;  %v3092_v0 = vadd.f32 %v2952_v4, %v8340_v31  ;;  %v8944_v33 = vpop.f32.mrf.mxu0  ;;  %v3321_v48 = vmax.f32 %v3209_v40, 0.0  ;;  %v7106_v52 = vld [vmem:[%s10505_s3 + $0x94] sm:$0xf0] }
 0x483   : > { %v3210_v42 = vadd.f32 %v8918_v46, %v3092_v0  ;;  %v3511_v4 = vpack.c.bf16 %v3483_v14, %v3483_v14  ;;  %v7104_v14 = vld [vmem:[%s10505_s3 + $0x84] sm:$0xf0] }
 0x484   : > { %6276 = vmatmul.msk.bf16.gmra.mxu0 %vm975_vm0, %v8959_v61 }
 0x485   : > { %v3322_v31 = vmax.f32 %v3210_v42, 0.0  ;;  %v6347_v42 = vor.u32 %v7106_v52, %v6346_v51  ;;  %v3832_v10 = vunpack.c.l.b16 %v3511_v4 }
 0x487   : > { %v3430_v5 = vmax.f32 %v3321_v48, %v3322_v31  ;;  %3718 = vmatpush.bf16.msra.mxu2 %v6347_v42 }
 0x488   : > { %v2955_v23 = vpop.f32.mrf.mxu1 }
 0x489   : > { %v3484_v40 = vmax.f32 %v3428_v35, %v3430_v5  ;;  %v3094_v0 = vadd.f32 %v2955_v23, %v8349_v60  ;;  %v2818_v27 = vpop.f32.mrf.mxu0  ;;  %v3095_v60 = vadd.f32 %v2808_v34, %v8338_v28  ;;  %v6338_v35 = vld [vmem:[%s10505_s3 + $0x80] sm:$0xf]  ;;  %v6340_v28 = vld [vmem:[%s10505_s3 + $0x88] sm:$0xf0] }
 0x48a   : > { %v6343_v34 = vor.u32 %v7103_v24, %v6340_v28 }
 0x48b   : > { %v3512_v48 = vpack.c.bf16 %v3484_v40, %v3484_v40  ;;  %v3212_v31 = vadd.f32 %v8918_v46, %v3094_v0  ;;  %6302 = vmatmul.msk.bf16.gmra.mxu1 %vm975_vm0, %v8914_v36  ;;  %v6339_v36 = vor.u32 %v7104_v14, %v6338_v35  ;;  %v3213_v40 = vadd.f32 %v8911_v18, %v3095_v60 }
 0x48c   : > { %3778 = vmatpush.bf16.msra.mxu3 %v6343_v34  ;;  %v3215_v35 = vadd.f32 %v8911_v18, %v3097_v1 }
 0x48d   : > { %v3833_v16 = vunpack.c.l.b16 %v3512_v48  ;;  %v3324_v5 = vmax.f32 %v3212_v31, 0.0  ;;  %3719 = vmatpush.bf16.msra.mxu2 %v6339_v36  ;;  %v3325_v41 = vmax.f32 %v3213_v40, 0.0  ;;  %v7295_v48 = vld [vmem:[%s7606_s27 + $0x88] sm:$0xff] }
 0x48e   : > { %v3327_v24 = vmax.f32 %v3215_v35, 0.0 }
 0x48f   : > { %v8993_v23 = vpack.c.b16 %v3833_v16, %v3832_v10  ;;  %v3431_v51 = vmax.f32 %v3323_v38, %v3324_v5  ;;  %v3217_v5 = vadd.f32 %v8911_v18, %v3099_v37 }
 0x490   : > { %v2957_v52 = vpop.f32.mrf.mxu1 }
 0x491   : > { %v3096_v0 = vadd.f32 %v2957_v52, %v8357_v44  ;;  %v2821_v42 = vpop.f32.mrf.mxu0  ;;  %v3101_v52 = vadd.f32 %v8944_v33, %v8364_v54  ;;  %v3329_v40 = vmax.f32 %v3217_v5, 0.0  ;;  %v3103_v33 = vadd.f32 %v2818_v27, %v8372_v59  ;;  %v7297_v5 = vld [vmem:[%s7606_s27 + $0x98] sm:$0xff] }
 0x492   : > { %v3105_v27 = vadd.f32 %v2821_v42, %v8381_v57 }
 0x493   : > { %v3214_v4 = vadd.f32 %v8918_v46, %v3096_v0  ;;  %v7296_v0 = vld [vmem:[%s7606_s27 + $0x90] sm:$0xff]  ;;  %v3219_v15 = vadd.f32 %v8911_v18, %v3101_v52 }
 0x494   : > { %6277 = vmatmul.msk.bf16.gmra.mxu0 %vm975_vm0, %v7295_v48 }
 0x495   : > { %v3326_v45 = vmax.f32 %v3214_v4, 0.0  ;;  %v3331_v54 = vmax.f32 %v3219_v15, 0.0 }
 0x497   : > { %v3432_v31 = vmax.f32 %v3325_v41, %v3326_v45 }
 0x498   : > { %v2960_v38 = vpop.f32.mrf.mxu1 }
 0x499   : > { %v3098_v14 = vadd.f32 %v2960_v38, %v8366_v47  ;;  %v2823_v44 = vpop.f32.mrf.mxu0 }
 0x49b   : > { %v3216_v60 = vadd.f32 %v8918_v46, %v3098_v14  ;;  %6303 = vmatmul.msk.bf16.gmra.mxu1 %vm975_vm0, %v8930_v2 }
 0x49d   : > { %v3328_v55 = vmax.f32 %v3216_v60, 0.0 }
 0x49f   : > { %v3433_v10 = vmax.f32 %v3327_v24, %v3328_v55 }
 0x4a0   : > { %v2962_v16 = vpop.f32.mrf.mxu1 }
 0x4a1   : > { %v3485_v36 = vmax.f32 %v3431_v51, %v3433_v10  ;;  %v3100_v28 = vadd.f32 %v2962_v16, %v8374_v63  ;;  %v2826_v34 = vpop.f32.mrf.mxu0 }
 0x4a3   : > { %v3218_v47 = vadd.f32 %v8918_v46, %v3100_v28  ;;  %v3513_v41 = vpack.c.bf16 %v3485_v36, %v3485_v36 }
 0x4a4   : > { %6278 = vmatmul.msk.bf16.gmra.mxu0 %vm975_vm0, %v7296_v0 }
 0x4a5   : > { %v3330_v2 = vmax.f32 %v3218_v47, 0.0  ;;  %v3592_v35 = vunpack.c.l.b16 %v3513_v41  ;;  %v3223_v47 = vadd.f32 %v8911_v18, %v3105_v27 }
 0x4a7   : > { %v3434_v21 = vmax.f32 %v3329_v40, %v3330_v2  ;;  %v3335_v2 = vmax.f32 %v3223_v47, 0.0 }
 0x4a8   : > { %v2965_v4 = vpop.f32.mrf.mxu1 }
 0x4a9   : > { %v3486_v1 = vmax.f32 %v3432_v31, %v3434_v21  ;;  %v3102_v51 = vadd.f32 %v2965_v4, %v8383_v9  ;;  %v2828_v38 = vpop.f32.mrf.mxu0  ;;  %v3221_v9 = vadd.f32 %v8911_v18, %v3103_v33  ;;  %v3107_v21 = vadd.f32 %v2823_v44, %v8401_v17  ;;  %v7298_v33 = vld [vmem:[%s7606_s27 + $0xa0] sm:$0xff] }
 0x4ab   : > { %v3514_v63 = vpack.c.bf16 %v3486_v1, %v3486_v1  ;;  %v3220_v45 = vadd.f32 %v8918_v46, %v3102_v51  ;;  %6304 = vmatmul.msk.bf16.gmra.mxu1 %vm975_vm0, %v8959_v61  ;;  %v3333_v59 = vmax.f32 %v3221_v9, 0.0  ;;  %v3225_v4 = vadd.f32 %v8911_v18, %v3107_v21 }
 0x4ad   : > { %v3593_v14 = vunpack.c.l.b16 %v3514_v63  ;;  %v3332_v60 = vmax.f32 %v3220_v45, 0.0  ;;  %v3109_v63 = vadd.f32 %v2826_v34, %v8410_v29  ;;  %v3337_v45 = vmax.f32 %v3225_v4, 0.0 }
 0x4ae   : > { %v3111_v34 = vadd.f32 %v2828_v38, %v8418_v50 }
 0x4af   : > { %v9022_v24 = vpack.c.b16 %v3593_v14, %v3592_v35  ;;  %v3435_v37 = vmax.f32 %v3331_v54, %v3332_v60  ;;  %v3227_v17 = vadd.f32 %v8911_v18, %v3109_v63 }
 0x4b0   : > { %v2967_v31 = vpop.f32.mrf.mxu1 }
 0x4b1   : > { %v3104_v55 = vadd.f32 %v2967_v31, %v8403_v13  ;;  %3720 = vmatmul.bf16.vlgmr.msra.gmra.mxu2 %v9022_v24  ;;  %3779 = vmatmul.bf16.vlgmr.msra.gmra.mxu3 %v9022_v24  ;;  %v2831_v10 = vpop.f32.mrf.mxu0  ;;  %v3339_v29 = vmax.f32 %v3227_v17, 0.0 }
 0x4b2   : > { %v3113_v38 = vadd.f32 %v2831_v10, %v8427_v56 }
 0x4b3   : > { %v3222_v61 = vadd.f32 %v8918_v46, %v3104_v55 }
 0x4b4   : > { %6279 = vmatmul.msk.bf16.gmra.mxu0 %vm975_vm0, %v7297_v5  ;;  %v3231_v21 = vadd.f32 %v8911_v18, %v3113_v38 }
 0x4b5   : > { %v3334_v16 = vmax.f32 %v3222_v61, 0.0 }
 0x4b7   : > { %v3436_v36 = vmax.f32 %v3333_v59, %v3334_v16 }
 0x4b8   : > { %v2970_v28 = vpop.f32.mrf.mxu1 }
 0x4b9   : > { %v3106_v13 = vadd.f32 %v2970_v28, %v8412_v20  ;;  %v2833_v40 = vpop.f32.mrf.mxu0 }
 0x4ba   : > { %v3115_v4 = vadd.f32 %v2833_v40, %v8435_v8 }
 0x4bb   : > { %v3224_v52 = vadd.f32 %v8918_v46, %v3106_v13  ;;  %6305 = vmatmul.msk.bf16.gmra.mxu1 %vm975_vm0, %v7295_v48  ;;  %v7299_v13 = vld [vmem:[%s7606_s27 + $0xa8] sm:$0xff] }
 0x4bd   : > { %v3336_v57 = vmax.f32 %v3224_v52, 0.0 }
 0x4bf   : > { %v3437_v42 = vmax.f32 %v3335_v2, %v3336_v57 }
 0x4c0   : > { %v2972_v15 = vpop.f32.mrf.mxu1 }
 0x4c1   : > { %v3487_v41 = vmax.f32 %v3435_v37, %v3437_v42  ;;  %v3108_v1 = vadd.f32 %v2972_v15, %v8420_v43  ;;  %v2836_v20 = vpop.f32.mrf.mxu0  ;;  %v3343_v15 = vmax.f32 %v3231_v21, 0.0 }
 0x4c3   : > { %v3226_v51 = vadd.f32 %v8918_v46, %v3108_v1  ;;  %v3515_v35 = vpack.c.bf16 %v3487_v41, %v3487_v41  ;;  %v3233_v1 = vadd.f32 %v8911_v18, %v3115_v4 }
 0x4c4   : > { %6280 = vmatmul.msk.bf16.gmra.mxu0 %vm975_vm0, %v7298_v33 }
 0x4c5   : > { %v3338_v54 = vmax.f32 %v3226_v51, 0.0  ;;  %v3594_v9 = vunpack.c.l.b16 %v3515_v35 }
 0x4c7   : > { %v3438_v48 = vmax.f32 %v3337_v45, %v3338_v54  ;;  %v3117_v54 = vadd.f32 %v2836_v20, %v8444_v19  ;;  %v10751_v20 = vld [vmem:[#allocation73_spill] sm:$0xff] }
 0x4c8   : > { %v2975_v44 = vpop.f32.mrf.mxu1 }
 0x4c9   : > { %v3488_v14 = vmax.f32 %v3436_v36, %v3438_v48  ;;  %v3110_v60 = vadd.f32 %v2975_v44, %v8429_v12  ;;  %v2838_v31 = vpop.f32.mrf.mxu0  ;;  %v3229_v36 = vadd.f32 %v8911_v18, %v3111_v34  ;;  %v3345_v48 = vmax.f32 %v3233_v1, 0.0  ;;  %v7300_v44 = vld [vmem:[%s7606_s27 + $0xb0] sm:$0xff] }
 0x4ca   : > { %v3235_v8 = vadd.f32 %v8911_v18, %v3117_v54  ;;  %v10755_v54 = vld [vmem:[#allocation6_spill] sm:$0xff] }
 0x4cb   : > { %v3516_v37 = vpack.c.bf16 %v3488_v14, %v3488_v14  ;;  %v3228_v43 = vadd.f32 %v8918_v46, %v3110_v60  ;;  %6306 = vmatmul.msk.bf16.gmra.mxu1 %vm975_vm0, %v7296_v0  ;;  %v3341_v50 = vmax.f32 %v3229_v36, 0.0 }
 0x4cc   : > { %v3347_v19 = vmax.f32 %v3235_v8, 0.0 }
 0x4cd   : > { %v3595_v55 = vunpack.c.l.b16 %v3516_v37  ;;  %v3340_v61 = vmax.f32 %v3228_v43, 0.0 }
 0x4cf   : > { %v9048_v59 = vpack.c.b16 %v3595_v55, %v3594_v9  ;;  %v3439_v27 = vmax.f32 %v3339_v29, %v3340_v61  ;;  %v3119_v29 = vadd.f32 %v2838_v31, %v10751_v20 }
 0x4d0   : > { %v2977_v16 = vpop.f32.mrf.mxu1 }
 0x4d1   : > { %v3112_v12 = vadd.f32 %v2977_v16, %v8437_v7  ;;  %3725 = vmatmul.bf16.gmra.mxu2 %v9048_v59  ;;  %3784 = vmatmul.bf16.gmra.mxu3 %v9048_v59  ;;  %v2841_v28 = vpop.f32.mrf.mxu0  ;;  %v3237_v36 = vadd.f32 %v8911_v18, %v3119_v29 }
 0x4d3   : > { %v3230_v0 = vadd.f32 %v8918_v46, %v3112_v12  ;;  %v3349_v31 = vmax.f32 %v3237_v36, 0.0 }
 0x4d4   : > { %6281 = vmatmul.msk.bf16.gmra.mxu0 %vm975_vm0, %v7299_v13 }
 0x4d5   : > { %v3342_v47 = vmax.f32 %v3230_v0, 0.0 }
 0x4d7   : > { %v3440_v52 = vmax.f32 %v3341_v50, %v3342_v47  ;;  %v10753_v50 = vld [vmem:[#allocation74_spill] sm:$0xff] }
 0x4d8   : > { %v2980_v2 = vpop.f32.mrf.mxu1  ;;  %v3121_v38 = vadd.f32 %v2841_v28, %v10753_v50 }
 0x4d9   : > { %v3114_v7 = vadd.f32 %v2980_v2, %v8446_v11  ;;  %v2843_v42 = vpop.f32.mrf.mxu0 }
 0x4db   : > { %v3232_v57 = vadd.f32 %v8918_v46, %v3114_v7  ;;  %6307 = vmatmul.msk.bf16.gmra.mxu1 %vm975_vm0, %v7297_v5  ;;  %v3239_v7 = vadd.f32 %v8911_v18, %v3121_v38  ;;  %v10759_v38 = vld [vmem:[#allocation8_spill] sm:$0xff] }
 0x4dd   : > { %v3344_v56 = vmax.f32 %v3232_v57, 0.0 }
 0x4df   : > { %v3441_v10 = vmax.f32 %v3343_v15, %v3344_v56  ;;  %v3351_v56 = vmax.f32 %v3239_v7, 0.0 }
 0x4e0   : > { %v2982_v41 = vpop.f32.mrf.mxu1 }
 0x4e1   : > { %v3489_v51 = vmax.f32 %v3439_v27, %v3441_v10  ;;  %v3116_v63 = vadd.f32 %v2982_v41, %v8454_v30  ;;  %v2846_v11 = vpop.f32.mrf.mxu0  ;;  %v10754_v10 = vld [vmem:[#allocation75_spill] sm:$0xff] }
 0x4e2   : > { %v3123_v41 = vadd.f32 %v2843_v42, %v10754_v10 }
 0x4e3   : > { %v3234_v45 = vadd.f32 %v8918_v46, %v3116_v63  ;;  %v3517_v35 = vpack.c.bf16 %v3489_v51, %v3489_v51 }
 0x4e4   : > { %6282 = vmatmul.msk.bf16.gmra.mxu0 %vm975_vm0, %v7300_v44  ;;  %v3241_v63 = vadd.f32 %v8911_v18, %v3123_v41 }
 0x4e5   : > { %v3346_v17 = vmax.f32 %v3234_v45, 0.0  ;;  %v3596_v34 = vunpack.c.l.b16 %v3517_v35 }
 0x4e7   : > { %v3442_v5 = vmax.f32 %v3345_v48, %v3346_v17 }
 0x4e8   : > { %v2985_v40 = vpop.f32.mrf.mxu1 }
 0x4e9   : > { %v3490_v14 = vmax.f32 %v3440_v52, %v3442_v5  ;;  %v3118_v60 = vadd.f32 %v2985_v40, %v8463_v32  ;;  %v2848_v43 = vpop.f32.mrf.mxu0  ;;  %v10752_v32 = vld [vmem:[#allocation76_spill] sm:$0xff]  ;;  %v7301_v52 = vld [vmem:[%s7606_s27 + $0xb8] sm:$0xff]  ;;  %v10756_v5 = vld [vmem:[#allocation5_spill] sm:$0xff]  ;;  %v3353_v40 = vmax.f32 %v3241_v63, 0.0 }
 0x4ea   : > { %v3125_v8 = vadd.f32 %v2846_v11, %v10756_v5 }
 0x4eb   : > { %v3518_v37 = vpack.c.bf16 %v3490_v14, %v3490_v14  ;;  %v3236_v30 = vadd.f32 %v8918_v46, %v3118_v60  ;;  %6308 = vmatmul.msk.bf16.gmra.mxu1 %vm975_vm0, %v7298_v33  ;;  %v7302_v14 = vld [vmem:[%s7606_s27 + $0xc0] sm:$0xff] }
 0x4ec   : > { %v3243_v42 = vadd.f32 %v8911_v18, %v3125_v8 }
 0x4ed   : > { %v3597_v9 = vunpack.c.l.b16 %v3518_v37  ;;  %v3348_v55 = vmax.f32 %v3236_v30, 0.0 }
 0x4ee   : > { %v3355_v11 = vmax.f32 %v3243_v42, 0.0 }
 0x4ef   : > { %v9074_v61 = vpack.c.b16 %v3597_v9, %v3596_v34  ;;  %v3443_v27 = vmax.f32 %v3347_v19, %v3348_v55  ;;  %v10757_v19 = vld [vmem:[#allocation7_spill] sm:$0xff]  ;;  %v10758_v55 = vld [vmem:[#allocation9_spill] sm:$0xff] }
 0x4f0   : > { %v2987_v16 = vpop.f32.mrf.mxu1 }
 0x4f1   : > { %v3120_v12 = vadd.f32 %v2987_v16, %v10752_v32  ;;  %3730 = vmatmul.bf16.gmra.mxu2 %v9074_v61  ;;  %3789 = vmatmul.bf16.gmra.mxu3 %v9074_v61  ;;  %v2851_v0 = vpop.f32.mrf.mxu0 }
 0x4f3   : > { %v3238_v33 = vadd.f32 %v8918_v46, %v3120_v12 }
 0x4f4   : > { %6283 = vmatmul.msk.bf16.gmra.mxu0 %vm975_vm0, %v7301_v52 }
 0x4f5   : > { %v3350_v47 = vmax.f32 %v3238_v33, 0.0 }
 0x4f7   : > { %v3444_v2 = vmax.f32 %v3349_v31, %v3350_v47 }
 0x4f8   : > { %v2990_v21 = vpop.f32.mrf.mxu1 }
 0x4f9   : > { %v3122_v57 = vadd.f32 %v2990_v21, %v8492_v6  ;;  %v2853_v4 = vpop.f32.mrf.mxu0  ;;  %v10760_v21 = vld [vmem:[#allocation11_spill] sm:$0xff] }
 0x4fa   : > { %v3129_v7 = vadd.f32 %v2851_v0, %v10760_v21  ;;  %v7102_v21 = vld [vmem:[%s10505_s3 + $0x74] sm:$0xf0] }
 0x4fb   : > { %v3240_v15 = vadd.f32 %v8918_v46, %v3122_v57  ;;  %6309 = vmatmul.msk.bf16.gmra.mxu1 %vm975_vm0, %v7299_v13 }
 0x4fc   : > { %v3247_v41 = vadd.f32 %v8911_v18, %v3129_v7 }
 0x4fd   : > { %v3352_v28 = vmax.f32 %v3240_v15, 0.0  ;;  %v9109_v15 = vld [vmem:[%s7606_s27 + $0xc8] sm:$0xff] }
 0x4fe   : > { %v3359_v0 = vmax.f32 %v3247_v41, 0.0 }
 0x4ff   : > { %v3445_v1 = vmax.f32 %v3351_v56, %v3352_v28  ;;  %v10761_v28 = vld [vmem:[#allocation10_spill] sm:$0xff] }
 0x500   : > { %v2992_v51 = vpop.f32.mrf.mxu1 }
 0x501   : > { %v3491_v45 = vmax.f32 %v3443_v27, %v3445_v1  ;;  %v3124_v48 = vadd.f32 %v2992_v51, %v10755_v54  ;;  %v2856_v6 = vpop.f32.mrf.mxu0  ;;  %v3127_v27 = vadd.f32 %v2848_v43, %v10758_v55 }
 0x503   : > { %v3242_v17 = vadd.f32 %v8918_v46, %v3124_v48  ;;  %v3519_v37 = vpack.c.bf16 %v3491_v45, %v3491_v45  ;;  %v3245_v50 = vadd.f32 %v8911_v18, %v3127_v27  ;;  %v10762_v45 = vld [vmem:[#allocation13_spill] sm:$0xff] }
 0x504   : > { %6284 = vmatmul.msk.bf16.gmra.mxu0 %vm975_vm0, %v7302_v14  ;;  %v3131_v54 = vadd.f32 %v2853_v4, %v10762_v45  ;;  %v10767_v45 = vld [vmem:[#allocation19_spill] sm:$0xff] }
 0x505   : > { %v3354_v35 = vmax.f32 %v3242_v17, 0.0  ;;  %v3598_v16 = vunpack.c.l.b16 %v3519_v37  ;;  %v3357_v43 = vmax.f32 %v3245_v50, 0.0  ;;  %v10764_v37 = vld [vmem:[#allocation15_spill] sm:$0xff] }
 0x506   : > { %v3249_v8 = vadd.f32 %v8911_v18, %v3131_v54 }
 0x507   : > { %v3446_v13 = vmax.f32 %v3353_v40, %v3354_v35  ;;  %v10763_v35 = vld [vmem:[#allocation12_spill] sm:$0xff] }
 0x508   : > { %v2995_v60 = vpop.f32.mrf.mxu1 }
 0x509   : > { %v3492_v30 = vmax.f32 %v3444_v2, %v3446_v13  ;;  %v3126_v20 = vadd.f32 %v2995_v60, %v10757_v19  ;;  %v2858_v9 = vpop.f32.mrf.mxu0  ;;  %v3361_v19 = vmax.f32 %v3249_v8, 0.0 }
 0x50b   : > { %v3520_v29 = vpack.c.bf16 %v3492_v30, %v3492_v30  ;;  %v3244_v34 = vadd.f32 %v8918_v46, %v3126_v20  ;;  %6310 = vmatmul.msk.bf16.gmra.mxu1 %vm975_vm0, %v7300_v44  ;;  %v3133_v30 = vadd.f32 %v2856_v6, %v10764_v37  ;;  %v7099_v37 = vld [vmem:[%s10505_s3 + $0x64] sm:$0xf] }
 0x50d   : > { %v3599_v36 = vunpack.c.l.b16 %v3520_v29  ;;  %v3356_v32 = vmax.f32 %v3244_v34, 0.0  ;;  %v3251_v29 = vadd.f32 %v8911_v18, %v3133_v30  ;;  %v6452_v30 = vld [vmem:[%s10505_s3 + $0x68] sm:$0xf0] }
 0x50f   : > { %v9100_v12 = vpack.c.b16 %v3599_v36, %v3598_v16  ;;  %v3447_v33 = vmax.f32 %v3355_v11, %v3356_v32  ;;  %v3363_v6 = vmax.f32 %v3251_v29, 0.0  ;;  %v10768_v29 = vld [vmem:[#allocation14_spill] sm:$0xff] }
 0x510   : > { %v2997_v31 = vpop.f32.mrf.mxu1 }
 0x511   : > { %v3128_v47 = vadd.f32 %v2997_v31, %v10759_v38  ;;  %3735 = vmatmul.bf16.gmra.mxu2 %v9100_v12  ;;  %3794 = vmatmul.bf16.gmra.mxu3 %v9100_v12  ;;  %v2861_v2 = vpop.f32.mrf.mxu0 }
 0x512   : > { %v3137_v54 = vadd.f32 %v2861_v2, %v10767_v45 }
 0x513   : > { %v3246_v44 = vadd.f32 %v8918_v46, %v3128_v47 }
 0x514   : > { %6285 = vmatmul.msk.bf16.gmra.mxu0 %vm975_vm0, %v9109_v15 }
 0x515   : > { %v3358_v57 = vmax.f32 %v3246_v44, 0.0 }
 0x517   : > { %v3448_v56 = vmax.f32 %v3357_v43, %v3358_v57  ;;  %v6460_v57 = vld [vmem:[%s10505_s3 + $0x78] sm:$0xf0] }
 0x518   : > { %v3000_v10 = vpop.f32.mrf.mxu1 }
 0x519   : > { %v3130_v1 = vadd.f32 %v3000_v10, %v10761_v28  ;;  %v9116_v63 = vpop.f32.mrf.mxu0  ;;  %v10766_v10 = vld [vmem:[#allocation21_spill] sm:$0xff] }
 0x51b   : > { %v3248_v51 = vadd.f32 %v8918_v46, %v3130_v1  ;;  %6311 = vmatmul.msk.bf16.gmra.mxu1 %vm975_vm0, %v7301_v52  ;;  %v9127_v52 = vld [vmem:[%s7606_s27 + $0xd0] sm:$0xff] }
 0x51d   : > { %v3360_v48 = vmax.f32 %v3248_v51, 0.0 }
 0x51f   : > { %v3449_v17 = vmax.f32 %v3359_v0, %v3360_v48 }
 0x520   : > { %v3002_v5 = vpop.f32.mrf.mxu1 }
 0x521   : > { %v3493_v40 = vmax.f32 %v3447_v33, %v3449_v17  ;;  %v3132_v13 = vadd.f32 %v3002_v5, %v10763_v35  ;;  %v9123_v60 = vpop.f32.mrf.mxu0  ;;  %v10765_v33 = vld [vmem:[#allocation17_spill] sm:$0xff]  ;;  %v9161_v17 = vld [vmem:[%s7606_s27 + $0xd8] sm:$0xff]  ;;  %v7100_v35 = vld [vmem:[%s10505_s3 + $0x64] sm:$0xf0] }
 0x522   : > { %v3135_v31 = vadd.f32 %v2858_v9, %v10765_v33 }
 0x523   : > { %v3250_v42 = vadd.f32 %v8918_v46, %v3132_v13  ;;  %v3521_v11 = vpack.c.bf16 %v3493_v40, %v3493_v40  ;;  %v6450_v40 = vld [vmem:[%s10505_s3 + $0x60] sm:$0xf]  ;;  %v3255_v13 = vadd.f32 %v8911_v18, %v3137_v54 }
 0x524   : > { %6286 = vmatmul.msk.bf16.gmra.mxu0 %vm975_vm0, %v9127_v52 }
 0x525   : > { %v3362_v20 = vmax.f32 %v3250_v42, 0.0  ;;  %v3600_v50 = vunpack.c.l.b16 %v3521_v11  ;;  %v6451_v42 = vor.u32 %v7100_v35, %v6450_v40 }
 0x527   : > { %v3450_v4 = vmax.f32 %v3361_v19, %v3362_v20  ;;  %v6455_v19 = vor.u32 %v7099_v37, %v6452_v30  ;;  %v7146_v37 = vld [vmem:[%s10505_s3 + $0x1d4] sm:$0xf0] }
 0x528   : > { %v3005_v34 = vpop.f32.mrf.mxu1 }
 0x529   : > { %v3494_v55 = vmax.f32 %v3448_v56, %v3450_v4  ;;  %v3134_v27 = vadd.f32 %v3005_v34, %v8555_v3  ;;  %v9134_v32 = vpop.f32.mrf.mxu0  ;;  %v6458_v3 = vld [vmem:[%s10505_s3 + $0x70] sm:$0xf]  ;;  %v3253_v56 = vadd.f32 %v8911_v18, %v3135_v31  ;;  %v3139_v34 = vadd.f32 %v9116_v63, %v10768_v29 }
 0x52a   : > { %v6459_v7 = vor.u32 %v7102_v21, %v6458_v3  ;;  %v6618_v63 = vld [vmem:[%s10505_s3 + $0x1f0] sm:$0xf]  ;;  %v7150_v21 = vld [vmem:[%s10505_s3 + $0x1f4] sm:$0xf0] }
 0x52b   : > { %v3522_v16 = vpack.c.bf16 %v3494_v55, %v3494_v55  ;;  %v3252_v36 = vadd.f32 %v8918_v46, %v3134_v27  ;;  %6312 = vmatmul.msk.bf16.gmra.mxu1 %vm975_vm0, %v7302_v14  ;;  %v7101_v14 = vld [vmem:[%s10505_s3 + $0x74] sm:$0xf]  ;;  %v3365_v0 = vmax.f32 %v3253_v56, 0.0 }
 0x52c   : > { %v6463_v28 = vor.u32 %v7101_v14, %v6460_v57  ;;  %3916 = vmatpush.bf16.msrb.mxu2 %v6459_v7  ;;  %v6619_v14 = vor.u32 %v7150_v21, %v6618_v63  ;;  %v10773_v63 = vld [vmem:[#allocation20_spill] sm:$0xff] }
 0x52d   : > { %v3601_v38 = vunpack.c.l.b16 %v3522_v16  ;;  %v3364_v47 = vmax.f32 %v3252_v36, 0.0  ;;  %v3257_v16 = vadd.f32 %v8911_v18, %v3139_v34 }
 0x52e   : > { %3975 = vmatpush.bf16.msrb.mxu3 %v6463_v28  ;;  %4398 = vmatpush.bf16.msrb.mxu0 %v6619_v14  ;;  %v6610_v28 = vld [vmem:[%s10505_s3 + $0x1e0] sm:$0xf] }
 0x52f   : > { %v9138_v44 = vpack.c.b16 %v3601_v38, %v3600_v50  ;;  %v3451_v43 = vmax.f32 %v3363_v6, %v3364_v47  ;;  %v10769_v6 = vld [vmem:[#allocation24_spill] sm:$0xff]  ;;  %v3369_v47 = vmax.f32 %v3257_v16, 0.0 }
 0x530   : > { %v3007_v9 = vpop.f32.mrf.mxu1  ;;  %3917 = vmatpush.bf16.msrb.mxu2 %v6451_v42  ;;  %v6602_v42 = vld [vmem:[%s10505_s3 + $0x1d0] sm:$0xf] }
 0x531   : > { %v3136_v41 = vadd.f32 %v3007_v9, %v10766_v10  ;;  %3740 = vmatmul.bf16.gmra.mxu2 %v9138_v44  ;;  %3799 = vmatmul.bf16.gmra.mxu3 %v9138_v44  ;;  %v9157_v51 = vpop.f32.mrf.mxu0  ;;  %v10771_v10 = vld [vmem:[#allocation26_spill] sm:$0xff]  ;;  %v6603_v30 = vor.u32 %v7146_v37, %v6602_v42 }
 0x532   : > { %3976 = vmatpush.bf16.msrb.mxu3 %v6455_v19  ;;  %v3145_v21 = vadd.f32 %v9157_v51, %v10773_v63 }
 0x533   : > { %v3254_v1 = vadd.f32 %v8918_v46, %v3136_v41 }
 0x534   : > { %6287 = vmatmul.msk.bf16.gmra.mxu0 %vm975_vm0, %v9161_v17  ;;  %v3263_v51 = vadd.f32 %v8911_v18, %v3145_v21  ;;  %v10776_v21 = vld [vmem:[#allocation29_spill] sm:$0xff] }
 0x535   : > { %v3366_v48 = vmax.f32 %v3254_v1, 0.0  ;;  %v7148_v1 = vld [vmem:[%s10505_s3 + $0x1e4] sm:$0xf0] }
 0x537   : > { %v3452_v5 = vmax.f32 %v3365_v0, %v3366_v48  ;;  %v6611_v0 = vor.u32 %v7148_v1, %v6610_v28  ;;  %v6578_v28 = vld [vmem:[%s10505_s3 + $0x1a0] sm:$0xf]  ;;  %v7140_v1 = vld [vmem:[%s10505_s3 + $0x1a4] sm:$0xf0] }
 0x538   : > { %v3010_v8 = vpop.f32.mrf.mxu1 }
 0x539   : > { %v3138_v2 = vadd.f32 %v3010_v8, %v8572_v53  ;;  %v9180_v4 = vpop.f32.mrf.mxu0  ;;  %v3367_v53 = vmax.f32 %v3255_v13, 0.0  ;;  %4399 = vmatpush.bf16.msrb.mxu0 %v6611_v0  ;;  %v10772_v8 = vld [vmem:[#allocation18_spill] sm:$0xff]  ;;  %v6579_v0 = vor.u32 %v7140_v1, %v6578_v28 }
 0x53a   : > { %v3143_v40 = vadd.f32 %v9134_v32, %v10772_v8  ;;  %v6620_v32 = vld [vmem:[%s10505_s3 + $0x1f8] sm:$0xf0] }
 0x53b   : > { %v3256_v20 = vadd.f32 %v8918_v46, %v3138_v2  ;;  %6313 = vmatmul.msk.bf16.gmra.mxu1 %vm975_vm0, %v9109_v15  ;;  %v10770_v15 = vld [vmem:[#allocation16_spill] sm:$0xff] }
 0x53c   : > { %v3141_v38 = vadd.f32 %v9123_v60, %v10770_v15 }
 0x53d   : > { %v3368_v11 = vmax.f32 %v3256_v20, 0.0  ;;  %v7149_v20 = vld [vmem:[%s10505_s3 + $0x1f4] sm:$0xf]  ;;  %4400 = vmatpush.bf16.msrb.mxu0 %v6603_v30 }
 0x53e   : > { %v3259_v7 = vadd.f32 %v8911_v18, %v3141_v38  ;;  %v6623_v34 = vor.u32 %v7149_v20, %v6620_v32  ;;  %v10774_v30 = vld [vmem:[#allocation25_spill] sm:$0xff] }
 0x53f   : > { %v3453_v55 = vmax.f32 %v3367_v53, %v3368_v11  ;;  %v6442_v53 = vld [vmem:[%s10505_s3 + $0x50] sm:$0xf]  ;;  %v7098_v11 = vld [vmem:[%s10505_s3 + $0x54] sm:$0xf0] }
 0x540   : > { %v3012_v27 = vpop.f32.mrf.mxu1  ;;  %4457 = vmatpush.bf16.msra.mxu1 %v6623_v34  ;;  %v10775_v34 = vld [vmem:[#allocation28_spill] sm:$0xff] }
 0x541   : > { %v3495_v36 = vmax.f32 %v3451_v43, %v3453_v55  ;;  %v3140_v33 = vadd.f32 %v3012_v27, %v10769_v6  ;;  %v9189_v50 = vpop.f32.mrf.mxu0  ;;  %v9200_v43 = vld [vmem:[%s7606_s27 + $0xe0] sm:$0xff]  ;;  %v7097_v55 = vld [vmem:[%s10505_s3 + $0x54] sm:$0xf]  ;;  %v3261_v27 = vadd.f32 %v8911_v18, %v3143_v40  ;;  %v6444_v6 = vld [vmem:[%s10505_s3 + $0x58] sm:$0xf0] }
 0x542   : > { %v6570_v40 = vld [vmem:[%s10505_s3 + $0x190] sm:$0xf] }
 0x543   : > { %v3258_v31 = vadd.f32 %v8918_v46, %v3140_v33  ;;  %v3523_v57 = vpack.c.bf16 %v3495_v36, %v3495_v36  ;;  %v6443_v36 = vor.u32 %v7098_v11, %v6442_v53  ;;  %v6594_v33 = vld [vmem:[%s10505_s3 + $0x1c0] sm:$0xf]  ;;  %v3149_v11 = vadd.f32 %v9189_v50, %v10775_v34  ;;  %v7095_v50 = vld [vmem:[%s10505_s3 + $0x44] sm:$0xf] }
 0x544   : > { %6288 = vmatmul.msk.bf16.gmra.mxu0 %vm975_vm0, %v9200_v43  ;;  %v10781_v34 = vld [vmem:[#allocation27_spill] sm:$0xff] }
 0x545   : > { %v3370_v3 = vmax.f32 %v3258_v31, 0.0  ;;  %v3602_v35 = vunpack.c.l.b16 %v3523_v57  ;;  %v7144_v31 = vld [vmem:[%s10505_s3 + $0x1c4] sm:$0xf0]  ;;  %3918 = vmatpush.bf16.msrb.mxu2 %v6443_v36  ;;  %v9312_v36 = vld [vmem:[%s7606_s27 + $0xf0] sm:$0xff] }
 0x546   : > { %v6595_v15 = vor.u32 %v7144_v31, %v6594_v33  ;;  %v6436_v33 = vld [vmem:[%s10505_s3 + $0x48] sm:$0xf0] }
 0x547   : > { %v3454_v9 = vmax.f32 %v3369_v47, %v3370_v3  ;;  %v3373_v3 = vmax.f32 %v3261_v27, 0.0  ;;  %v6434_v27 = vld [vmem:[%s10505_s3 + $0x40] sm:$0xf] }
 0x548   : > { %v3015_v60 = vpop.f32.mrf.mxu1  ;;  %4401 = vmatpush.bf16.msrb.mxu0 %v6595_v15  ;;  %v3267_v15 = vadd.f32 %v8911_v18, %v3149_v11 }
 0x549   : > { %v3496_v56 = vmax.f32 %v3452_v5, %v3454_v9  ;;  %v3142_v41 = vadd.f32 %v3015_v60, %v10771_v10  ;;  %v9213_v48 = vpop.f32.mrf.mxu0  ;;  %v3371_v5 = vmax.f32 %v3259_v7, 0.0  ;;  %v6586_v9 = vld [vmem:[%s10505_s3 + $0x1b0] sm:$0xf]  ;;  %v7142_v7 = vld [vmem:[%s10505_s3 + $0x1b4] sm:$0xf0]  ;;  %v9267_v60 = vld [vmem:[%s7606_s27 + $0xe8] sm:$0xff] }
 0x54a   : > { %v6587_v57 = vor.u32 %v7142_v7, %v6586_v9  ;;  %v10777_v9 = vld [vmem:[#allocation22_spill] sm:$0xff]  ;;  %v3379_v28 = vmax.f32 %v3267_v15, 0.0 }
 0x54b   : > { %v3524_v45 = vpack.c.bf16 %v3496_v56, %v3496_v56  ;;  %v3260_v54 = vadd.f32 %v8918_v46, %v3142_v41  ;;  %6314 = vmatmul.msk.bf16.gmra.mxu1 %vm975_vm0, %v9127_v52  ;;  %v10778_v7 = vld [vmem:[#allocation30_spill] sm:$0xff] }
 0x54c   : > { %4402 = vmatpush.bf16.msrb.mxu0 %v6587_v57  ;;  %v2660_v57 = vadd.f32 %v10778_v7, %v10777_v9  ;;  %v6428_v15 = vld [vmem:[%s10505_s3 + $0x38] sm:$0xf0]  ;;  %v10782_v9 = vld [vmem:[#allocation23_spill] sm:$0xff]  ;;  %v10783_v7 = vld [vmem:[#allocation77_spill] sm:$0xff] }
 0x54d   : > { %v3603_v13 = vunpack.c.l.b16 %v3524_v45  ;;  %v3372_v2 = vmax.f32 %v3260_v54, 0.0 }
 0x54e   : > { %v3151_v1 = vadd.f32 %v9213_v48, %v2660_v57  ;;  %v2664_v57 = vadd.f32 %v10783_v7, %v10782_v9 }
 0x54f   : > { %v9225_v19 = vpack.c.b16 %v3603_v13, %v3602_v35  ;;  %v3455_v52 = vmax.f32 %v3371_v5, %v3372_v2  ;;  %v3375_v5 = vmax.f32 %v3263_v51, 0.0  ;;  %v7138_v35 = vld [vmem:[%s10505_s3 + $0x194] sm:$0xf0] }
 0x550   : > { %v3017_v29 = vpop.f32.mrf.mxu1  ;;  %4403 = vmatpush.bf16.msrb.mxu0 %v6579_v0  ;;  %v6571_v13 = vor.u32 %v7138_v35, %v6570_v40  ;;  %v10780_v40 = vld [vmem:[#allocation32_spill] sm:$0xff]  ;;  %v3269_v48 = vadd.f32 %v8911_v18, %v3151_v1 }
 0x551   : > { %v3144_v16 = vadd.f32 %v3017_v29, %v8611_v25  ;;  %3745 = vmatmul.bf16.gmra.mxu2 %v9225_v19  ;;  %3804 = vmatmul.bf16.gmra.mxu3 %v9225_v19  ;;  %v6447_v25 = vor.u32 %v7097_v55, %v6444_v6  ;;  %v9256_v47 = vpop.f32.mrf.mxu0 }
 0x552   : > { %v3153_v11 = vadd.f32 %v9256_v47, %v10781_v34  ;;  %v7094_v47 = vld [vmem:[%s10505_s3 + $0x34] sm:$0xf0]  ;;  %v6564_v34 = vld [vmem:[%s10505_s3 + $0x188] sm:$0xf0] }
 0x553   : > { %v3262_v38 = vadd.f32 %v8918_v46, %v3144_v16  ;;  %3977 = vmatpush.bf16.msrb.mxu3 %v6447_v25  ;;  %v7096_v16 = vld [vmem:[%s10505_s3 + $0x44] sm:$0xf0]  ;;  %v6439_v25 = vor.u32 %v7095_v50, %v6436_v33  ;;  %v7093_v50 = vld [vmem:[%s10505_s3 + $0x34] sm:$0xf] }
 0x554   : > { %6289 = vmatmul.msk.bf16.gmra.mxu0 %vm975_vm0, %v9267_v60  ;;  %v6435_v6 = vor.u32 %v7096_v16, %v6434_v27  ;;  %v6596_v27 = vld [vmem:[%s10505_s3 + $0x1c8] sm:$0xf0] }
 0x555   : > { %v3374_v14 = vmax.f32 %v3262_v38, 0.0  ;;  %4404 = vmatpush.bf16.msrb.mxu0 %v6571_v13 }
 0x556   : > { %3919 = vmatpush.bf16.msrb.mxu2 %v6435_v6  ;;  %v6426_v6 = vld [vmem:[%s10505_s3 + $0x30] sm:$0xf] }
 0x557   : > { %v3456_v56 = vmax.f32 %v3373_v3, %v3374_v14  ;;  %3978 = vmatpush.bf16.msrb.mxu3 %v6439_v25  ;;  %v6427_v25 = vor.u32 %v7094_v47, %v6426_v6  ;;  %v10786_v47 = vld [vmem:[#allocation79_spill] sm:$0xff] }
 0x558   : > { %v3020_v10 = vpop.f32.mrf.mxu1 }
 0x559   : > { %v3146_v41 = vadd.f32 %v3020_v10, %v8620_v62  ;;  %v9280_v54 = vpop.f32.mrf.mxu0  ;;  %v3147_v62 = vadd.f32 %v9180_v4, %v8609_v58  ;;  %v6562_v58 = vld [vmem:[%s10505_s3 + $0x180] sm:$0xf]  ;;  %v7136_v4 = vld [vmem:[%s10505_s3 + $0x184] sm:$0xf0] }
 0x55a   : > { %v6563_v32 = vor.u32 %v7136_v4, %v6562_v58  ;;  %3920 = vmatpush.bf16.msrb.mxu2 %v6427_v25  ;;  %v3155_v1 = vadd.f32 %v9280_v54, %v2664_v57  ;;  %v10790_v57 = vld [vmem:[#allocation78_spill] sm:$0xff] }
 0x55b   : > { %v3264_v45 = vadd.f32 %v8918_v46, %v3146_v41  ;;  %6315 = vmatmul.msk.bf16.gmra.mxu1 %vm975_vm0, %v9161_v17  ;;  %v3265_v17 = vadd.f32 %v8911_v18, %v3147_v62  ;;  %v6612_v62 = vld [vmem:[%s10505_s3 + $0x1e8] sm:$0xf0] }
 0x55c   : > { %4405 = vmatpush.bf16.msrb.mxu0 %v6563_v32 }
 0x55d   : > { %v3376_v8 = vmax.f32 %v3264_v45, 0.0 }
 0x55f   : > { %v3457_v2 = vmax.f32 %v3375_v5, %v3376_v8  ;;  %v7147_v5 = vld [vmem:[%s10505_s3 + $0x1e4] sm:$0xf] }
 0x560   : > { %v3022_v42 = vpop.f32.mrf.mxu1  ;;  %v10779_v8 = vld [vmem:[#allocation31_spill] sm:$0xff] }
 0x561   : > { %v3497_v37 = vmax.f32 %v3455_v52, %v3457_v2  ;;  %v3148_v20 = vadd.f32 %v3022_v42, %v10774_v30  ;;  %v9301_v29 = vpop.f32.mrf.mxu0  ;;  %v3377_v52 = vmax.f32 %v3265_v17, 0.0  ;;  %v2661_v35 = vadd.f32 %v10780_v40, %v10779_v8  ;;  %v7145_v30 = vld [vmem:[%s10505_s3 + $0x1d4] sm:$0xf] }
 0x562   : > { %v6615_v2 = vor.u32 %v7147_v5, %v6612_v62  ;;  %v10784_v5 = vld [vmem:[#allocation37_spill] sm:$0xff] }
 0x563   : > { %v3266_v53 = vadd.f32 %v8918_v46, %v3148_v20  ;;  %v3525_v3 = vpack.c.bf16 %v3497_v37, %v3497_v37  ;;  %v9346_v37 = vld [vmem:[%s7606_s27 + $0xf8] sm:$0xff]  ;;  %v2665_v62 = vadd.f32 %v10784_v5, %v8682_v49  ;;  %v10785_v49 = vld [vmem:[#allocation33_spill] sm:$0xff] }
 0x564   : > { %6290 = vmatmul.msk.bf16.gmra.mxu0 %vm975_vm0, %v9312_v36  ;;  %4458 = vmatpush.bf16.msra.mxu1 %v6615_v2  ;;  %v6604_v20 = vld [vmem:[%s10505_s3 + $0x1d8] sm:$0xf0] }
 0x565   : > { %v3378_v55 = vmax.f32 %v3266_v53, 0.0  ;;  %v3604_v0 = vunpack.c.l.b16 %v3525_v3  ;;  %v6607_v32 = vor.u32 %v7145_v30, %v6604_v20  ;;  %v3381_v53 = vmax.f32 %v3269_v48, 0.0  ;;  %v6572_v48 = vld [vmem:[%s10505_s3 + $0x198] sm:$0xf0] }
 0x566   : > { %v3157_v20 = vadd.f32 %v9301_v29, %v10785_v49  ;;  %v10792_v49 = vld [vmem:[#allocation81_spill] sm:$0xff] }
 0x567   : > { %v3458_v31 = vmax.f32 %v3377_v52, %v3378_v55  ;;  %v7143_v55 = vld [vmem:[%s10505_s3 + $0x1c4] sm:$0xf] }
 0x568   : > { %v3025_v38 = vpop.f32.mrf.mxu1  ;;  %4459 = vmatpush.bf16.msra.mxu1 %v6607_v32  ;;  %v6599_v33 = vor.u32 %v7143_v55, %v6596_v27  ;;  %v3275_v55 = vadd.f32 %v8911_v18, %v3157_v20 }
 0x569   : > { %v3498_v63 = vmax.f32 %v3456_v56, %v3458_v31  ;;  %v3150_v14 = vadd.f32 %v3025_v38, %v10776_v21  ;;  %v9327_v41 = vpop.f32.mrf.mxu0  ;;  %v3271_v38 = vadd.f32 %v8911_v18, %v3153_v11  ;;  %v7141_v21 = vld [vmem:[%s10505_s3 + $0x1b4] sm:$0xf] }
 0x56b   : > { %v3526_v10 = vpack.c.bf16 %v3498_v63, %v3498_v63  ;;  %v3268_v51 = vadd.f32 %v8918_v46, %v3150_v14  ;;  %6316 = vmatmul.msk.bf16.gmra.mxu1 %vm975_vm0, %v9200_v43  ;;  %v6431_v63 = vor.u32 %v7093_v50, %v6428_v15  ;;  %v6588_v14 = vld [vmem:[%s10505_s3 + $0x1b8] sm:$0xf0] }
 0x56c   : > { %4460 = vmatpush.bf16.msra.mxu1 %v6599_v33  ;;  %v10787_v33 = vld [vmem:[#allocation35_spill] sm:$0xff] }
 0x56d   : > { %v3605_v56 = vunpack.c.l.b16 %v3526_v10  ;;  %v3380_v45 = vmax.f32 %v3268_v51, 0.0  ;;  %3979 = vmatpush.bf16.msrb.mxu3 %v6431_v63 }
 0x56f   : > { %v9340_v13 = vpack.c.b16 %v3605_v56, %v3604_v0  ;;  %v3459_v43 = vmax.f32 %v3379_v28, %v3380_v45  ;;  %v3383_v28 = vmax.f32 %v3271_v38, 0.0  ;;  %v7139_v56 = vld [vmem:[%s10505_s3 + $0x1a4] sm:$0xf]  ;;  %v6580_v45 = vld [vmem:[%s10505_s3 + $0x1a8] sm:$0xf0] }
 0x570   : > { %v3027_v42 = vpop.f32.mrf.mxu1 }
 0x571   : > { %v3152_v17 = vadd.f32 %v3027_v42, %v2661_v35  ;;  %3750 = vmatmul.bf16.gmra.mxu2 %v9340_v13  ;;  %3809 = vmatmul.bf16.gmra.mxu3 %v9340_v13  ;;  %v9355_v4 = vpop.f32.mrf.mxu0  ;;  %v3273_v35 = vadd.f32 %v8911_v18, %v3155_v1  ;;  %v7137_v42 = vld [vmem:[%s10505_s3 + $0x194] sm:$0xf]  ;;  %v6418_v1 = vld [vmem:[%s10505_s3 + $0x20] sm:$0xf] }
 0x572   : > { %v6575_v30 = vor.u32 %v7137_v42, %v6572_v48 }
 0x573   : > { %v3270_v58 = vadd.f32 %v8918_v46, %v3152_v17  ;;  %v3385_v32 = vmax.f32 %v3273_v35, 0.0  ;;  %v10791_v35 = vld [vmem:[#allocation36_spill] sm:$0xff] }
 0x574   : > { %6291 = vmatmul.msk.bf16.gmra.mxu0 %vm975_vm0, %v9346_v37 }
 0x575   : > { %v3382_v52 = vmax.f32 %v3270_v58, 0.0 }
 0x577   : > { %v3460_v16 = vmax.f32 %v3381_v53, %v3382_v52  ;;  %v7135_v53 = vld [vmem:[%s10505_s3 + $0x184] sm:$0xf] }
 0x578   : > { %v3030_v31 = vpop.f32.mrf.mxu1  ;;  %v6567_v52 = vor.u32 %v7135_v53, %v6564_v34 }
 0x579   : > { %v3154_v3 = vadd.f32 %v3030_v31, %v8674_v26  ;;  %v9390_v51 = vpop.f32.mrf.mxu0  ;;  %v6591_v26 = vor.u32 %v7141_v21, %v6588_v14  ;;  %v10788_v31 = vld [vmem:[#allocation34_spill] sm:$0xff] }
 0x57a   : > { %v2668_v25 = vadd.f32 %v10788_v31, %v10787_v33 }
 0x57b   : > { %v3272_v10 = vadd.f32 %v8918_v46, %v3154_v3  ;;  %6317 = vmatmul.msk.bf16.gmra.mxu1 %vm975_vm0, %v9267_v60  ;;  %v6583_v60 = vor.u32 %v7139_v56, %v6580_v45  ;;  %v3387_v3 = vmax.f32 %v3275_v55, 0.0  ;;  %v6420_v45 = vld [vmem:[%s10505_s3 + $0x28] sm:$0xf0]  ;;  %v10795_v55 = vld [vmem:[#allocation41_spill] sm:$0xff] }
 0x57c   : > { %4461 = vmatpush.bf16.msra.mxu1 %v6591_v26  ;;  %v3159_v63 = vadd.f32 %v9327_v41, %v2668_v25  ;;  %v7091_v41 = vld [vmem:[%s10505_s3 + $0x24] sm:$0xf] }
 0x57d   : > { %v3384_v0 = vmax.f32 %v3272_v10, 0.0 }
 0x57e   : > { %v3277_v5 = vadd.f32 %v8911_v18, %v3159_v63 }
 0x57f   : > { %v3461_v8 = vmax.f32 %v3383_v28, %v3384_v0 }
 0x580   : > { %v3032_v40 = vpop.f32.mrf.mxu1  ;;  %4462 = vmatpush.bf16.msra.mxu1 %v6583_v60 }
 0x581   : > { %v3499_v2 = vmax.f32 %v3459_v43, %v3461_v8  ;;  %v3156_v54 = vadd.f32 %v3032_v40, %v2665_v62  ;;  %v9413_v58 = vpop.f32.mrf.mxu0  ;;  %v6423_v8 = vor.u32 %v7091_v41, %v6420_v45  ;;  %v3389_v40 = vmax.f32 %v3277_v5, 0.0  ;;  %v10799_v5 = vld [vmem:[#allocation42_spill] sm:$0xff] }
 0x583   : > { %v3274_v17 = vadd.f32 %v8918_v46, %v3156_v54  ;;  %v3527_v27 = vpack.c.bf16 %v3499_v2, %v3499_v2  ;;  %3980 = vmatpush.bf16.msrb.mxu3 %v6423_v8  ;;  %v3161_v2 = vadd.f32 %v9355_v4, %v10791_v35 }
 0x584   : > { %4406 = vmatmul.bf16.vlgmr.msrb.gmra.mxu0 %v9074_v61  ;;  %4463 = vmatpush.bf16.msra.mxu1 %v6575_v30 }
 0x585   : > { %v3386_v43 = vmax.f32 %v3274_v17, 0.0  ;;  %v3606_v21 = vunpack.c.l.b16 %v3527_v27  ;;  %v3279_v30 = vadd.f32 %v8911_v18, %v3161_v2 }
 0x587   : > { %v3462_v11 = vmax.f32 %v3385_v32, %v3386_v43  ;;  %v10793_v32 = vld [vmem:[#allocation39_spill] sm:$0xff]  ;;  %v10794_v43 = vld [vmem:[#allocation80_spill] sm:$0xff]  ;;  %v3391_v4 = vmax.f32 %v3279_v30, 0.0 }
 0x588   : > { %v3035_v29 = vpop.f32.mrf.mxu1  ;;  %4464 = vmatpush.bf16.msra.mxu1 %v6567_v52  ;;  %v2672_v53 = vadd.f32 %v10794_v43, %v10793_v32 }
 0x589   : > { %v3500_v6 = vmax.f32 %v3460_v16, %v3462_v11  ;;  %v3158_v50 = vadd.f32 %v3035_v29, %v10786_v47  ;;  %v9430_v7 = vpop.f32.mrf.mxu0  ;;  %v10789_v16 = vld [vmem:[#allocation38_spill] sm:$0xff]  ;;  %v10796_v29 = vld [vmem:[#allocation56_spill] sm:$0xff] }
 0x58a   : > { %v2669_v10 = vadd.f32 %v10790_v57, %v10789_v16  ;;  %v3163_v11 = vadd.f32 %v9390_v51, %v2672_v53  ;;  %v2673_v27 = vadd.f32 %v10796_v29, %v10795_v55  ;;  %v6410_v51 = vld [vmem:[%s10505_s3 + $0x10] sm:$0xf] }
 0x58b   : > { %v3528_v15 = vpack.c.bf16 %v3500_v6, %v3500_v6  ;;  %v3276_v38 = vadd.f32 %v8918_v46, %v3158_v50  ;;  %6318 = vmatmul.msk.bf16.gmra.mxu1 %vm975_vm0, %v9312_v36  ;;  %v7092_v36 = vld [vmem:[%s10505_s3 + $0x24] sm:$0xf0] }
 0x58c   : > { %v6419_v56 = vor.u32 %v7092_v36, %v6418_v1  ;;  %v3281_v50 = vadd.f32 %v8911_v18, %v3163_v11  ;;  %v9487_v1 = vpop.f32.mrf.mxu2  ;;  %v9489_v36 = vpop.f32.mrf.mxu3  ;;  %v7088_v11 = vld [vmem:[%s10505_s3 + $0x4] sm:$0xf0] }
 0x58d   : > { %v3607_v14 = vunpack.c.l.b16 %v3528_v15  ;;  %v3388_v9 = vmax.f32 %v3276_v38, 0.0  ;;  %v10797_v38 = vld [vmem:[#allocation40_spill] sm:$0xff] }
 0x58e   : > { %3921 = vmatpush.bf16.msrb.mxu2 %v6419_v56  ;;  %v10798_v56 = vld [vmem:[#allocation43_spill] sm:$0xff] }
 0x58f   : > { %v9434_v26 = vpack.c.b16 %v3607_v14, %v3606_v21  ;;  %v3463_v28 = vmax.f32 %v3387_v3, %v3388_v9  ;;  %v3393_v3 = vmax.f32 %v3281_v50, 0.0  ;;  %v7090_v21 = vld [vmem:[%s10505_s3 + $0x14] sm:$0xf0]  ;;  %v7089_v9 = vld [vmem:[%s10505_s3 + $0x14] sm:$0xf] }
 0x590   : > { %v3037_v0 = vpop.f32.mrf.mxu1  ;;  %v6411_v14 = vor.u32 %v7090_v21, %v6410_v51 }
 0x591   : > { %v3160_v62 = vadd.f32 %v3037_v0, %v2669_v10  ;;  %3755 = vmatmul.bf16.gmra.mxu2 %v9434_v26  ;;  %3814 = vmatmul.bf16.gmra.mxu3 %v9434_v26  ;;  %v9455_v48 = vpop.f32.mrf.mxu0 }
 0x592   : > { %3922 = vmatpush.bf16.msrb.mxu2 %v6411_v14  ;;  %v10804_v14 = vld [vmem:[#allocation84_spill] sm:$0xff] }
 0x593   : > { %v3278_v60 = vadd.f32 %v8918_v46, %v3160_v62  ;;  %v10800_v62 = vld [vmem:[#allocation82_spill] sm:$0xff] }
 0x594   : > { %4411 = vmatmul.bf16.gmra.mxu0 %v9100_v12  ;;  %v2676_v8 = vadd.f32 %v10800_v62, %v10799_v5  ;;  %v10808_v5 = vld [vmem:[#allocation51_spill] sm:$0xff] }
 0x595   : > { %v3390_v54 = vmax.f32 %v3278_v60, 0.0 }
 0x597   : > { %v3464_v42 = vmax.f32 %v3389_v40, %v3390_v54  ;;  %v3167_v54 = vadd.f32 %v9430_v7, %v2676_v8  ;;  %v9509_v7 = vpop.f32.mrf.mxu3 }
 0x598   : > { %v3040_v17 = vpop.f32.mrf.mxu1 }
 0x599   : > { %v3162_v20 = vadd.f32 %v3040_v17, %v10792_v49  ;;  %v9468_v25 = vpop.f32.mrf.mxu0  ;;  %v3285_v55 = vadd.f32 %v8911_v18, %v3167_v54 }
 0x59b   : > { %v3280_v34 = vadd.f32 %v8918_v46, %v3162_v20  ;;  %6319 = vmatmul.msk.bf16.gmra.mxu1 %vm975_vm0, %v9346_v37  ;;  %v3165_v37 = vadd.f32 %v9413_v58, %v10797_v38  ;;  %v6412_v58 = vld [vmem:[%s10505_s3 + $0x18] sm:$0xf0]  ;;  %v10801_v20 = vld [vmem:[#allocation44_spill] sm:$0xff] }
 0x59c   : > { %v6415_v57 = vor.u32 %v7089_v9, %v6412_v58  ;;  %v10805_v58 = vld [vmem:[#allocation45_spill] sm:$0xff] }
 0x59d   : > { %v3392_v52 = vmax.f32 %v3280_v34, 0.0  ;;  %v3283_v10 = vadd.f32 %v8911_v18, %v3165_v37 }
 0x59e   : > { %3981 = vmatpush.bf16.msrb.mxu3 %v6415_v57 }
 0x59f   : > { %v3465_v6 = vmax.f32 %v3391_v4, %v3392_v52  ;;  %v3395_v35 = vmax.f32 %v3283_v10, 0.0  ;;  %v6402_v4 = vld [vmem:[%s10505_s3] sm:$0xf]  ;;  %v9507_v52 = vpop.f32.mrf.mxu2 }
 0x5a0   : > { %v3042_v47 = vpop.f32.mrf.mxu1 }
 0x5a1   : > { %v3501_v33 = vmax.f32 %v3463_v28, %v3465_v6  ;;  %v3164_v31 = vadd.f32 %v3042_v47, %v2673_v27  ;;  %v2906_v2 = vpop.f32.mrf.mxu0  ;;  %v6403_v27 = vor.u32 %v7088_v11, %v6402_v4  ;;  %v7087_v6 = vld [vmem:[%s10505_s3 + $0x4] sm:$0xf]  ;;  %v6404_v47 = vld [vmem:[%s10505_s3 + $0x8] sm:$0xf0] }
 0x5a2   : > { %v6407_v50 = vor.u32 %v7087_v6, %v6404_v47 }
 0x5a3   : > { %v3282_v15 = vadd.f32 %v8918_v46, %v3164_v31  ;;  %v3529_v41 = vpack.c.bf16 %v3501_v33, %v3501_v33  ;;  %3923 = vmatpush.bf16.msrb.mxu2 %v6403_v27  ;;  %v3397_v31 = vmax.f32 %v3285_v55, 0.0 }
 0x5a4   : > { %4416 = vmatmul.bf16.gmra.mxu0 %v9138_v44  ;;  %3982 = vmatpush.bf16.msrb.mxu3 %v6407_v50  ;;  %v10811_v50 = vld [vmem:[#allocation49_spill] sm:$0xff] }
 0x5a5   : > { %v3394_v63 = vmax.f32 %v3282_v15, 0.0  ;;  %v3608_v17 = vunpack.c.l.b16 %v3529_v41  ;;  %v10803_v15 = vld [vmem:[#allocation61_spill] sm:$0xff] }
 0x5a6   : > { %v3169_v38 = vadd.f32 %v9455_v48, %v10803_v15 }
 0x5a7   : > { %v3466_v16 = vmax.f32 %v3393_v3, %v3394_v63  ;;  %v9528_v10 = vpop.f32.mrf.mxu2 }
 0x5a8   : > { %v3045_v28 = vpop.f32.mrf.mxu1  ;;  %v3287_v21 = vadd.f32 %v8911_v18, %v3169_v38 }
 0x5a9   : > { %v3502_v0 = vmax.f32 %v3464_v42, %v3466_v16  ;;  %v3166_v45 = vadd.f32 %v3045_v28, %v10798_v56  ;;  %v10802_v42 = vld [vmem:[#allocation47_spill] sm:$0xff]  ;;  %v2908_v3 = vpop.f32.mrf.mxu0  ;;  %v9530_v28 = vpop.f32.mrf.mxu3 }
 0x5aa   : > { %v2677_v32 = vadd.f32 %v10802_v42, %v10801_v20  ;;  %v10806_v16 = vld [vmem:[#allocation83_spill] sm:$0xff]  ;;  %v3399_v48 = vmax.f32 %v3287_v21, 0.0  ;;  %v10809_v42 = vld [vmem:[#allocation46_spill] sm:$0xff] }
 0x5ab   : > { %v3530_v60 = vpack.c.bf16 %v3502_v0, %v3502_v0  ;;  %v3284_v40 = vadd.f32 %v8918_v46, %v3166_v45  ;;  %4465 = vmatmul.bf16.vlgmr.msra.gmra.mxu1 %v9074_v61  ;;  %v2680_v57 = vadd.f32 %v10806_v16, %v10805_v58  ;;  %v10807_v45 = vld [vmem:[#allocation48_spill] sm:$0xff]  ;;  %v10814_v16 = vld [vmem:[#allocation55_spill] sm:$0xff] }
 0x5ac   : > { %v2681_v62 = vadd.f32 %v10808_v5, %v10807_v45  ;;  %v10813_v58 = vld [vmem:[#allocation52_spill] sm:$0xff] }
 0x5ad   : > { %v3609_v30 = vunpack.c.l.b16 %v3530_v60  ;;  %v3396_v49 = vmax.f32 %v3284_v40, 0.0  ;;  %v3171_v0 = vadd.f32 %v9468_v25, %v2680_v57  ;;  %v2685_v57 = vadd.f32 %v10814_v16, %v10813_v58  ;;  %v10819_v58 = vld [vmem:[#allocation57_spill] sm:$0xff]  ;;  %v10820_v16 = vld [vmem:[#allocation60_spill] sm:$0xff] }
 0x5af   : > { %v9499_v43 = vpack.c.b16 %v3609_v30, %v3608_v17  ;;  %v3467_v53 = vmax.f32 %v3395_v35, %v3396_v49  ;;  %v3289_v35 = vadd.f32 %v8911_v18, %v3171_v0  ;;  %v9538_v30 = vpop.f32.mrf.mxu2  ;;  %v6538_v0 = vld [vmem:[%s10505_s3 + $0x170] sm:$0xf] }
 0x5b0   : > { %v3047_v34 = vpop.f32.mrf.mxu1 }
 0x5b1   : > { %v3168_v29 = vadd.f32 %v3047_v34, %v2677_v32  ;;  %3760 = vmatmul.bf16.gmra.mxu2 %v9499_v43  ;;  %3819 = vmatmul.bf16.gmra.mxu3 %v9499_v43  ;;  %v2911_v60 = vpop.f32.mrf.mxu0  ;;  %v9540_v49 = vpop.f32.mrf.mxu3  ;;  %v3173_v32 = vadd.f32 %v2906_v2, %v10809_v42  ;;  %v3401_v25 = vmax.f32 %v3289_v35, 0.0 }
 0x5b3   : > { %v3286_v33 = vadd.f32 %v8918_v46, %v3168_v29  ;;  %v3291_v11 = vadd.f32 %v8911_v18, %v3173_v32 }
 0x5b4   : > { %4421 = vmatmul.bf16.gmra.mxu0 %v9225_v19 }
 0x5b5   : > { %v3398_v37 = vmax.f32 %v3286_v33, 0.0  ;;  %v10812_v33 = vld [vmem:[#allocation85_spill] sm:$0xff]  ;;  %v3403_v2 = vmax.f32 %v3291_v11, 0.0 }
 0x5b7   : > { %v3468_v63 = vmax.f32 %v3397_v31, %v3398_v37  ;;  %v2684_v31 = vadd.f32 %v10812_v33, %v10811_v50  ;;  %v9551_v37 = vpop.f32.mrf.mxu2  ;;  %v6532_v33 = vld [vmem:[%s10505_s3 + $0x168] sm:$0xf0] }
 0x5b8   : > { %v3050_v51 = vpop.f32.mrf.mxu1 }
 0x5b9   : > { %v3170_v9 = vadd.f32 %v3050_v51, %v10804_v14  ;;  %v2913_v47 = vpop.f32.mrf.mxu0  ;;  %v9553_v51 = vpop.f32.mrf.mxu3  ;;  %v3175_v21 = vadd.f32 %v2908_v3, %v2684_v31  ;;  %v7133_v3 = vld [vmem:[%s10505_s3 + $0x174] sm:$0xf] }
 0x5bb   : > { %v3288_v41 = vadd.f32 %v8918_v46, %v3170_v9  ;;  %4470 = vmatmul.bf16.gmra.mxu1 %v9100_v12 }
 0x5bd   : > { %v3400_v56 = vmax.f32 %v3288_v41, 0.0 }
 0x5bf   : > { %v3469_v8 = vmax.f32 %v3399_v48, %v3400_v56  ;;  %v7134_v56 = vld [vmem:[%s10505_s3 + $0x174] sm:$0xf0] }
 0x5c0   : > { %v3052_v40 = vpop.f32.mrf.mxu1  ;;  %v6539_v5 = vor.u32 %v7134_v56, %v6538_v0 }
 0x5c1   : > { %v3503_v54 = vmax.f32 %v3467_v53, %v3469_v8  ;;  %v3172_v17 = vadd.f32 %v3052_v40, %v2681_v62  ;;  %v10810_v53 = vld [vmem:[#allocation86_spill] sm:$0xff]  ;;  %v3293_v8 = vadd.f32 %v8911_v18, %v3175_v21  ;;  %v9577_v42 = vpop.f32.mrf.mxu3 }
 0x5c2   : > { %v6540_v62 = vld [vmem:[%s10505_s3 + $0x178] sm:$0xf0]  ;;  %4137 = vmatpush.bf16.msra.mxu2 %v6539_v5 }
 0x5c3   : > { %v3290_v20 = vadd.f32 %v8918_v46, %v3172_v17  ;;  %v3531_v29 = vpack.c.bf16 %v3503_v54, %v3503_v54  ;;  %v6543_v35 = vor.u32 %v7133_v3, %v6540_v62  ;;  %v2916_v17 = vpop.f32.mrf.mxu0  ;;  %v3405_v32 = vmax.f32 %v3293_v8, 0.0 }
 0x5c4   : > { %4426 = vmatmul.bf16.gmra.mxu0 %v9340_v13 }
 0x5c5   : > { %v3402_v34 = vmax.f32 %v3290_v20, 0.0  ;;  %v3610_v14 = vunpack.c.l.b16 %v3531_v29  ;;  %4196 = vmatpush.bf16.msra.mxu3 %v6543_v35  ;;  %v9575_v20 = vpop.f32.mrf.mxu2  ;;  %v6530_v29 = vld [vmem:[%s10505_s3 + $0x160] sm:$0xf] }
 0x5c7   : > { %v3470_v4 = vmax.f32 %v3401_v25, %v3402_v34  ;;  %v10816_v25 = vld [vmem:[#allocation50_spill] sm:$0xff] }
 0x5c8   : > { %v3055_v55 = vpop.f32.mrf.mxu1  ;;  %v3177_v34 = vadd.f32 %v2911_v60, %v10816_v25  ;;  %v7131_v60 = vld [vmem:[%s10505_s3 + $0x164] sm:$0xf] }
 0x5c9   : > { %v3504_v27 = vmax.f32 %v3468_v63, %v3470_v4  ;;  %v3174_v6 = vadd.f32 %v3055_v55, %v10810_v53  ;;  %v6535_v31 = vor.u32 %v7131_v60, %v6532_v33  ;;  %v9603_v56 = vpop.f32.mrf.mxu3  ;;  %v10824_v60 = vld [vmem:[#allocation88_spill] sm:$0xff] }
 0x5ca   : > { %v3295_v53 = vadd.f32 %v8911_v18, %v3177_v34 }
 0x5cb   : > { %v3532_v15 = vpack.c.bf16 %v3504_v27, %v3504_v27  ;;  %v3292_v38 = vadd.f32 %v8918_v46, %v3174_v6  ;;  %4475 = vmatmul.bf16.gmra.mxu1 %v9138_v44  ;;  %v7132_v27 = vld [vmem:[%s10505_s3 + $0x164] sm:$0xf0]  ;;  %4197 = vmatpush.bf16.msra.mxu3 %v6535_v31 }
 0x5cc   : > { %v6531_v50 = vor.u32 %v7132_v27, %v6530_v29 }
 0x5cd   : > { %v3611_v9 = vunpack.c.l.b16 %v3532_v15  ;;  %v3404_v63 = vmax.f32 %v3292_v38, 0.0  ;;  %v10817_v15 = vld [vmem:[#allocation53_spill] sm:$0xff]  ;;  %v10818_v38 = vld [vmem:[#allocation87_spill] sm:$0xff]  ;;  %v9601_v0 = vpop.f32.mrf.mxu2 }
 0x5ce   : > { %4138 = vmatpush.bf16.msra.mxu2 %v6531_v50  ;;  %v10823_v50 = vld [vmem:[#allocation58_spill] sm:$0xff] }
 0x5cf   : > { %v9557_v41 = vpack.c.b16 %v3611_v9, %v3610_v14  ;;  %v3471_v48 = vmax.f32 %v3403_v2, %v3404_v63  ;;  %v2688_v2 = vadd.f32 %v10818_v38, %v10817_v15  ;;  %v2918_v63 = vpop.f32.mrf.mxu0 }
 0x5d0   : > { %v3057_v45 = vpop.f32.mrf.mxu1 }
 0x5d1   : > { %10815 = vst [vmem:[#allocation73_spill] sm:$0xff] %v9557_v41  ;;  %v3176_v40 = vadd.f32 %v3057_v45, %v2685_v57  ;;  %3765 = vmatmul.bf16.gmra.mxu2 %v9557_v41  ;;  %3824 = vmatmul.bf16.gmra.mxu3 %v9557_v41  ;;  %v3179_v14 = vadd.f32 %v2913_v47, %v2688_v2  ;;  %v9613_v34 = vpop.f32.mrf.mxu3 }
 0x5d2   : > { %v2689_v57 = vadd.f32 %v10820_v16, %v10819_v58  ;;  %v6522_v16 = vld [vmem:[%s10505_s3 + $0x150] sm:$0xf] }
 0x5d3   : > { %v3294_v54 = vadd.f32 %v8918_v46, %v3176_v40  ;;  %v3297_v5 = vadd.f32 %v8911_v18, %v3179_v14  ;;  %v10821_v40 = vld [vmem:[#allocation54_spill] sm:$0xff]  ;;  %v10825_v14 = vld [vmem:[#allocation89_spill] sm:$0xff] }
 0x5d4   : > { %4431 = vmatmul.bf16.gmra.mxu0 %v9434_v26  ;;  %v3181_v35 = vadd.f32 %v2916_v17, %v10821_v40  ;;  %v2692_v17 = vadd.f32 %v10824_v60, %v10823_v50  ;;  %v10828_v50 = vld [vmem:[#allocation63_spill] sm:$0xff]  ;;  %v10829_v60 = vld [vmem:[#allocation62_spill] sm:$0xff] }
 0x5d5   : > { %v3406_v4 = vmax.f32 %v3294_v54, 0.0  ;;  %v3409_v54 = vmax.f32 %v3297_v5, 0.0  ;;  %v9611_v25 = vpop.f32.mrf.mxu2 }
 0x5d6   : > { %v3183_v38 = vadd.f32 %v2918_v63, %v2692_v17  ;;  %v7129_v63 = vld [vmem:[%s10505_s3 + $0x154] sm:$0xf]  ;;  %v2696_v17 = vadd.f32 %v10829_v60, %v10828_v50 }
 0x5d7   : > { %v3472_v11 = vmax.f32 %v3405_v32, %v3406_v4 }
 0x5d8   : > { %v3060_v55 = vpop.f32.mrf.mxu1 }
 0x5d9   : > { %v3178_v6 = vadd.f32 %v3060_v55, %v8819_v39  ;;  %v3407_v39 = vmax.f32 %v3295_v53, 0.0  ;;  %v2921_v55 = vpop.f32.mrf.mxu0  ;;  %v9642_v40 = vpop.f32.mrf.mxu3 }
 0x5db   : > { %v3296_v21 = vadd.f32 %v8918_v46, %v3178_v6  ;;  %4480 = vmatmul.bf16.gmra.mxu1 %v9225_v19 }
 0x5dd   : > { %v3408_v9 = vmax.f32 %v3296_v21, 0.0  ;;  %v9637_v5 = vpop.f32.mrf.mxu2 }
 0x5df   : > { %v3473_v3 = vmax.f32 %v3407_v39, %v3408_v9  ;;  %v2693_v9 = vadd.f32 %v10825_v14, %v8845_v22  ;;  %v6524_v22 = vld [vmem:[%s10505_s3 + $0x158] sm:$0xf0]  ;;  %v10831_v14 = vld [vmem:[#allocation3_spill] sm:$0xff] }
 0x5e0   : > { %v3062_v45 = vpop.f32.mrf.mxu1 }
 0x5e1   : > { %v3505_v62 = vmax.f32 %v3471_v48, %v3473_v3  ;;  %v3180_v8 = vadd.f32 %v3062_v45, %v2689_v57  ;;  %3924 = vmatmul.bf16.vlgmr.msrb.gmra.mxu2 %v8993_v23  ;;  %3983 = vmatmul.bf16.vlgmr.msrb.gmra.mxu3 %v8993_v23  ;;  %v3299_v48 = vadd.f32 %v8911_v18, %v3181_v35  ;;  %v10822_v23 = vld [vmem:[#allocation90_spill] sm:$0xff]  ;;  %v2923_v35 = vpop.f32.mrf.mxu0 }
 0x5e2   : > { %v7130_v57 = vld [vmem:[%s10505_s3 + $0x154] sm:$0xf0] }
 0x5e3   : > { %v3298_v47 = vadd.f32 %v8918_v46, %v3180_v8  ;;  %v3533_v27 = vpack.c.bf16 %v3505_v62, %v3505_v62  ;;  %v3411_v15 = vmax.f32 %v3299_v48, 0.0  ;;  %v6523_v45 = vor.u32 %v7130_v57, %v6522_v16  ;;  %v6514_v57 = vld [vmem:[%s10505_s3 + $0x140] sm:$0xf] }
 0x5e4   : > { %4436 = vmatmul.bf16.gmra.mxu0 %v9499_v43  ;;  %v3301_v62 = vadd.f32 %v8911_v18, %v3183_v38 }
 0x5e5   : > { %v3410_v32 = vmax.f32 %v3298_v47, 0.0  ;;  %v4053_v2 = vunpack.c.l.b16 %v3533_v27  ;;  %v6527_v47 = vor.u32 %v7129_v63, %v6524_v22  ;;  %4139 = vmatpush.bf16.msra.mxu2 %v6523_v45  ;;  %v7128_v63 = vld [vmem:[%s10505_s3 + $0x144] sm:$0xf0] }
 0x5e7   : > { %v3474_v4 = vmax.f32 %v3409_v54, %v3410_v32  ;;  %4198 = vmatpush.bf16.msra.mxu3 %v6527_v47  ;;  %v3413_v32 = vmax.f32 %v3301_v62, 0.0  ;;  %v6515_v62 = vor.u32 %v7128_v63, %v6514_v57 }
 0x5e8   : > { %v3065_v29 = vpop.f32.mrf.mxu1 }
 0x5e9   : > { %v3506_v53 = vmax.f32 %v3472_v11, %v3474_v4  ;;  %v3182_v6 = vadd.f32 %v3065_v29, %v10822_v23  ;;  %v10826_v4 = vld [vmem:[#allocation59_spill] sm:$0xff]  ;;  %v2926_v38 = vpop.f32.mrf.mxu0  ;;  %4140 = vmatpush.bf16.msra.mxu2 %v6515_v62 }
 0x5ea   : > { %v3185_v48 = vadd.f32 %v2921_v55, %v10826_v4  ;;  %v3187_v55 = vadd.f32 %v2923_v35, %v2696_v17 }
 0x5eb   : > { %v3534_v33 = vpack.c.bf16 %v3506_v53, %v3506_v53  ;;  %v3300_v31 = vadd.f32 %v8918_v46, %v3182_v6  ;;  %4485 = vmatmul.bf16.gmra.mxu1 %v9340_v13  ;;  %v10827_v6 = vld [vmem:[#allocation64_spill] sm:$0xff] }
 0x5ec   : > { %v3303_v23 = vadd.f32 %v8911_v18, %v3185_v48  ;;  %v3305_v45 = vadd.f32 %v8911_v18, %v3187_v55  ;;  %v10833_v55 = vld [vmem:[#allocation92_spill] sm:$0xff] }
 0x5ed   : > { %v4054_v21 = vunpack.c.l.b16 %v3534_v33  ;;  %v3412_v39 = vmax.f32 %v3300_v31, 0.0  ;;  %v9651_v33 = vpop.f32.mrf.mxu2  ;;  %v9653_v31 = vpop.f32.mrf.mxu3 }
 0x5ef   : > { %v9623_v58 = vpack.c.b16 %v4054_v21, %v4053_v2  ;;  %v3475_v11 = vmax.f32 %v3411_v15, %v3412_v39  ;;  %v3415_v2 = vmax.f32 %v3303_v23, 0.0  ;;  %v10830_v39 = vld [vmem:[#allocation69_spill] sm:$0xff]  ;;  %v3417_v23 = vmax.f32 %v3305_v45, 0.0 }
 0x5f0   : > { %v3067_v3 = vpop.f32.mrf.mxu1 }
 0x5f1   : > { %v3184_v8 = vadd.f32 %v3067_v3, %v2693_v9  ;;  %3929 = vmatmul.bf16.gmra.mxu2 %v9022_v24  ;;  %3988 = vmatmul.bf16.gmra.mxu3 %v9022_v24  ;;  %v2697_v9 = vadd.f32 %v10831_v14, %v10830_v39  ;;  %v7127_v3 = vld [vmem:[%s10505_s3 + $0x144] sm:$0xf]  ;;  %v10835_v39 = vld [vmem:[#allocation65_spill] sm:$0xff] }
 0x5f3   : > { %v3302_v54 = vadd.f32 %v8918_v46, %v3184_v8  ;;  %v6516_v8 = vld [vmem:[%s10505_s3 + $0x148] sm:$0xf0] }
 0x5f4   : > { %4441 = vmatmul.bf16.gmra.mxu0 %v9557_v41 }
 0x5f5   : > { %v3414_v29 = vmax.f32 %v3302_v54, 0.0  ;;  %v6519_v54 = vor.u32 %v7127_v3, %v6516_v8  ;;  %v9675_v4 = vpop.f32.mrf.mxu2  ;;  %v9677_v48 = vpop.f32.mrf.mxu3  ;;  %v10837_v8 = vld [vmem:[#allocation72_spill] sm:$0xff] }
 0x5f7   : > { %v3476_v27 = vmax.f32 %v3413_v32, %v3414_v29  ;;  %4199 = vmatpush.bf16.msra.mxu3 %v6519_v54  ;;  %v10832_v29 = vld [vmem:[#allocation67_spill] sm:$0xff] }
 0x5f8   : > { %v3070_v53 = vpop.f32.mrf.mxu1 }
 0x5f9   : > { %v3186_v24 = vadd.f32 %v3070_v53, %v10827_v6  ;;  %v3189_v53 = vadd.f32 %v2926_v38, %v10832_v29 }
 0x5fb   : > { %v3304_v15 = vadd.f32 %v8918_v46, %v3186_v24  ;;  %4490 = vmatmul.bf16.gmra.mxu1 %v9434_v26  ;;  %v2928_v24 = vpop.f32.mrf.mxu0  ;;  %v3307_v50 = vadd.f32 %v8911_v18, %v3189_v53 }
 0x5fd   : > { %v3416_v21 = vmax.f32 %v3304_v15, 0.0  ;;  %v9687_v38 = vpop.f32.mrf.mxu2  ;;  %v9689_v57 = vpop.f32.mrf.mxu3  ;;  %v3419_v63 = vmax.f32 %v3307_v50, 0.0 }
 0x5ff   : > { %v3477_v16 = vmax.f32 %v3415_v2, %v3416_v21  ;;  %v10834_v21 = vld [vmem:[#allocation91_spill] sm:$0xff] }
 0x600   : > { %v3072_v22 = vpop.f32.mrf.mxu1  ;;  %v2700_v14 = vadd.f32 %v10835_v39, %v10834_v21 }
 0x601   : > { %v3507_v47 = vmax.f32 %v3475_v11, %v3477_v16  ;;  %v3188_v35 = vadd.f32 %v3072_v22, %v2697_v9  ;;  %3934 = vmatmul.bf16.gmra.mxu2 %v9048_v59  ;;  %3993 = vmatmul.bf16.gmra.mxu3 %v9048_v59 }
 0x602   : > { %v3191_v3 = vadd.f32 %v2928_v24, %v2700_v14  ;;  %v7126_v24 = vld [vmem:[%s10505_s3 + $0x134] sm:$0xf0] }
 0x603   : > { %v3306_v32 = vadd.f32 %v8918_v46, %v3188_v35  ;;  %v3535_v17 = vpack.c.bf16 %v3507_v47, %v3507_v47 }
 0x604   : > { %4446 = vmatmul.bf16.gmra.mxu0 %v9623_v58  ;;  %v3309_v53 = vadd.f32 %v8911_v18, %v3191_v3 }
 0x605   : > { %v3418_v6 = vmax.f32 %v3306_v32, 0.0  ;;  %v4314_v45 = vunpack.c.l.b16 %v3535_v17  ;;  %v2931_v32 = vpop.f32.mrf.mxu0  ;;  %v9712_v14 = vpop.f32.mrf.mxu2 }
 0x607   : > { %v3478_v11 = vmax.f32 %v3417_v23, %v3418_v6  ;;  %v6506_v6 = vld [vmem:[%s10505_s3 + $0x130] sm:$0xf] }
 0x608   : > { %v3075_v60 = vpop.f32.mrf.mxu1  ;;  %v6507_v50 = vor.u32 %v7126_v24, %v6506_v6  ;;  %v10845_v24 = vld [vmem:[#allocation71_spill] sm:$0xff] }
 0x609   : > { %v3508_v15 = vmax.f32 %v3476_v27, %v3478_v11  ;;  %v3190_v2 = vadd.f32 %v3075_v60, %v10833_v55  ;;  %v10836_v27 = vld [vmem:[#allocation68_spill] sm:$0xff]  ;;  %v7125_v11 = vld [vmem:[%s10505_s3 + $0x134] sm:$0xf]  ;;  %v6508_v60 = vld [vmem:[%s10505_s3 + $0x138] sm:$0xf0]  ;;  %v3421_v55 = vmax.f32 %v3309_v53, 0.0 }
 0x60a   : > { %v2701_v47 = vadd.f32 %v10837_v8, %v10836_v27  ;;  %4141 = vmatpush.bf16.msra.mxu2 %v6507_v50  ;;  %v10842_v27 = vld [vmem:[#allocation4_spill] sm:$0xff] }
 0x60b   : > { %v3536_v9 = vpack.c.bf16 %v3508_v15, %v3508_v15  ;;  %v3308_v16 = vadd.f32 %v8918_v46, %v3190_v2  ;;  %4495 = vmatmul.bf16.gmra.mxu1 %v9499_v43  ;;  %v6511_v15 = vor.u32 %v7125_v11, %v6508_v60  ;;  %v10839_v2 = vld [vmem:[#allocation66_spill] sm:$0xff]  ;;  %v2704_v8 = vadd.f32 %v9487_v1, %v10842_v27 }
 0x60c   : > { %v3193_v21 = vadd.f32 %v2931_v32, %v10839_v2  ;;  %v2705_v11 = vadd.f32 %v9489_v36, %v10845_v24  ;;  %v6498_v2 = vld [vmem:[%s10505_s3 + $0x120] sm:$0xf]  ;;  %v7124_v36 = vld [vmem:[%s10505_s3 + $0x124] sm:$0xf0] }
 0x60d   : > { %v4315_v22 = vunpack.c.l.b16 %v3536_v9  ;;  %v3420_v62 = vmax.f32 %v3308_v16, 0.0  ;;  %4200 = vmatpush.bf16.msra.mxu3 %v6511_v15  ;;  %v9714_v9 = vpop.f32.mrf.mxu3 }
 0x60e   : > { %10840 = vst [vmem:[#allocation74_spill] sm:$0xff] %v9714_v9  ;;  %v3311_v3 = vadd.f32 %v8911_v18, %v3193_v21  ;;  %v6499_v21 = vor.u32 %v7124_v36, %v6498_v2 }
 0x60f   : > { %v3479_v35 = vmax.f32 %v3419_v63, %v3420_v62  ;;  %v9693_v54 = vpack.c.b16 %v4315_v22, %v4314_v45  ;;  %v10841_v45 = vld [vmem:[#allocation70_spill] sm:$0xff]  ;;  %v2933_v62 = vpop.f32.mrf.mxu0 }
 0x610   : > { %v3077_v29 = vpop.f32.mrf.mxu1  ;;  %v3423_v32 = vmax.f32 %v3311_v3, 0.0  ;;  %4142 = vmatpush.bf16.msra.mxu2 %v6499_v21 }
 0x611   : > { %10838 = vst [vmem:[#allocation76_spill] sm:$0xff] %v9693_v54  ;;  %v3192_v23 = vadd.f32 %v3077_v29, %v2701_v47  ;;  %3939 = vmatmul.bf16.gmra.mxu2 %v9074_v61  ;;  %3998 = vmatmul.bf16.gmra.mxu3 %v9074_v61  ;;  %v3195_v29 = vadd.f32 %v2933_v62, %v2704_v8 }
 0x613   : > { %v3310_v17 = vadd.f32 %v8918_v46, %v3192_v23  ;;  %v9723_v23 = vpop.f32.mrf.mxu2 }
 0x614   : > { %4451 = vmatmul.bf16.gmra.mxu0 %v9693_v54  ;;  %10843 = vst [vmem:[#allocation75_spill] sm:$0xff] %v9723_v23 }
 0x615   : > { %v3422_v39 = vmax.f32 %v3310_v17, 0.0  ;;  %v9725_v6 = vpop.f32.mrf.mxu3  ;;  %v3313_v17 = vadd.f32 %v8911_v18, %v3195_v29  ;;  %v7123_v18 = vld [vmem:[%s10505_s3 + $0x124] sm:$0xf] }
 0x616   : > { %10844 = vst [vmem:[#allocation6_spill] sm:$0xff] %v9725_v6  ;;  %v6660_v6 = vld [vmem:[%s10505_s3 + $0x228] sm:$0xf0] }
 0x617   : > { %v3480_v16 = vmax.f32 %v3421_v55, %v3422_v39  ;;  %v6500_v39 = vld [vmem:[%s10505_s3 + $0x128] sm:$0xf0] }
 0x618   : > { %v3080_v63 = vpop.f32.mrf.mxu1 }
 0x619   : > { %v3194_v22 = vadd.f32 %v3080_v63, %v10841_v45 }
 0x61b   : > { %v3312_v47 = vadd.f32 %v8918_v46, %v3194_v22  ;;  %4500 = vmatmul.bf16.gmra.mxu1 %v9557_v41  ;;  %v9745_v45 = vpop.f32.mrf.mxu2 }
 0x61c   : > { %10846 = vst [vmem:[#allocation5_spill] sm:$0xff] %v9745_v45 }
 0x61d   : > { %v3424_v53 = vmax.f32 %v3312_v47, 0.0  ;;  %v9747_v22 = vpop.f32.mrf.mxu3 }
 0x61e   : > { %10847 = vst [vmem:[#allocation7_spill] sm:$0xff] %v9747_v22 }
 0x61f   : > { %v3481_v50 = vmax.f32 %v3423_v32, %v3424_v53 }
 0x620   : > { %v3082_v60 = vpop.f32.mrf.mxu1 }
 0x621   : > { %v3196_v15 = vadd.f32 %v3082_v60, %v2705_v11  ;;  %3944 = vmatmul.bf16.gmra.mxu2 %v9100_v12  ;;  %4003 = vmatmul.bf16.gmra.mxu3 %v9100_v12  ;;  %v3509_v1 = vmax.f32 %v3479_v35, %v3481_v50  ;;  %v3425_v35 = vmax.f32 %v3313_v17, 0.0  ;;  %v7122_v11 = vld [vmem:[%s10505_s3 + $0x114] sm:$0xf0]  ;;  %v7121_v50 = vld [vmem:[%s10505_s3 + $0x114] sm:$0xf] }
 0x622   : > { %v6492_v17 = vld [vmem:[%s10505_s3 + $0x118] sm:$0xf0] }
 0x623   : > { %v3314_v55 = vadd.f32 %v8918_v46, %v3196_v15  ;;  %v6503_v46 = vor.u32 %v7123_v18, %v6500_v39  ;;  %v3537_v27 = vpack.c.bf16 %v3509_v1, %v3509_v1  ;;  %v9752_v53 = vpop.f32.mrf.mxu2  ;;  %v6482_v39 = vld [vmem:[%s10505_s3 + $0x100] sm:$0xf] }
 0x624   : > { %10849 = vst [vmem:[#allocation8_spill] sm:$0xff] %v9752_v53 }
 0x625   : > { %v3426_v63 = vmax.f32 %v3314_v55, 0.0  ;;  %4201 = vmatpush.bf16.msra.mxu3 %v6503_v46  ;;  %v4575_v47 = vunpack.c.l.b16 %v3537_v27  ;;  %v9754_v24 = vpop.f32.mrf.mxu3  ;;  %v6495_v55 = vor.u32 %v7121_v50, %v6492_v17  ;;  %v7165_v50 = vld [vmem:[%s10505_s3 + $0x274] sm:$0xf]  ;;  %v6700_v17 = vld [vmem:[%s10505_s3 + $0x278] sm:$0xf0] }
 0x626   : > { %10850 = vst [vmem:[#allocation11_spill] sm:$0xff] %v9754_v24 }
 0x627   : > { %v3482_v3 = vmax.f32 %v3425_v35, %v3426_v63  ;;  %v7120_v35 = vld [vmem:[%s10505_s3 + $0x104] sm:$0xf0]  ;;  %v7119_v63 = vld [vmem:[%s10505_s3 + $0x104] sm:$0xf] }
 0x628   : > { %v6483_v46 = vor.u32 %v7120_v35, %v6482_v39 }
 0x629   : > { %v3510_v62 = vmax.f32 %v3480_v16, %v3482_v3  ;;  %v6490_v16 = vld [vmem:[%s10505_s3 + $0x110] sm:$0xf]  ;;  %4202 = vmatpush.bf16.msra.mxu3 %v6495_v55  ;;  %v6484_v3 = vld [vmem:[%s10505_s3 + $0x108] sm:$0xf0]  ;;  %v6703_v55 = vor.u32 %v7165_v50, %v6700_v17  ;;  %v7163_v50 = vld [vmem:[%s10505_s3 + $0x264] sm:$0xf] }
 0x62a   : > { %v6491_v60 = vor.u32 %v7122_v11, %v6490_v16  ;;  %v6698_v16 = vld [vmem:[%s10505_s3 + $0x270] sm:$0xf]  ;;  %v7166_v11 = vld [vmem:[%s10505_s3 + $0x274] sm:$0xf0]  ;;  %v6692_v17 = vld [vmem:[%s10505_s3 + $0x268] sm:$0xf0] }
 0x62b   : > { %4505 = vmatmul.bf16.gmra.mxu1 %v9623_v58  ;;  %v3538_v8 = vpack.c.bf16 %v3510_v62, %v3510_v62  ;;  %v9770_v15 = vpop.f32.mrf.mxu2  ;;  %v6487_v62 = vor.u32 %v7119_v63, %v6484_v3 }
 0x62c   : > { %10851 = vst [vmem:[#allocation10_spill] sm:$0xff] %v9770_v15  ;;  %4143 = vmatpush.bf16.msra.mxu2 %v6491_v60  ;;  %v6699_v60 = vor.u32 %v7166_v11, %v6698_v16  ;;  %v6690_v16 = vld [vmem:[%s10505_s3 + $0x260] sm:$0xf]  ;;  %v7164_v11 = vld [vmem:[%s10505_s3 + $0x264] sm:$0xf0] }
 0x62d   : > { %v4576_v32 = vunpack.c.l.b16 %v3538_v8  ;;  %v9772_v1 = vpop.f32.mrf.mxu3  ;;  %4203 = vmatpush.bf16.msra.mxu3 %v6487_v62 }
 0x62e   : > { %10852 = vst [vmem:[#allocation13_spill] sm:$0xff] %v9772_v1 }
 0x62f   : > { %v9750_v29 = vpack.c.b16 %v4576_v32, %v4575_v47 }
 0x630   : > { %4144 = vmatpush.bf16.msra.mxu2 %v6483_v46 }
 0x631   : > { %10848 = vst [vmem:[#allocation9_spill] sm:$0xff] %v9750_v29  ;;  %3949 = vmatmul.bf16.gmra.mxu2 %v9138_v44  ;;  %4008 = vmatmul.bf16.gmra.mxu3 %v9138_v44 }
 0x632   : > { %4718 = vmatpush.bf16.msrb.mxu3 %v6703_v55  ;;  %v6695_v55 = vor.u32 %v7163_v50, %v6692_v17  ;;  %v7161_v50 = vld [vmem:[%s10505_s3 + $0x254] sm:$0xf] }
 0x634   : > { %v9777_v2 = vpop.f32.mrf.mxu2  ;;  %4659 = vmatpush.bf16.msrb.mxu2 %v6699_v60  ;;  %v6691_v60 = vor.u32 %v7164_v11, %v6690_v16  ;;  %v6682_v16 = vld [vmem:[%s10505_s3 + $0x250] sm:$0xf]  ;;  %v7162_v11 = vld [vmem:[%s10505_s3 + $0x254] sm:$0xf0] }
 0x635   : > { %10853 = vst [vmem:[#allocation12_spill] sm:$0xff] %v9777_v2  ;;  %v9779_v36 = vpop.f32.mrf.mxu3 }
 0x636   : > { %10854 = vst [vmem:[#allocation15_spill] sm:$0xff] %v9779_v36  ;;  %4719 = vmatpush.bf16.msrb.mxu3 %v6695_v55 }
 0x638   : > { %4660 = vmatpush.bf16.msrb.mxu2 %v6691_v60  ;;  %v6683_v60 = vor.u32 %v7162_v11, %v6682_v16 }
 0x63b   : > { %4510 = vmatmul.bf16.gmra.mxu1 %v9693_v54 }
 0x63c   : > { %v9781_v18 = vpop.f32.mrf.mxu2  ;;  %4661 = vmatpush.bf16.msrb.mxu2 %v6683_v60  ;;  %v7160_v60 = vld [vmem:[%s10505_s3 + $0x244] sm:$0xf0] }
 0x63d   : > { %10855 = vst [vmem:[#allocation17_spill] sm:$0xff] %v9781_v18  ;;  %v9783_v21 = vpop.f32.mrf.mxu3 }
 0x63e   : > { %10856 = vst [vmem:[#allocation21_spill] sm:$0xff] %v9783_v21 }
 0x641   : > { %3954 = vmatmul.bf16.gmra.mxu2 %v9225_v19  ;;  %4013 = vmatmul.bf16.gmra.mxu3 %v9225_v19 }
 0x651   : > { %3959 = vmatmul.bf16.gmra.mxu2 %v9340_v13  ;;  %4018 = vmatmul.bf16.gmra.mxu3 %v9340_v13 }
 0x654   : > { %v9799_v27 = vpop.f32.mrf.mxu2  ;;  %v9801_v8 = vpop.f32.mrf.mxu3 }
 0x655   : > { %10857 = vst [vmem:[#allocation19_spill] sm:$0xff] %v9799_v27 }
 0x656   : > { %10858 = vst [vmem:[#allocation14_spill] sm:$0xff] %v9801_v8 }
 0x65c   : > { %v9803_v47 = vpop.f32.mrf.mxu2  ;;  %v9805_v32 = vpop.f32.mrf.mxu3 }
 0x65d   : > { %10859 = vst [vmem:[#allocation24_spill] sm:$0xff] %v9803_v47 }
 0x65e   : > { %10860 = vst [vmem:[#allocation16_spill] sm:$0xff] %v9805_v32 }
 0x661   : > { %3964 = vmatmul.bf16.gmra.mxu2 %v9434_v26  ;;  %4023 = vmatmul.bf16.gmra.mxu3 %v9434_v26 }
 0x664   : > { %v9821_v39 = vpop.f32.mrf.mxu2  ;;  %v9823_v35 = vpop.f32.mrf.mxu3 }
 0x66c   : > { %v9825_v63 = vpop.f32.mrf.mxu2  ;;  %v9827_v46 = vpop.f32.mrf.mxu3 }
 0x671   : > { %3969 = vmatmul.bf16.gmra.mxu2 %v9499_v43  ;;  %4028 = vmatmul.bf16.gmra.mxu3 %v9499_v43 }
 0x674   : > { %v9831_v3 = vpop.f32.mrf.mxu2  ;;  %v9833_v62 = vpop.f32.mrf.mxu3 }
 0x67c   : > { %v9847_v21 = vpop.f32.mrf.mxu2  ;;  %v9849_v18 = vpop.f32.mrf.mxu3 }
 0x681   : > { %4145 = vmatmul.bf16.vlgmr.msra.gmra.mxu2 %v9048_v59  ;;  %4204 = vmatmul.bf16.vlgmr.msra.gmra.mxu3 %v9048_v59  ;;  %v6684_v59 = vld [vmem:[%s10505_s3 + $0x258] sm:$0xf0] }
 0x682   : > { %v6687_v17 = vor.u32 %v7161_v50, %v6684_v59  ;;  %v6674_v50 = vld [vmem:[%s10505_s3 + $0x240] sm:$0xf] }
 0x683   : > { %v6675_v59 = vor.u32 %v7160_v60, %v6674_v50  ;;  %v6666_v50 = vld [vmem:[%s10505_s3 + $0x230] sm:$0xf]  ;;  %v7157_v60 = vld [vmem:[%s10505_s3 + $0x234] sm:$0xf] }
 0x684   : > { %v9853_v29 = vpop.f32.mrf.mxu2  ;;  %v9855_v54 = vpop.f32.mrf.mxu3  ;;  %4720 = vmatpush.bf16.msrb.mxu3 %v6687_v17  ;;  %v6676_v17 = vld [vmem:[%s10505_s3 + $0x248] sm:$0xf0] }
 0x685   : > { %4662 = vmatpush.bf16.msrb.mxu2 %v6675_v59  ;;  %v6668_v59 = vld [vmem:[%s10505_s3 + $0x238] sm:$0xf0] }
 0x68c   : > { %v9869_v55 = vpop.f32.mrf.mxu2  ;;  %v9871_v32 = vpop.f32.mrf.mxu3 }
 0x691   : > { %4150 = vmatmul.bf16.gmra.mxu2 %v9074_v61  ;;  %4209 = vmatmul.bf16.gmra.mxu3 %v9074_v61  ;;  %v7159_v61 = vld [vmem:[%s10505_s3 + $0x244] sm:$0xf] }
 0x692   : > { %v6679_v27 = vor.u32 %v7159_v61, %v6676_v17  ;;  %v6671_v17 = vor.u32 %v7157_v60, %v6668_v59  ;;  %v6658_v60 = vld [vmem:[%s10505_s3 + $0x220] sm:$0xf]  ;;  %v7155_v59 = vld [vmem:[%s10505_s3 + $0x224] sm:$0xf] }
 0x694   : > { %v9875_v47 = vpop.f32.mrf.mxu2  ;;  %v9877_v8 = vpop.f32.mrf.mxu3  ;;  %4721 = vmatpush.bf16.msrb.mxu3 %v6679_v27  ;;  %v7158_v27 = vld [vmem:[%s10505_s3 + $0x234] sm:$0xf0] }
 0x695   : > { %v6667_v61 = vor.u32 %v7158_v27, %v6666_v50 }
 0x697   : > { %4663 = vmatpush.bf16.msrb.mxu2 %v6667_v61  ;;  %v7156_v61 = vld [vmem:[%s10505_s3 + $0x224] sm:$0xf0] }
 0x698   : > { %4722 = vmatpush.bf16.msrb.mxu3 %v6671_v17  ;;  %v6659_v17 = vor.u32 %v7156_v61, %v6658_v60  ;;  %v6650_v60 = vld [vmem:[%s10505_s3 + $0x210] sm:$0xf] }
 0x69b   : > { %4664 = vmatpush.bf16.msrb.mxu2 %v6659_v17 }
 0x69c   : > { %v9879_v16 = vpop.f32.mrf.mxu2  ;;  %v9881_v11 = vpop.f32.mrf.mxu3 }
 0x6a1   : > { %4155 = vmatmul.bf16.gmra.mxu2 %v9100_v12  ;;  %4214 = vmatmul.bf16.gmra.mxu3 %v9100_v12 }
 0x6a4   : > { %v9897_v36 = vpop.f32.mrf.mxu2  ;;  %v9899_v2 = vpop.f32.mrf.mxu3 }
 0x6ac   : > { %v9901_v1 = vpop.f32.mrf.mxu2  ;;  %v9903_v15 = vpop.f32.mrf.mxu3 }
 0x6b1   : > { %4160 = vmatmul.bf16.gmra.mxu2 %v9138_v44  ;;  %4219 = vmatmul.bf16.gmra.mxu3 %v9138_v44 }
 0x6b4   : > { %v9919_v24 = vpop.f32.mrf.mxu2  ;;  %v9921_v53 = vpop.f32.mrf.mxu3 }
 0x6bc   : > { %v9923_v22 = vpop.f32.mrf.mxu2  ;;  %v9925_v45 = vpop.f32.mrf.mxu3 }
 0x6bd   : > { %10861 = vst [vmem:[#allocation26_spill] sm:$0xff] %v9925_v45 }
 0x6c1   : > { %4165 = vmatmul.bf16.gmra.mxu2 %v9225_v19  ;;  %4224 = vmatmul.bf16.gmra.mxu3 %v9225_v19 }
 0x6c4   : > { %v9929_v50 = vpop.f32.mrf.mxu2  ;;  %v9931_v27 = vpop.f32.mrf.mxu3 }
 0x6c5   : > { %10862 = vst [vmem:[#allocation18_spill] sm:$0xff] %v9929_v50  ;;  %v6663_v50 = vor.u32 %v7155_v59, %v6660_v6  ;;  %v7154_v6 = vld [vmem:[%s10505_s3 + $0x214] sm:$0xf0]  ;;  %v6652_v59 = vld [vmem:[%s10505_s3 + $0x218] sm:$0xf0] }
 0x6c6   : > { %10863 = vst [vmem:[#allocation20_spill] sm:$0xff] %v9931_v27  ;;  %v6651_v61 = vor.u32 %v7154_v6, %v6650_v60 }
 0x6c7   : > { %4723 = vmatpush.bf16.msrb.mxu3 %v6663_v50  ;;  %v7153_v50 = vld [vmem:[%s10505_s3 + $0x214] sm:$0xf] }
 0x6c8   : > { %v6655_v17 = vor.u32 %v7153_v50, %v6652_v59  ;;  %4665 = vmatpush.bf16.msrb.mxu2 %v6651_v61  ;;  %v6642_v50 = vld [vmem:[%s10505_s3 + $0x200] sm:$0xf]  ;;  %v7152_v61 = vld [vmem:[%s10505_s3 + $0x204] sm:$0xf0]  ;;  %v7151_v59 = vld [vmem:[%s10505_s3 + $0x204] sm:$0xf] }
 0x6cb   : > { %4724 = vmatpush.bf16.msrb.mxu3 %v6655_v17  ;;  %v6643_v17 = vor.u32 %v7152_v61, %v6642_v50  ;;  %v3985_v50 = vadd.f32 %v9823_v35, %v9509_v7  ;;  %v3931_v7 = vadd.f32 %v9831_v3, %v9538_v30  ;;  %v3995_v3 = vadd.f32 %v9855_v54, %v9577_v42 }
 0x6cc   : > { %v9945_v27 = vpop.f32.mrf.mxu2  ;;  %v9947_v23 = vpop.f32.mrf.mxu3  ;;  %v3941_v42 = vadd.f32 %v9875_v47, %v9611_v25  ;;  %v4000_v54 = vadd.f32 %v9877_v8, %v9613_v34  ;;  %v3946_v34 = vadd.f32 %v9897_v36, %v9651_v33  ;;  %v4005_v8 = vadd.f32 %v9899_v2, %v9653_v31 }
 0x6cd   : > { %10864 = vst [vmem:[#allocation25_spill] sm:$0xff] %v9945_v27  ;;  %4666 = vmatpush.bf16.msrb.mxu2 %v6643_v17  ;;  %v3951_v31 = vadd.f32 %v9919_v24, %v9687_v38  ;;  %v4010_v2 = vadd.f32 %v9921_v53, %v9689_v57  ;;  %v10880_v57 = vld [vmem:[#allocation75_spill] sm:$0xff]  ;;  %v10881_v53 = vld [vmem:[#allocation18_spill] sm:$0xff] }
 0x6ce   : > { %10865 = vst [vmem:[#allocation28_spill] sm:$0xff] %v9947_v23  ;;  %v3956_v24 = vadd.f32 %v10881_v53, %v10880_v57 }
 0x6d1   : > { %4170 = vmatmul.bf16.gmra.mxu2 %v9340_v13  ;;  %4229 = vmatmul.bf16.gmra.mxu3 %v9340_v13 }
 0x6d4   : > { %v9951_v45 = vpop.f32.mrf.mxu2  ;;  %v9953_v9 = vpop.f32.mrf.mxu3 }
 0x6d5   : > { %10866 = vst [vmem:[#allocation29_spill] sm:$0xff] %v9951_v45 }
 0x6d6   : > { %10867 = vst [vmem:[#allocation22_spill] sm:$0xff] %v9953_v9 }
 0x6dc   : > { %v9967_v9 = vpop.f32.mrf.mxu2  ;;  %v9969_v45 = vpop.f32.mrf.mxu3 }
 0x6dd   : > { %10868 = vst [vmem:[#allocation30_spill] sm:$0xff] %v9967_v9 }
 0x6de   : > { %10869 = vst [vmem:[#allocation31_spill] sm:$0xff] %v9969_v45 }
 0x6e1   : > { %4175 = vmatmul.bf16.gmra.mxu2 %v9434_v26  ;;  %4234 = vmatmul.bf16.gmra.mxu3 %v9434_v26 }
 0x6e4   : > { %v9973_v23 = vpop.f32.mrf.mxu2  ;;  %v9975_v27 = vpop.f32.mrf.mxu3 }
 0x6e5   : > { %10870 = vst [vmem:[#allocation32_spill] sm:$0xff] %v9973_v23 }
 0x6e6   : > { %10871 = vst [vmem:[#allocation27_spill] sm:$0xff] %v9975_v27  ;;  %v6644_v27 = vld [vmem:[%s10505_s3 + $0x208] sm:$0xf0] }
 0x6ec   : > { %v9977_v60 = vpop.f32.mrf.mxu2  ;;  %v9979_v6 = vpop.f32.mrf.mxu3 }
 0x6ed   : > { %10872 = vst [vmem:[#allocation23_spill] sm:$0xff] %v9977_v60  ;;  %v6647_v60 = vor.u32 %v7151_v59, %v6644_v27  ;;  %v3926_v27 = vadd.f32 %v9821_v39, %v9507_v52  ;;  %v3990_v39 = vadd.f32 %v9833_v62, %v9540_v49  ;;  %v3936_v49 = vadd.f32 %v9853_v29, %v9575_v20 }
 0x6ee   : > { %10873 = vst [vmem:[#allocation77_spill] sm:$0xff] %v9979_v6 }
 0x6ef   : > { %4725 = vmatpush.bf16.msrb.mxu3 %v6647_v60 }
 0x6f1   : > { %4180 = vmatmul.bf16.gmra.mxu2 %v9499_v43  ;;  %4239 = vmatmul.bf16.gmra.mxu3 %v9499_v43 }
 0x6f4   : > { %v9995_v6 = vpop.f32.mrf.mxu2  ;;  %v9997_v23 = vpop.f32.mrf.mxu3 }
 0x6f5   : > { %10874 = vst [vmem:[#allocation37_spill] sm:$0xff] %v9995_v6 }
 0x6f6   : > { %10875 = vst [vmem:[#allocation33_spill] sm:$0xff] %v9997_v23 }
 0x6fc   : > { %v9999_v45 = vpop.f32.mrf.mxu2  ;;  %v10001_v9 = vpop.f32.mrf.mxu3 }
 0x6fd   : > { %10876 = vst [vmem:[#allocation79_spill] sm:$0xff] %v9999_v45  ;;  %v3928_v45 = vadd.f32 %v9825_v63, %v9528_v10 }
 0x6fe   : > { %10877 = vst [vmem:[#allocation35_spill] sm:$0xff] %v10001_v9  ;;  %v3987_v9 = vadd.f32 %v9827_v46, %v9530_v28 }
 0x701   : > { %4185 = vmatmul.bf16.gmra.mxu2 %v9557_v41  ;;  %4244 = vmatmul.bf16.gmra.mxu3 %v9557_v41 }
 0x704   : > { %v4146_v61 = vpop.f32.mrf.mxu2  ;;  %v4205_v60 = vpop.f32.mrf.mxu3 }
 0x705   : > { %v10009_v59 = vadd.f32 %v4146_v61, %v3926_v27  ;;  %v10011_v17 = vadd.f32 %v4205_v60, %v3985_v50  ;;  %v3997_v27 = vadd.f32 %v9871_v32, %v9603_v56  ;;  %v3943_v32 = vadd.f32 %v9879_v16, %v9637_v5 }
 0x706   : > { %v4002_v60 = vadd.f32 %v9881_v11, %v9642_v40  ;;  %v3948_v11 = vadd.f32 %v9901_v1, %v9675_v4 }
 0x70c   : > { %v4148_v23 = vpop.f32.mrf.mxu2  ;;  %v4207_v6 = vpop.f32.mrf.mxu3 }
 0x70d   : > { %v10017_v41 = vadd.f32 %v4148_v23, %v3928_v45  ;;  %v10019_v52 = vadd.f32 %v4207_v6, %v3987_v9  ;;  %v3933_v9 = vadd.f32 %v9847_v21, %v9551_v37  ;;  %v3992_v23 = vadd.f32 %v9849_v18, %v9553_v51 }
 0x70e   : > { %v3938_v18 = vadd.f32 %v9869_v55, %v9601_v0 }
 0x711   : > { %4190 = vmatmul.bf16.gmra.mxu2 %v9623_v58  ;;  %4249 = vmatmul.bf16.gmra.mxu3 %v9623_v58 }
 0x714   : > { %v4151_v10 = vpop.f32.mrf.mxu2  ;;  %v4210_v35 = vpop.f32.mrf.mxu3 }
 0x715   : > { %v10027_v63 = vadd.f32 %v4151_v10, %v3931_v7  ;;  %v10029_v28 = vadd.f32 %v4210_v35, %v3990_v39  ;;  %v4007_v10 = vadd.f32 %v9903_v15, %v9677_v48  ;;  %v3953_v15 = vadd.f32 %v9923_v22, %v9712_v14 }
 0x71c   : > { %v4153_v45 = vpop.f32.mrf.mxu2  ;;  %v4212_v46 = vpop.f32.mrf.mxu3 }
 0x71d   : > { %v10035_v6 = vadd.f32 %v4153_v45, %v3933_v9  ;;  %v10037_v30 = vadd.f32 %v4212_v46, %v3992_v23  ;;  %v10878_v23 = vld [vmem:[#allocation74_spill] sm:$0xff] }
 0x71e   : > { %v10879_v45 = vld [vmem:[#allocation26_spill] sm:$0xff] }
 0x71f   : > { %v4012_v46 = vadd.f32 %v10879_v45, %v10878_v23  ;;  %v10893_v23 = vld [vmem:[#allocation30_spill] sm:$0xff] }
 0x721   : > { %4667 = vmatmul.bf16.vlgmr.msrb.gmra.mxu2 %v9100_v12  ;;  %4726 = vmatmul.bf16.vlgmr.msrb.gmra.mxu3 %v9100_v12 }
 0x724   : > { %v4156_v37 = vpop.f32.mrf.mxu2  ;;  %v4215_v21 = vpop.f32.mrf.mxu3 }
 0x725   : > { %v10045_v62 = vadd.f32 %v4156_v37, %v3936_v49  ;;  %v10047_v51 = vadd.f32 %v4215_v21, %v3995_v3  ;;  %v10882_v37 = vld [vmem:[#allocation6_spill] sm:$0xff]  ;;  %v10883_v21 = vld [vmem:[#allocation20_spill] sm:$0xff] }
 0x72c   : > { %v4158_v50 = vpop.f32.mrf.mxu2  ;;  %v4217_v12 = vpop.f32.mrf.mxu3 }
 0x72d   : > { %v10053_v61 = vadd.f32 %v4158_v50, %v3938_v18  ;;  %v10055_v20 = vadd.f32 %v4217_v12, %v3997_v27  ;;  %v4015_v18 = vadd.f32 %v10883_v21, %v10882_v37  ;;  %v10884_v12 = vld [vmem:[#allocation5_spill] sm:$0xff]  ;;  %v7182_v37 = vld [vmem:[%s10507_s5 + $0x78] sm:$0xff] }
 0x72e   : > { %5030 = vmatpush.bf16.msra.mxu0 %v7182_v37  ;;  %v10896_v21 = vld [vmem:[#allocation73_spill] sm:$0xff] }
 0x731   : > { %4672 = vmatmul.bf16.gmra.mxu2 %v9138_v44  ;;  %4731 = vmatmul.bf16.gmra.mxu3 %v9138_v44 }
 0x734   : > { %v4161_v0 = vpop.f32.mrf.mxu2  ;;  %v4220_v29 = vpop.f32.mrf.mxu3 }
 0x735   : > { %v10063_v55 = vadd.f32 %v4161_v0, %v3941_v42  ;;  %v10065_v56 = vadd.f32 %v4220_v29, %v4000_v54  ;;  %v10885_v42 = vld [vmem:[#allocation25_spill] sm:$0xff]  ;;  %v10886_v0 = vld [vmem:[#allocation7_spill] sm:$0xff]  ;;  %v10887_v29 = vld [vmem:[#allocation28_spill] sm:$0xff] }
 0x736   : > { %v3958_v54 = vadd.f32 %v10885_v42, %v10884_v12  ;;  %v10899_v42 = vld [vmem:[#allocation15_spill] sm:$0xff] }
 0x73c   : > { %v4163_v7 = vpop.f32.mrf.mxu2  ;;  %v4222_v44 = vpop.f32.mrf.mxu3 }
 0x73d   : > { %v10071_v39 = vadd.f32 %v4163_v7, %v3943_v32  ;;  %v10073_v25 = vadd.f32 %v4222_v44, %v4002_v60  ;;  %v4017_v32 = vadd.f32 %v10887_v29, %v10886_v0 }
 0x741   : > { %4677 = vmatmul.bf16.gmra.mxu2 %v9225_v19  ;;  %4736 = vmatmul.bf16.gmra.mxu3 %v9225_v19 }
 0x744   : > { %v4166_v5 = vpop.f32.mrf.mxu2  ;;  %v4225_v47 = vpop.f32.mrf.mxu3 }
 0x745   : > { %v10081_v16 = vadd.f32 %v4166_v5, %v3946_v34  ;;  %v10083_v40 = vadd.f32 %v4225_v47, %v4005_v8  ;;  %v10888_v34 = vld [vmem:[#allocation8_spill] sm:$0xff]  ;;  %v10889_v8 = vld [vmem:[#allocation29_spill] sm:$0xff]  ;;  %v10890_v47 = vld [vmem:[#allocation11_spill] sm:$0xff] }
 0x746   : > { %v3961_v5 = vadd.f32 %v10889_v8, %v10888_v34 }
 0x74c   : > { %v4168_v35 = vpop.f32.mrf.mxu2  ;;  %v4227_v19 = vpop.f32.mrf.mxu3 }
 0x74d   : > { %v10089_v9 = vadd.f32 %v4168_v35, %v3948_v11  ;;  %v10091_v33 = vadd.f32 %v4227_v19, %v4007_v10  ;;  %v10891_v11 = vld [vmem:[#allocation22_spill] sm:$0xff] }
 0x74e   : > { %v4020_v10 = vadd.f32 %v10891_v11, %v10890_v47 }
 0x751   : > { %4682 = vmatmul.bf16.gmra.mxu2 %v9340_v13  ;;  %4741 = vmatmul.bf16.gmra.mxu3 %v9340_v13 }
 0x754   : > { %v4171_v4 = vpop.f32.mrf.mxu2  ;;  %v4230_v1 = vpop.f32.mrf.mxu3 }
 0x755   : > { %v10099_v36 = vadd.f32 %v4171_v4, %v3951_v31  ;;  %v10101_v48 = vadd.f32 %v4230_v1, %v4010_v2  ;;  %v4407_v4 = vpop.f32.mrf.mxu0  ;;  %v4466_v1 = vpop.f32.mrf.mxu1 }
 0x75c   : > { %v4173_v49 = vpop.f32.mrf.mxu2  ;;  %v4232_v13 = vpop.f32.mrf.mxu3 }
 0x75d   : > { %v10107_v3 = vadd.f32 %v4173_v49, %v3953_v15  ;;  %v10109_v38 = vadd.f32 %v4232_v13, %v4012_v46  ;;  %v10892_v15 = vld [vmem:[#allocation10_spill] sm:$0xff]  ;;  %v10894_v46 = vld [vmem:[#allocation13_spill] sm:$0xff]  ;;  %v10895_v49 = vld [vmem:[#allocation31_spill] sm:$0xff] }
 0x75e   : > { %v3963_v45 = vadd.f32 %v10893_v23, %v10892_v15  ;;  %v10902_v15 = vld [vmem:[#allocation37_spill] sm:$0xff] }
 0x761   : > { %4687 = vmatmul.bf16.gmra.mxu2 %v9434_v26  ;;  %4746 = vmatmul.bf16.gmra.mxu3 %v9434_v26 }
 0x764   : > { %v4176_v14 = vpop.f32.mrf.mxu2  ;;  %v4235_v22 = vpop.f32.mrf.mxu3 }
 0x765   : > { %v10117_v27 = vadd.f32 %v4176_v14, %v3956_v24  ;;  %v10119_v50 = vadd.f32 %v4235_v22, %v4015_v18  ;;  %v7174_v18 = vld [vmem:[%s10507_s5 + $0x38] sm:$0xff]  ;;  %v10897_v14 = vld [vmem:[#allocation12_spill] sm:$0xff] }
 0x766   : > { %v10898_v22 = vld [vmem:[#allocation32_spill] sm:$0xff]  ;;  %5098 = vmatpush.bf16.msrb.mxu1 %v7174_v18 }
 0x767   : > { %v3966_v12 = vadd.f32 %v10898_v22, %v10897_v14  ;;  %v7172_v18 = vld [vmem:[%s10507_s5 + $0x28] sm:$0xff] }
 0x76c   : > { %v4178_v60 = vpop.f32.mrf.mxu2  ;;  %v4237_v26 = vpop.f32.mrf.mxu3 }
 0x76d   : > { %v10125_v7 = vadd.f32 %v4178_v60, %v3958_v54  ;;  %v10127_v44 = vadd.f32 %v4237_v26, %v4017_v32  ;;  %v10900_v54 = vld [vmem:[#allocation27_spill] sm:$0xff]  ;;  %v4409_v60 = vpop.f32.mrf.mxu0  ;;  %v4468_v26 = vpop.f32.mrf.mxu1 }
 0x76e   : > { %v4025_v0 = vadd.f32 %v10900_v54, %v10899_v42  ;;  %v10905_v42 = vld [vmem:[#allocation24_spill] sm:$0xff]  ;;  %v10906_v54 = vld [vmem:[#allocation79_spill] sm:$0xff] }
 0x771   : > { %4692 = vmatmul.bf16.gmra.mxu2 %v9499_v43  ;;  %4751 = vmatmul.bf16.gmra.mxu3 %v9499_v43  ;;  %v4022_v43 = vadd.f32 %v10895_v49, %v10894_v46  ;;  %v10904_v46 = vld [vmem:[#allocation33_spill] sm:$0xff] }
 0x774   : > { %v4181_v35 = vpop.f32.mrf.mxu2  ;;  %v4240_v19 = vpop.f32.mrf.mxu3 }
 0x775   : > { %v10135_v31 = vadd.f32 %v4181_v35, %v3961_v5  ;;  %v10137_v2 = vadd.f32 %v4240_v19, %v4020_v10  ;;  %v10167_v11 = vpop.f32.mrf.mxu0  ;;  %v10169_v10 = vpop.f32.mrf.mxu1  ;;  %v7173_v35 = vld [vmem:[%s10507_s5 + $0x30] sm:$0xff]  ;;  %v10901_v19 = vld [vmem:[#allocation19_spill] sm:$0xff] }
 0x776   : > { %v3971_v23 = vadd.f32 %v10902_v15, %v10901_v19  ;;  %5099 = vmatpush.bf16.msrb.mxu1 %v7173_v35 }
 0x77a   : > { %5100 = vmatpush.bf16.msrb.mxu1 %v7172_v18  ;;  %v4516_v18 = vadd.f32 %v4407_v4, %v10009_v59 }
 0x77c   : > { %v4183_v13 = vpop.f32.mrf.mxu2  ;;  %v4242_v57 = vpop.f32.mrf.mxu3 }
 0x77d   : > { %v10143_v53 = vadd.f32 %v4183_v13, %v3963_v45  ;;  %v10145_v24 = vadd.f32 %v4242_v57, %v4022_v43  ;;  %v10903_v45 = vld [vmem:[#allocation14_spill] sm:$0xff]  ;;  %v7181_v13 = vld [vmem:[%s10507_s5 + $0x70] sm:$0xff]  ;;  %v10193_v14 = vpop.f32.mrf.mxu0  ;;  %v10195_v22 = vpop.f32.mrf.mxu1 }
 0x77e   : > { %v4030_v49 = vadd.f32 %v10904_v46, %v10903_v45  ;;  %v7206_v43 = vld [vmem:[%s10507_s5 + $0x138] sm:$0xff]  ;;  %5031 = vmatpush.bf16.msra.mxu0 %v7181_v13  ;;  %v7169_v13 = vld [vmem:[%s10507_s5 + $0x10] sm:$0xff] }
 0x77f   : > { %5357 = vmatpush.bf16.msra.mxu2 %v7206_v43  ;;  %v7170_v46 = vld [vmem:[%s10507_s5 + $0x18] sm:$0xff]  ;;  %v10909_v43 = vld [vmem:[#allocation76_spill] sm:$0xff] }
 0x781   : > { %4697 = vmatmul.bf16.gmra.mxu2 %v10896_v21  ;;  %4756 = vmatmul.bf16.gmra.mxu3 %v10896_v21 }
 0x784   : > { %v4186_v29 = vpop.f32.mrf.mxu2  ;;  %v4245_v32 = vpop.f32.mrf.mxu3 }
 0x785   : > { %v10159_v34 = vadd.f32 %v4186_v29, %v3966_v12  ;;  %v10161_v8 = vadd.f32 %v4245_v32, %v4025_v0  ;;  %v7171_v12 = vld [vmem:[%s10507_s5 + $0x20] sm:$0xff]  ;;  %v3973_v0 = vadd.f32 %v10906_v54, %v10905_v42  ;;  %v10907_v29 = vld [vmem:[#allocation16_spill] sm:$0xff]  ;;  %v4517_v42 = vadd.f32 %v4466_v1, %v10011_v17 }
 0x786   : > { %v10908_v32 = vld [vmem:[#allocation35_spill] sm:$0xff]  ;;  %5101 = vmatpush.bf16.msrb.mxu1 %v7171_v12 }
 0x787   : > { %v4032_v35 = vadd.f32 %v10908_v32, %v10907_v29  ;;  %v7167_v17 = vld [vmem:[%s10507_s5] sm:$0xff] }
 0x78a   : > { %5102 = vmatpush.bf16.msrb.mxu1 %v7170_v46 }
 0x78c   : > { %v10163_v5 = vpop.f32.mrf.mxu2  ;;  %v10165_v47 = vpop.f32.mrf.mxu3 }
 0x78e   : > { %5103 = vmatpush.bf16.msrb.mxu1 %v7169_v13  ;;  %v7205_v13 = vld [vmem:[%s10507_s5 + $0x130] sm:$0xff] }
 0x78f   : > { %5358 = vmatpush.bf16.msra.mxu2 %v7205_v13 }
 0x791   : > { %4702 = vmatmul.bf16.gmra.mxu2 %v9623_v58  ;;  %4761 = vmatmul.bf16.gmra.mxu3 %v9623_v58 }
 0x794   : > { %v4191_v58 = vpop.f32.mrf.mxu2  ;;  %v4250_v57 = vpop.f32.mrf.mxu3 }
 0x795   : > { %v10186_v37 = vadd.f32 %v4191_v58, %v3971_v23  ;;  %v10188_v21 = vadd.f32 %v4250_v57, %v4030_v49  ;;  %v4817_v49 = vld [vmem:[%s10506_s4] sm:$0x3]  ;;  %v10219_v58 = vpop.f32.mrf.mxu0  ;;  %v10221_v57 = vpop.f32.mrf.mxu1 }
 0x796   : > { %v10224_v12 = vperm.slane %v4817_v49, 0  ;;  %v10227_v54 = vperm.slane %v4817_v49, 1  ;;  %v4518_v49 = vadd.f32 %v4409_v60, %v10017_v41 }
 0x79c   : > { %v4193_v19 = vpop.f32.mrf.mxu2  ;;  %v4252_v15 = vpop.f32.mrf.mxu3 }
 0x79d   : > { %v10204_v23 = vadd.f32 %v4193_v19, %v3973_v0  ;;  %v10206_v45 = vadd.f32 %v4252_v15, %v4032_v35  ;;  %v7168_v19 = vld [vmem:[%s10507_s5 + $0x8] sm:$0xff] }
 0x79e   : > { %5104 = vmatpush.bf16.msrb.mxu1 %v7168_v19 }
 0x7a1   : > { %4707 = vmatmul.bf16.gmra.mxu2 %v10909_v43  ;;  %4766 = vmatmul.bf16.gmra.mxu3 %v10909_v43  ;;  %v4519_v43 = vadd.f32 %v4468_v26, %v10019_v52 }
 0x7a2   : > { %5105 = vmatpush.bf16.msrb.mxu1 %v7167_v17 }
 0x7a4   : > { %v4668_v0 = vpop.f32.mrf.mxu2  ;;  %v4727_v29 = vpop.f32.mrf.mxu3 }
 0x7a5   : > { %v4777_v32 = vadd.f32 %v4668_v0, %v4516_v18  ;;  %v4778_v35 = vadd.f32 %v4727_v29, %v4517_v42  ;;  %v7180_v18 = vld [vmem:[%s10507_s5 + $0x68] sm:$0xff]  ;;  %v10245_v29 = vpop.f32.mrf.mxu0 }
 0x7a6   : > { %5032 = vmatpush.bf16.msra.mxu0 %v7180_v18 }
 0x7a7   : > { %v4823_v15 = vadd.f32 %v10224_v12, %v4777_v32  ;;  %v4824_v46 = vadd.f32 %v10227_v54, %v4778_v35  ;;  %v10247_v32 = vpop.f32.mrf.mxu1 }
 0x7a9   : > { %v4863_v59 = vmax.f32 %v4823_v15, 0.0  ;;  %v4864_v4 = vmax.f32 %v4824_v46, 0.0  ;;  %v10910_v15 = vld [vmem:[#allocation9_spill] sm:$0xff] }
 0x7ab   : > { %v4903_v1 = vmax.f32 %v4863_v59, %v4864_v4  ;;  %v4520_v59 = vadd.f32 %v10167_v11, %v10027_v63  ;;  %v4521_v4 = vadd.f32 %v10169_v10, %v10029_v28  ;;  %v7179_v63 = vld [vmem:[%s10507_s5 + $0x60] sm:$0xff]  ;;  %v4522_v28 = vadd.f32 %v10193_v14, %v10035_v6 }
 0x7ac   : > { %v4670_v42 = vpop.f32.mrf.mxu2  ;;  %v4729_v0 = vpop.f32.mrf.mxu3  ;;  %v4523_v10 = vadd.f32 %v10195_v22, %v10037_v30  ;;  %5033 = vmatpush.bf16.msra.mxu0 %v7179_v63  ;;  %v7204_v22 = vld [vmem:[%s10507_s5 + $0x128] sm:$0xff] }
 0x7ad   : > { %v4779_v35 = vadd.f32 %v4670_v42, %v4518_v49  ;;  %v4780_v19 = vadd.f32 %v4729_v0, %v4519_v43  ;;  %v10257_v18 = vpop.f32.mrf.mxu0  ;;  %5359 = vmatpush.bf16.msra.mxu2 %v7204_v22  ;;  %v7203_v22 = vld [vmem:[%s10507_s5 + $0x120] sm:$0xff] }
 0x7af   : > { %v4825_v41 = vadd.f32 %v10224_v12, %v4779_v35  ;;  %v4826_v52 = vadd.f32 %v10227_v54, %v4780_v19  ;;  %v10259_v42 = vpop.f32.mrf.mxu1 }
 0x7b1   : > { %v4865_v60 = vmax.f32 %v4825_v41, 0.0  ;;  %v4866_v26 = vmax.f32 %v4826_v52, 0.0  ;;  %4712 = vmatmul.bf16.gmra.mxu2 %v10910_v15  ;;  %4771 = vmatmul.bf16.gmra.mxu3 %v10910_v15 }
 0x7b2   : > { %5360 = vmatpush.bf16.msra.mxu2 %v7203_v22 }
 0x7b3   : > { %v4904_v46 = vmax.f32 %v4865_v60, %v4866_v26 }
 0x7b4   : > { %v4673_v17 = vpop.f32.mrf.mxu2  ;;  %v4732_v49 = vpop.f32.mrf.mxu3 }
 0x7b5   : > { %v4781_v43 = vadd.f32 %v4673_v17, %v4520_v59  ;;  %v4782_v13 = vadd.f32 %v4732_v49, %v4521_v4  ;;  %v7178_v4 = vld [vmem:[%s10507_s5 + $0x58] sm:$0xff] }
 0x7b6   : > { %5034 = vmatpush.bf16.msra.mxu0 %v7178_v4 }
 0x7b7   : > { %v4827_v0 = vadd.f32 %v10224_v12, %v4781_v43  ;;  %v4828_v35 = vadd.f32 %v10227_v54, %v4782_v13  ;;  %v10275_v43 = vpop.f32.mrf.mxu0  ;;  %v10277_v6 = vpop.f32.mrf.mxu1 }
 0x7b9   : > { %v4867_v19 = vmax.f32 %v4827_v0, 0.0  ;;  %v4868_v41 = vmax.f32 %v4828_v35, 0.0  ;;  %v4524_v0 = vadd.f32 %v10219_v58, %v10045_v62  ;;  %v4525_v35 = vadd.f32 %v10221_v57, %v10047_v51 }
 0x7bb   : > { %v4905_v11 = vmax.f32 %v4867_v19, %v4868_v41 }
 0x7bc   : > { %v4675_v52 = vpop.f32.mrf.mxu2  ;;  %v4734_v60 = vpop.f32.mrf.mxu3 }
 0x7bd   : > { %v4923_v26 = vmax.f32 %v4903_v1, %v4905_v11  ;;  %v4783_v15 = vadd.f32 %v4675_v52, %v4522_v28  ;;  %v4784_v59 = vadd.f32 %v4734_v60, %v4523_v10  ;;  %v7177_v1 = vld [vmem:[%s10507_s5 + $0x50] sm:$0xff]  ;;  %v7176_v52 = vld [vmem:[%s10507_s5 + $0x48] sm:$0xff] }
 0x7be   : > { %5035 = vmatpush.bf16.msra.mxu0 %v7177_v1 }
 0x7bf   : > { %v4829_v17 = vadd.f32 %v10224_v12, %v4783_v15  ;;  %v4830_v49 = vadd.f32 %v10227_v54, %v4784_v59  ;;  %v4933_v63 = vpack.c.bf16 %v4923_v26, %v4923_v26  ;;  %v4427_v26 = vpop.f32.mrf.mxu0  ;;  %v4486_v4 = vpop.f32.mrf.mxu1 }
 0x7c1   : > { %v4869_v30 = vmax.f32 %v4829_v17, 0.0  ;;  %v4870_v14 = vmax.f32 %v4830_v49, 0.0  ;;  %v5046_v58 = vunpack.c.l.b16 %v4933_v63 }
 0x7c2   : > { %5036 = vmatpush.bf16.msra.mxu0 %v7176_v52 }
 0x7c3   : > { %v4906_v13 = vmax.f32 %v4869_v30, %v4870_v14  ;;  %v4526_v30 = vadd.f32 %v10245_v29, %v10053_v61  ;;  %v4527_v14 = vadd.f32 %v10247_v32, %v10055_v20 }
 0x7c4   : > { %v4678_v19 = vpop.f32.mrf.mxu2  ;;  %v4737_v41 = vpop.f32.mrf.mxu3 }
 0x7c5   : > { %v4924_v11 = vmax.f32 %v4904_v46, %v4906_v13  ;;  %v4785_v28 = vadd.f32 %v4678_v19, %v4524_v0  ;;  %v4786_v10 = vadd.f32 %v4737_v41, %v4525_v35  ;;  %v7175_v46 = vld [vmem:[%s10507_s5 + $0x40] sm:$0xff]  ;;  %v7190_v19 = vld [vmem:[%s10507_s5 + $0xb8] sm:$0xff]  ;;  %v7189_v41 = vld [vmem:[%s10507_s5 + $0xb0] sm:$0xff] }
 0x7c6   : > { %5037 = vmatpush.bf16.msra.mxu0 %v7175_v46  ;;  %v4530_v46 = vadd.f32 %v10275_v43, %v10071_v39 }
 0x7c7   : > { %v4934_v60 = vpack.c.bf16 %v4924_v11, %v4924_v11  ;;  %v4831_v15 = vadd.f32 %v10224_v12, %v4785_v28  ;;  %v4832_v62 = vadd.f32 %v10227_v54, %v4786_v10  ;;  %v4528_v11 = vadd.f32 %v10257_v18, %v10063_v55 }
 0x7c8   : > { %v4529_v28 = vadd.f32 %v10259_v42, %v10065_v56  ;;  %v7187_v56 = vld [vmem:[%s10507_s5 + $0xa0] sm:$0xff] }
 0x7c9   : > { %v5047_v51 = vunpack.c.l.b16 %v4934_v60  ;;  %v4871_v57 = vmax.f32 %v4831_v15, 0.0  ;;  %v4872_v59 = vmax.f32 %v4832_v62, 0.0  ;;  %v4429_v60 = vpop.f32.mrf.mxu0  ;;  %v4488_v15 = vpop.f32.mrf.mxu1 }
 0x7ca   : > { %5183 = vmatpush.bf16.msrb.mxu0 %v7190_v19 }
 0x7cb   : > { %v5048_v17 = vpack.c.b16 %v5047_v51, %v5046_v58  ;;  %v4907_v49 = vmax.f32 %v4871_v57, %v4872_v59  ;;  %v7188_v51 = vld [vmem:[%s10507_s5 + $0xa8] sm:$0xff] }
 0x7cc   : > { %v4680_v1 = vpop.f32.mrf.mxu2  ;;  %v4739_v13 = vpop.f32.mrf.mxu3 }
 0x7cd   : > { %v4787_v0 = vadd.f32 %v4680_v1, %v4526_v30  ;;  %v4788_v35 = vadd.f32 %v4739_v13, %v4527_v14  ;;  %5106 = vmatmul.bf16.vlgmr.msrb.gmra.mxu1 %v5048_v17  ;;  %v4531_v17 = vadd.f32 %v10277_v6, %v10073_v25  ;;  %v7185_v25 = vld [vmem:[%s10507_s5 + $0x90] sm:$0xff] }
 0x7ce   : > { %5184 = vmatpush.bf16.msrb.mxu0 %v7189_v41 }
 0x7cf   : > { %v4833_v61 = vadd.f32 %v10224_v12, %v4787_v0  ;;  %v4834_v29 = vadd.f32 %v10227_v54, %v4788_v35  ;;  %v7186_v0 = vld [vmem:[%s10507_s5 + $0x98] sm:$0xff] }
 0x7d1   : > { %v4873_v20 = vmax.f32 %v4833_v61, 0.0  ;;  %v4874_v32 = vmax.f32 %v4834_v29, 0.0  ;;  %v4432_v35 = vpop.f32.mrf.mxu0  ;;  %v4491_v19 = vpop.f32.mrf.mxu1 }
 0x7d2   : > { %5185 = vmatpush.bf16.msrb.mxu0 %v7188_v51 }
 0x7d3   : > { %v4908_v63 = vmax.f32 %v4873_v20, %v4874_v32  ;;  %v4533_v20 = vadd.f32 %v4486_v4, %v10083_v40 }
 0x7d4   : > { %v4683_v10 = vpop.f32.mrf.mxu2  ;;  %v4742_v52 = vpop.f32.mrf.mxu3 }
 0x7d5   : > { %v4789_v62 = vadd.f32 %v4683_v10, %v4528_v11  ;;  %v4790_v58 = vadd.f32 %v4742_v52, %v4529_v28 }
 0x7d6   : > { %5186 = vmatpush.bf16.msrb.mxu0 %v7187_v56 }
 0x7d7   : > { %v4835_v57 = vadd.f32 %v10224_v12, %v4789_v62  ;;  %v4836_v59 = vadd.f32 %v10227_v54, %v4790_v58  ;;  %v7184_v62 = vld [vmem:[%s10507_s5 + $0x88] sm:$0xff] }
 0x7d9   : > { %v4875_v55 = vmax.f32 %v4835_v57, 0.0  ;;  %v4876_v18 = vmax.f32 %v4836_v59, 0.0 }
 0x7da   : > { %5187 = vmatpush.bf16.msrb.mxu0 %v7186_v0 }
 0x7db   : > { %v4909_v42 = vmax.f32 %v4875_v55, %v4876_v18 }
 0x7dc   : > { %v4685_v30 = vpop.f32.mrf.mxu2  ;;  %v4744_v14 = vpop.f32.mrf.mxu3 }
 0x7dd   : > { %v4925_v22 = vmax.f32 %v4907_v49, %v4909_v42  ;;  %v4791_v1 = vadd.f32 %v4685_v30, %v4530_v46  ;;  %v4792_v13 = vadd.f32 %v4744_v14, %v4531_v17  ;;  %v4532_v49 = vadd.f32 %v4427_v26, %v10081_v16  ;;  %v4434_v16 = vpop.f32.mrf.mxu0  ;;  %v4493_v26 = vpop.f32.mrf.mxu1  ;;  %v7202_v17 = vld [vmem:[%s10507_s5 + $0x118] sm:$0xff] }
 0x7de   : > { %5188 = vmatpush.bf16.msrb.mxu0 %v7185_v25  ;;  %v4534_v42 = vadd.f32 %v4429_v60, %v10089_v9  ;;  %v4535_v46 = vadd.f32 %v4488_v15, %v10091_v33  ;;  %5361 = vmatpush.bf16.msra.mxu2 %v7202_v17  ;;  %v7197_v15 = vld [vmem:[%s10507_s5 + $0xf0] sm:$0xff]  ;;  %v4537_v25 = vadd.f32 %v4491_v19, %v10101_v48  ;;  %v7195_v19 = vld [vmem:[%s10507_s5 + $0xe0] sm:$0xff] }
 0x7df   : > { %v4837_v61 = vadd.f32 %v10224_v12, %v4791_v1  ;;  %v4838_v29 = vadd.f32 %v10227_v54, %v4792_v13  ;;  %v4935_v11 = vpack.c.bf16 %v4925_v22, %v4925_v22  ;;  %v7198_v13 = vld [vmem:[%s10507_s5 + $0xf8] sm:$0xff] }
 0x7e0   : > { %5270 = vmatpush.bf16.msra.mxu1 %v7198_v13 }
 0x7e1   : > { %v4877_v39 = vmax.f32 %v4837_v61, 0.0  ;;  %v4878_v43 = vmax.f32 %v4838_v29, 0.0  ;;  %v4978_v40 = vunpack.c.l.b16 %v4935_v11  ;;  %v7196_v11 = vld [vmem:[%s10507_s5 + $0xe8] sm:$0xff] }
 0x7e2   : > { %5189 = vmatpush.bf16.msrb.mxu0 %v7184_v62  ;;  %v4539_v62 = vadd.f32 %v4493_v26, %v10109_v38  ;;  %v7193_v38 = vld [vmem:[%s10507_s5 + $0xd0] sm:$0xff] }
 0x7e3   : > { %v4910_v6 = vmax.f32 %v4877_v39, %v4878_v43  ;;  %v4536_v43 = vadd.f32 %v4432_v35, %v10099_v36 }
 0x7e4   : > { %v4688_v32 = vpop.f32.mrf.mxu2  ;;  %v4747_v41 = vpop.f32.mrf.mxu3  ;;  %5271 = vmatpush.bf16.msra.mxu1 %v7197_v15 }
 0x7e5   : > { %v4926_v28 = vmax.f32 %v4908_v63, %v4910_v6  ;;  %v4793_v10 = vadd.f32 %v4688_v32, %v4532_v49  ;;  %v4794_v52 = vadd.f32 %v4747_v41, %v4533_v20  ;;  %v7183_v63 = vld [vmem:[%s10507_s5 + $0x80] sm:$0xff]  ;;  %v4437_v61 = vpop.f32.mrf.mxu0  ;;  %v4496_v29 = vpop.f32.mrf.mxu1  ;;  %v7201_v6 = vld [vmem:[%s10507_s5 + $0x110] sm:$0xff] }
 0x7e6   : > { %5190 = vmatpush.bf16.msrb.mxu0 %v7183_v63  ;;  %5362 = vmatpush.bf16.msra.mxu2 %v7201_v6  ;;  %v7194_v63 = vld [vmem:[%s10507_s5 + $0xd8] sm:$0xff] }
 0x7e7   : > { %v4936_v58 = vpack.c.bf16 %v4926_v28, %v4926_v28  ;;  %v4839_v51 = vadd.f32 %v10224_v12, %v4793_v10  ;;  %v4840_v57 = vadd.f32 %v10227_v54, %v4794_v52  ;;  %v4538_v52 = vadd.f32 %v4434_v16, %v10107_v3 }
 0x7e8   : > { %5272 = vmatpush.bf16.msra.mxu1 %v7196_v11 }
 0x7e9   : > { %v4979_v4 = vunpack.c.l.b16 %v4936_v58  ;;  %v4879_v59 = vmax.f32 %v4839_v51, 0.0  ;;  %v4880_v55 = vmax.f32 %v4840_v57, 0.0 }
 0x7eb   : > { %v4980_v18 = vpack.c.b16 %v4979_v4, %v4978_v40  ;;  %v4911_v56 = vmax.f32 %v4879_v59, %v4880_v55 }
 0x7ec   : > { %v4690_v30 = vpop.f32.mrf.mxu2  ;;  %v4749_v14 = vpop.f32.mrf.mxu3  ;;  %5273 = vmatpush.bf16.msra.mxu1 %v7195_v19 }
 0x7ed   : > { %v4795_v22 = vadd.f32 %v4690_v30, %v4534_v42  ;;  %v4796_v1 = vadd.f32 %v4749_v14, %v4535_v46  ;;  %5038 = vmatmul.bf16.vlgmr.msra.gmra.mxu0 %v4980_v18  ;;  %v4439_v57 = vpop.f32.mrf.mxu0  ;;  %v4498_v40 = vpop.f32.mrf.mxu1  ;;  %v4541_v46 = vadd.f32 %v4496_v29, %v10119_v50 }
 0x7ef   : > { %v4841_v0 = vadd.f32 %v10224_v12, %v4795_v22  ;;  %v4842_v9 = vadd.f32 %v10227_v54, %v4796_v1 }
 0x7f0   : > { %5274 = vmatpush.bf16.msra.mxu1 %v7194_v63 }
 0x7f1   : > { %v4881_v33 = vmax.f32 %v4841_v0, 0.0  ;;  %v4882_v60 = vmax.f32 %v4842_v9, 0.0  ;;  %v7192_v0 = vld [vmem:[%s10507_s5 + $0xc8] sm:$0xff] }
 0x7f3   : > { %v4912_v39 = vmax.f32 %v4881_v33, %v4882_v60 }
 0x7f4   : > { %v4693_v49 = vpop.f32.mrf.mxu2  ;;  %v4752_v20 = vpop.f32.mrf.mxu3  ;;  %5275 = vmatpush.bf16.msra.mxu1 %v7193_v38 }
 0x7f5   : > { %v4797_v32 = vadd.f32 %v4693_v49, %v4536_v43  ;;  %v4798_v41 = vadd.f32 %v4752_v20, %v4537_v25  ;;  %v4442_v9 = vpop.f32.mrf.mxu0  ;;  %v4501_v33 = vpop.f32.mrf.mxu1  ;;  %v4542_v49 = vadd.f32 %v4439_v57, %v10125_v7  ;;  %v4543_v20 = vadd.f32 %v4498_v40, %v10127_v44 }
 0x7f7   : > { %v4843_v28 = vadd.f32 %v10224_v12, %v4797_v32  ;;  %v4844_v36 = vadd.f32 %v10227_v54, %v4798_v41  ;;  %v7200_v32 = vld [vmem:[%s10507_s5 + $0x108] sm:$0xff] }
 0x7f8   : > { %5276 = vmatpush.bf16.msra.mxu1 %v7192_v0  ;;  %5363 = vmatpush.bf16.msra.mxu2 %v7200_v32 }
 0x7f9   : > { %v4883_v48 = vmax.f32 %v4843_v28, 0.0  ;;  %v4884_v35 = vmax.f32 %v4844_v36, 0.0 }
 0x7fb   : > { %v4913_v10 = vmax.f32 %v4883_v48, %v4884_v35 }
 0x7fc   : > { %v4695_v58 = vpop.f32.mrf.mxu2  ;;  %v4754_v51 = vpop.f32.mrf.mxu3 }
 0x7fd   : > { %v4927_v4 = vmax.f32 %v4911_v56, %v4913_v10  ;;  %v4799_v59 = vadd.f32 %v4695_v58, %v4538_v52  ;;  %v4800_v55 = vadd.f32 %v4754_v51, %v4539_v62  ;;  %v4540_v56 = vadd.f32 %v4437_v61, %v10117_v27  ;;  %v4444_v19 = vpop.f32.mrf.mxu0  ;;  %v4503_v10 = vpop.f32.mrf.mxu1 }
 0x7fe   : > { %v4544_v62 = vadd.f32 %v4442_v9, %v10135_v31  ;;  %v4545_v58 = vadd.f32 %v4501_v33, %v10137_v2  ;;  %v4546_v38 = vadd.f32 %v4444_v19, %v10143_v53  ;;  %v10911_v9 = vld [vmem:[#allocation17_spill] sm:$0xff]  ;;  %v10912_v33 = vld [vmem:[#allocation23_spill] sm:$0xff] }
 0x7ff   : > { %v4845_v18 = vadd.f32 %v10224_v12, %v4799_v59  ;;  %v4846_v42 = vadd.f32 %v10227_v54, %v4800_v55  ;;  %v4937_v14 = vpack.c.bf16 %v4927_v4, %v4927_v4 }
 0x801   : > { %v4885_v3 = vmax.f32 %v4845_v18, 0.0  ;;  %v4886_v16 = vmax.f32 %v4846_v42, 0.0  ;;  %v5131_v50 = vunpack.c.l.b16 %v4937_v14 }
 0x803   : > { %v4914_v26 = vmax.f32 %v4885_v3, %v4886_v16 }
 0x804   : > { %v4698_v17 = vpop.f32.mrf.mxu2  ;;  %v4757_v30 = vpop.f32.mrf.mxu3 }
 0x805   : > { %v4928_v22 = vmax.f32 %v4912_v39, %v4914_v26  ;;  %v4801_v1 = vadd.f32 %v4698_v17, %v4540_v56  ;;  %v4802_v13 = vadd.f32 %v4757_v30, %v4541_v46  ;;  %v7191_v39 = vld [vmem:[%s10507_s5 + $0xc0] sm:$0xff]  ;;  %v4447_v42 = vpop.f32.mrf.mxu0  ;;  %v4506_v3 = vpop.f32.mrf.mxu1  ;;  %v4547_v26 = vadd.f32 %v4503_v10, %v10145_v24 }
 0x806   : > { %5277 = vmatpush.bf16.msra.mxu1 %v7191_v39  ;;  %v4548_v53 = vadd.f32 %v4447_v42, %v10159_v34  ;;  %v4549_v24 = vadd.f32 %v4506_v3, %v10161_v8 }
 0x807   : > { %v4938_v60 = vpack.c.bf16 %v4928_v22, %v4928_v22  ;;  %v4847_v15 = vadd.f32 %v10224_v12, %v4801_v1  ;;  %v4848_v27 = vadd.f32 %v10227_v54, %v4802_v13  ;;  %v7199_v13 = vld [vmem:[%s10507_s5 + $0x100] sm:$0xff] }
 0x808   : > { %5364 = vmatpush.bf16.msra.mxu2 %v7199_v13 }
 0x809   : > { %v5132_v61 = vunpack.c.l.b16 %v4938_v60  ;;  %v4887_v29 = vmax.f32 %v4847_v15, 0.0  ;;  %v4888_v43 = vmax.f32 %v4848_v27, 0.0  ;;  %v3968_v60 = vadd.f32 %v10912_v33, %v10911_v9  ;;  %v10913_v15 = vld [vmem:[#allocation21_spill] sm:$0xff] }
 0x80a   : > { %v10914_v27 = vld [vmem:[#allocation77_spill] sm:$0xff] }
 0x80b   : > { %v5133_v25 = vpack.c.b16 %v5132_v61, %v5131_v50  ;;  %v4915_v6 = vmax.f32 %v4887_v29, %v4888_v43  ;;  %v4027_v50 = vadd.f32 %v10914_v27, %v10913_v15  ;;  %v4289_v32 = vadd.f32 %v10163_v5, %v3968_v60 }
 0x80c   : > { %v4700_v41 = vpop.f32.mrf.mxu2  ;;  %v4759_v11 = vpop.f32.mrf.mxu3 }
 0x80d   : > { %v4803_v28 = vadd.f32 %v4700_v41, %v4542_v49  ;;  %v4804_v36 = vadd.f32 %v4759_v11, %v4543_v20  ;;  %5191 = vmatmul.bf16.vlgmr.msrb.gmra.mxu0 %v5133_v25  ;;  %v4449_v49 = vpop.f32.mrf.mxu0  ;;  %v4508_v20 = vpop.f32.mrf.mxu1  ;;  %v4290_v34 = vadd.f32 %v10165_v47, %v4027_v50 }
 0x80f   : > { %v4849_v48 = vadd.f32 %v10224_v12, %v4803_v28  ;;  %v4850_v35 = vadd.f32 %v10227_v54, %v4804_v36 }
 0x811   : > { %v4889_v7 = vmax.f32 %v4849_v48, 0.0  ;;  %v4890_v52 = vmax.f32 %v4850_v35, 0.0 }
 0x813   : > { %v4916_v44 = vmax.f32 %v4889_v7, %v4890_v52  ;;  %v4550_v7 = vadd.f32 %v4449_v49, %v4289_v32  ;;  %v4551_v52 = vadd.f32 %v4508_v20, %v4290_v34  ;;  %v7207_v49 = vld [vmem:[%s10509_s7] sm:$0xff] }
 0x814   : > { %v4703_v51 = vpop.f32.mrf.mxu2  ;;  %v4762_v57 = vpop.f32.mrf.mxu3 }
 0x815   : > { %v4805_v40 = vadd.f32 %v4703_v51, %v4544_v62  ;;  %v4806_v4 = vadd.f32 %v4762_v57, %v4545_v58 }
 0x817   : > { %v4851_v59 = vadd.f32 %v10224_v12, %v4805_v40  ;;  %v4852_v55 = vadd.f32 %v10227_v54, %v4806_v4  ;;  %v4452_v40 = vpop.f32.mrf.mxu0  ;;  %v4511_v4 = vpop.f32.mrf.mxu1 }
 0x818   : > { %v4552_v42 = vadd.f32 %v4452_v40, %v10186_v37  ;;  %v4553_v3 = vadd.f32 %v4511_v4, %v10188_v21 }
 0x819   : > { %v4891_v63 = vmax.f32 %v4851_v59, 0.0  ;;  %v4892_v18 = vmax.f32 %v4852_v55, 0.0 }
 0x81b   : > { %v4917_v16 = vmax.f32 %v4891_v63, %v4892_v18  ;;  %v7213_v63 = vld [vmem:[%s10509_s7 + $0x30] sm:$0xff] }
 0x81c   : > { %v4705_v31 = vpop.f32.mrf.mxu2  ;;  %v4764_v56 = vpop.f32.mrf.mxu3 }
 0x81d   : > { %v4929_v2 = vmax.f32 %v4915_v6, %v4917_v16  ;;  %v4807_v46 = vadd.f32 %v4705_v31, %v4546_v38  ;;  %v4808_v17 = vadd.f32 %v4764_v56, %v4547_v26  ;;  %v7212_v26 = vld [vmem:[%s10509_s7 + $0x28] sm:$0xff] }
 0x81f   : > { %v4853_v30 = vadd.f32 %v10224_v12, %v4807_v46  ;;  %v4854_v14 = vadd.f32 %v10227_v54, %v4808_v17  ;;  %v4939_v43 = vpack.c.bf16 %v4929_v2, %v4929_v2  ;;  %v4513_v37 = vpop.f32.mrf.mxu1 }
 0x821   : > { %v4893_v22 = vmax.f32 %v4853_v30, 0.0  ;;  %v4894_v1 = vmax.f32 %v4854_v14, 0.0  ;;  %v5218_v28 = vunpack.c.l.b16 %v4939_v43  ;;  %v4454_v14 = vpop.f32.mrf.mxu0 }
 0x822   : > { %v4554_v21 = vadd.f32 %v4454_v14, %v10204_v23 }
 0x823   : > { %v4918_v0 = vmax.f32 %v4893_v22, %v4894_v1  ;;  %v4555_v1 = vadd.f32 %v4513_v37, %v10206_v45  ;;  %v7211_v45 = vld [vmem:[%s10509_s7 + $0x20] sm:$0xff] }
 0x824   : > { %v4708_v61 = vpop.f32.mrf.mxu2  ;;  %v4767_v29 = vpop.f32.mrf.mxu3 }
 0x825   : > { %v4930_v39 = vmax.f32 %v4916_v44, %v4918_v0  ;;  %v4809_v25 = vadd.f32 %v4708_v61, %v4548_v53  ;;  %v4810_v6 = vadd.f32 %v4767_v29, %v4549_v24  ;;  %v7214_v44 = vld [vmem:[%s10509_s7 + $0x38] sm:$0xff] }
 0x826   : > { %5450 = vmatpush.bf16.msra.mxu3 %v7214_v44 }
 0x827   : > { %v4940_v8 = vpack.c.bf16 %v4930_v39, %v4930_v39  ;;  %v4855_v41 = vadd.f32 %v10224_v12, %v4809_v25  ;;  %v4856_v11 = vadd.f32 %v10227_v54, %v4810_v6  ;;  %v7208_v6 = vld [vmem:[%s10509_s7 + $0x8] sm:$0xff] }
 0x829   : > { %v5219_v36 = vunpack.c.l.b16 %v4940_v8  ;;  %v4895_v48 = vmax.f32 %v4855_v41, 0.0  ;;  %v4896_v35 = vmax.f32 %v4856_v11, 0.0  ;;  %v7222_v8 = vld [vmem:[%s10511_s9 + $0x38] sm:$0xff]  ;;  %v7221_v11 = vld [vmem:[%s10511_s9 + $0x30] sm:$0xff] }
 0x82a   : > { %5451 = vmatpush.bf16.msra.mxu3 %v7213_v63  ;;  %5535 = vmatpush.bf16.msra.mxu0 %v7222_v8 }
 0x82b   : > { %v5220_v19 = vpack.c.b16 %v5219_v36, %v5218_v28  ;;  %v4919_v10 = vmax.f32 %v4895_v48, %v4896_v35  ;;  %v7220_v28 = vld [vmem:[%s10511_s9 + $0x28] sm:$0xff]  ;;  %v7219_v35 = vld [vmem:[%s10511_s9 + $0x20] sm:$0xff] }
 0x82c   : > { %v4710_v5 = vpop.f32.mrf.mxu2  ;;  %v4769_v62 = vpop.f32.mrf.mxu3 }
 0x82d   : > { %v4811_v47 = vadd.f32 %v4710_v5, %v4550_v7  ;;  %v4812_v58 = vadd.f32 %v4769_v62, %v4551_v52  ;;  %5278 = vmatmul.bf16.vlgmr.msra.gmra.mxu1 %v5220_v19 }
 0x82e   : > { %5452 = vmatpush.bf16.msra.mxu3 %v7212_v26  ;;  %5536 = vmatpush.bf16.msra.mxu0 %v7221_v11  ;;  %v7215_v26 = vld [vmem:[%s10511_s9] sm:$0xff] }
 0x82f   : > { %v4857_v51 = vadd.f32 %v10224_v12, %v4811_v47  ;;  %v4858_v57 = vadd.f32 %v10227_v54, %v4812_v58 }
 0x831   : > { %v4897_v59 = vmax.f32 %v4857_v51, 0.0  ;;  %v4898_v55 = vmax.f32 %v4858_v57, 0.0  ;;  %v7253_v51 = vld [vmem:[%s10508_s6] ss:$0 sm:$0xff] }
 0x832   : > { %5453 = vmatpush.bf16.msra.mxu3 %v7211_v45  ;;  %5537 = vmatpush.bf16.msra.mxu0 %v7220_v28 }
 0x833   : > { %v4920_v18 = vmax.f32 %v4897_v59, %v4898_v55 }
 0x834   : > { %v4713_v16 = vpop.f32.mrf.mxu2  ;;  %v4772_v38 = vpop.f32.mrf.mxu3 }
 0x835   : > { %v4813_v31 = vadd.f32 %v4713_v16, %v4552_v42  ;;  %v4814_v56 = vadd.f32 %v4772_v38, %v4553_v3  ;;  %v7218_v3 = vld [vmem:[%s10511_s9 + $0x18] sm:$0xff]  ;;  %v7217_v16 = vld [vmem:[%s10511_s9 + $0x10] sm:$0xff]  ;;  %v7216_v38 = vld [vmem:[%s10511_s9 + $0x8] sm:$0xff] }
 0x836   : > { %5538 = vmatpush.bf16.msra.mxu0 %v7219_v35 }
 0x837   : > { %v4859_v2 = vadd.f32 %v10224_v12, %v4813_v31  ;;  %v4860_v46 = vadd.f32 %v10227_v54, %v4814_v56  ;;  %v7254_v56 = vld [vmem:[%s10510_s8] ss:$0 sm:$0xff] }
 0x839   : > { %v4899_v17 = vmax.f32 %v4859_v2, 0.0  ;;  %v4900_v30 = vmax.f32 %v4860_v46, 0.0 }
 0x83a   : > { %5539 = vmatpush.bf16.msra.mxu0 %v7218_v3 }
 0x83b   : > { %v4921_v22 = vmax.f32 %v4899_v17, %v4900_v30 }
 0x83c   : > { %v4715_v13 = vpop.f32.mrf.mxu2  ;;  %v4774_v0 = vpop.f32.mrf.mxu3 }
 0x83d   : > { %v4931_v53 = vmax.f32 %v4919_v10, %v4921_v22  ;;  %v4815_v24 = vadd.f32 %v4715_v13, %v4554_v21  ;;  %v4816_v9 = vadd.f32 %v4774_v0, %v4555_v1  ;;  %v7255_v22 = vld [vmem:[%s10512_s10] ss:$0 sm:$0xff] }
 0x83e   : > { %5540 = vmatpush.bf16.msra.mxu0 %v7217_v16 }
 0x83f   : > { %v4861_v33 = vadd.f32 %v10224_v12, %v4815_v24  ;;  %v4862_v60 = vadd.f32 %v10227_v54, %v4816_v9  ;;  %v4941_v61 = vpack.c.bf16 %v4931_v53, %v4931_v53  ;;  %v7210_v12 = vld [vmem:[%s10509_s7 + $0x18] sm:$0xff]  ;;  %v7209_v54 = vld [vmem:[%s10509_s7 + $0x10] sm:$0xff] }
 0x840   : > { %5454 = vmatpush.bf16.msra.mxu3 %v7210_v12 }
 0x841   : > { %v4901_v15 = vmax.f32 %v4861_v33, 0.0  ;;  %v4902_v27 = vmax.f32 %v4862_v60, 0.0  ;;  %v5305_v39 = vunpack.c.l.b16 %v4941_v61 }
 0x842   : > { %5541 = vmatpush.bf16.msra.mxu0 %v7216_v38 }
 0x843   : > { %v4922_v50 = vmax.f32 %v4901_v15, %v4902_v27 }
 0x844   : > { %5455 = vmatpush.bf16.msra.mxu3 %v7209_v54 }
 0x845   : > { %v4932_v29 = vmax.f32 %v4920_v18, %v4922_v50 }
 0x846   : > { %5542 = vmatpush.bf16.msra.mxu0 %v7215_v26 }
 0x847   : > { %v4942_v43 = vpack.c.bf16 %v4932_v29, %v4932_v29 }
 0x848   : > { %5456 = vmatpush.bf16.msra.mxu3 %v7208_v6 }
 0x849   : > { %v5306_v25 = vunpack.c.l.b16 %v4942_v43 }
 0x84a   : > { %v5107_v32 = vpop.f32.mrf.mxu1 }
 0x84b   : > { %v5307_v23 = vpack.c.b16 %v5306_v25, %v5305_v39 }
 0x84c   : > { %5457 = vmatpush.bf16.msra.mxu3 %v7207_v49 }
 0x84d   : > { %5365 = vmatmul.bf16.vlgmr.msra.gmra.mxu2 %v5307_v23 }
 0x852   : > { %v5109_v41 = vpop.f32.mrf.mxu1 }
 0x86a   : > { %v5039_v20 = vpop.f32.mrf.mxu0 }
 0x86b   : > { %v5108_v19 = vadd.f32 %v5107_v32, %v5039_v20 }
 0x872   : > { %v5041_v34 = vpop.f32.mrf.mxu0 }
 0x873   : > { %v5110_v44 = vadd.f32 %v5109_v41, %v5041_v34 }
 0x88a   : > { %v5192_v36 = vpop.f32.mrf.mxu0 }
 0x88b   : > { %v5197_v7 = vadd.f32 %v5192_v36, %v5108_v19 }
 0x892   : > { %v5194_v52 = vpop.f32.mrf.mxu0 }
 0x893   : > { %v5198_v47 = vadd.f32 %v5194_v52, %v5110_v44 }
 0x8aa   : > { %v5279_v48 = vpop.f32.mrf.mxu1 }
 0x8ab   : > { %v5284_v5 = vadd.f32 %v5279_v48, %v5197_v7 }
 0x8b2   : > { %v5281_v62 = vpop.f32.mrf.mxu1 }
 0x8b3   : > { %v5285_v57 = vadd.f32 %v5281_v62, %v5198_v47 }
 0x8d0   : > { %v5366_v10 = vpop.f32.mrf.mxu2 }
 0x8d1   : > { %v5371_v58 = vadd.f32 %v5366_v10, %v5284_v5 }
 0x8d3   : > { %v5377_v4 = vadd.f32 %v7253_v51, %v5371_v58 }
 0x8d5   : > { %v5379_v63 = vmax.f32 %v5377_v4, 0.0 }
 0x8d8   : > { %v5368_v40 = vpop.f32.mrf.mxu2 }
 0x8d9   : > { %v5372_v59 = vadd.f32 %v5368_v40, %v5285_v57 }
 0x8db   : > { %v5378_v55 = vadd.f32 %v7253_v51, %v5372_v59 }
 0x8dd   : > { %v5380_v18 = vmax.f32 %v5378_v55, 0.0 }
 0x8df   : > { %v5381_v42 = vpack.c.bf16 %v5380_v18, %v5379_v63 }
 0x8e1   : > { %5458 = vmatmul.bf16.vlgmr.msra.gmra.mxu3 %v5381_v42 }
 0x964   : > { %v5459_v31 = vpop.f32.mrf.mxu3 }
 0x965   : > { %v5460_v2 = vadd.f32 %v7254_v56, %v5459_v31 }
 0x967   : > { %v5464_v30 = vmax.f32 %v5460_v2, 0.0 }
 0x96c   : > { %v5461_v46 = vpop.f32.mrf.mxu3 }
 0x96d   : > { %v5462_v17 = vadd.f32 %v7254_v56, %v5461_v46 }
 0x96f   : > { %v5465_v14 = vmax.f32 %v5462_v17, 0.0 }
 0x971   : > { %v5466_v37 = vpack.c.bf16 %v5465_v14, %v5464_v30 }
 0x973   : > { %5543 = vmatmul.bf16.vlgmr.msra.gmra.mxu0 %v5466_v37 }
 0x9f0   : > { %v5544_v21 = vpop.f32.mrf.mxu0 }
 0x9f1   : > { %v5545_v1 = vadd.f32 %v7255_v22, %v5544_v21 }
 0x9f3   : > { %5549 = vst [vmem:[%s683_s15] sm:$0xff] %v5545_v1 }
 0x9f8   : > { %v5546_v13 = vpop.f32.mrf.mxu0 }
 0x9f9   : > { %v5547_v0 = vadd.f32 %v7255_v22, %v5546_v13 }
 0x9fb   : > { %5550 = vst [vmem:[%s683_s15 + $0x8] sm:$0xff] %v5547_v0 }
 0x9fc PF: > { %p18_p9 = scmp.ge.s32.totalorder %s7410_s21, 4   ;;  %s10915_s17 = smov %s7327_s18 }
 0x9fd   : > { %s10916_s18 = smov %s7419_s24  ;;  %s10917_s19 = smov %s7410_s21 }
 0x9fe   :  { %20 = sbr.rel (!%p18_p9) target bundleno = 2 (0x2), region = 152 }

</bundles_post_ra>
